<compile_context>
chip_gen: v7x
topology: tpu7x:2x2x1
jax: 0.10.0
libtpu: 0.0.40
codegen_flags: <defaults>
</compile_context>

<pallas_src>
import functools

import jax
import jax.numpy as jnp
import numpy as np
from jax import lax
from jax.experimental import pallas as pl
from jax.experimental.pallas import tpu as pltpu


def _crop_kernel(coords_ref, img_ref, out_ref, *, H, W, Ht, Wt):
    """One block of BB batch elements per grid step; batch packed into lanes.

    coords_ref: VMEM (2, BB)  float32   row 0 = x, row 1 = y
    img_ref:    VMEM (W, H, BB) float32 (input transposed so batch is lanes)
    out_ref:    VMEM (Ht, Wt, BB) int32
    """
    BB = out_ref.shape[-1]

    x_c = coords_ref[0:1, :]          # (1, BB)
    y_c = coords_ref[1:2, :]          # (1, BB)

    # grid_sample(align_corners=True) source pixel coordinates, algebraically:
    #   ix[j, b] = j - Wt//2 + x[b] - W//2 + (W-1)/2
    #   iy[i, b] = i - Ht//2 + y[b] - H//2 + (H-1)/2
    off_x = -(Wt // 2) - (W // 2) + (W - 1) / 2.0
    off_y = -(Ht // 2) - (H // 2) + (H - 1) / 2.0

    # Coordinate-independent iotas built once per 128-element block.
    j_sub = lax.broadcasted_iota(jnp.int32, (Wt, BB), 0).astype(jnp.float32)
    i_sub = lax.broadcasted_iota(jnp.int32, (Ht, BB), 0).astype(jnp.float32)
    ix = j_sub + x_c + off_x          # (Wt, BB)
    iy = i_sub + y_c + off_y          # (Ht, BB)

    # Separable bilinear tap weight of source column w for output column j is
    # relu(1 - |ix[j] - w|); out-of-range taps vanish -> zeros padding.

    # Phase 1: reduce over source columns w (pure VPU, batch in lanes):
    #   colred[h, j, b] = sum_w img[b, h, w] * relu(1 - |ix[j, b] - w|)
    colred = jnp.zeros((H, Wt, BB), jnp.float32)
    for w in range(W):
        wx_w = jnp.maximum(0.0, 1.0 - jnp.abs(ix - float(w)))     # (Wt, BB)
        img_w = img_ref[w]                                        # (H, BB)
        colred = colred + img_w[:, None, :] * wx_w[None, :, :]

    # Phase 2: reduce over source rows h:
    #   acc[i, j, b] = sum_h relu(1 - |iy[i, b] - h|) * colred[h, j, b]
    acc = jnp.zeros((Ht, Wt, BB), jnp.float32)
    for h in range(H):
        wy_h = jnp.maximum(0.0, 1.0 - jnp.abs(iy - float(h)))     # (Ht, BB)
        acc = acc + wy_h[:, None, :] * colred[h][None, :, :]

    # torch.round is round-half-to-even; so is jnp.round.
    out_ref[...] = jnp.round(acc).astype(jnp.int32)


def crop(inputs, coordinates, *, height_target, width_target, block_b=128):
    """Pallas equivalent of Crop(height, width, height_target, width_target)."""
    B, H, W = inputs.shape
    Ht, Wt = height_target, width_target

    BB = block_b
    Bp = ((B + BB - 1) // BB) * BB

    x = inputs.astype(jnp.float32)
    c = coordinates.astype(jnp.float32)
    if Bp != B:
        x = jnp.pad(x, ((0, Bp - B), (0, 0), (0, 0)))
        c = jnp.pad(c, ((0, Bp - B), (0, 0)))

    # Put batch in the lane dimension: lane-dense loads, compute and stores.
    img_t = jnp.transpose(x, (2, 1, 0))      # (W, H, Bp)
    coords_t = jnp.transpose(c, (1, 0))      # (2, Bp)

    kernel = functools.partial(_crop_kernel, H=H, W=W, Ht=Ht, Wt=Wt)

    grid_spec = pltpu.PrefetchScalarGridSpec(
        num_scalar_prefetch=0,
        grid=(Bp // BB,),
        in_specs=[
            pl.BlockSpec((2, BB), lambda b: (0, b)),
            pl.BlockSpec((W, H, BB), lambda b: (0, 0, b)),
        ],
        out_specs=pl.BlockSpec((Ht, Wt, BB), lambda b: (0, 0, b)),
    )

    out_t = pl.pallas_call(
        kernel,
        out_shape=jax.ShapeDtypeStruct((Ht, Wt, Bp), jnp.int32),
        grid_spec=grid_spec,
        compiler_params=pltpu.CompilerParams(
            dimension_semantics=("parallel",)),
    )(coords_t, img_t)

    return jnp.transpose(out_t, (2, 0, 1))[:B]


def crop_reference(inputs, coordinates, *, height_target, width_target):
    """Pure-JAX reference reproducing grid_sample(bilinear, zeros, align_corners=True)."""
    B, H, W = inputs.shape
    Ht, Wt = height_target, width_target
    x = coordinates[:, 0].astype(jnp.float32)
    y = coordinates[:, 1].astype(jnp.float32)

    j = jnp.arange(Wt, dtype=jnp.float32)
    i = jnp.arange(Ht, dtype=jnp.float32)
    ix = j[None, :] - (Wt // 2) + x[:, None] - (W // 2) + (W - 1) / 2.0   # (B, Wt)
    iy = i[None, :] - (Ht // 2) + y[:, None] - (H // 2) + (H - 1) / 2.0   # (B, Ht)

    x0 = jnp.floor(ix)
    y0 = jnp.floor(iy)
    wx1 = ix - x0
    wy1 = iy - y0

    def gather(yy, xx):
        yv = yy[:, :, None]
        xv = xx[:, None, :]
        valid = (yv >= 0) & (yv < H) & (xv >= 0) & (xv < W)
        yc = jnp.clip(yv, 0, H - 1).astype(jnp.int32)
        xc = jnp.clip(xv, 0, W - 1).astype(jnp.int32)
        vals = jax.vmap(lambda img, yi, xi: img[yi, xi])(inputs, yc, xc)
        return jnp.where(valid, vals, 0.0)

    out = (
        (1 - wy1)[:, :, None] * (1 - wx1)[:, None, :] * gather(y0, x0)
        + (1 - wy1)[:, :, None] * wx1[:, None, :] * gather(y0, x0 + 1)
        + wy1[:, :, None] * (1 - wx1)[:, None, :] * gather(y0 + 1, x0)
        + wy1[:, :, None] * wx1[:, None, :] * gather(y0 + 1, x0 + 1)
    )
    return jnp.round(out).astype(jnp.int32)


if __name__ == "__main__":
    # Small shapes consistent with the module: full map 16x16, crop 8x8.
    B, H, W = 2, 16, 16
    Ht, Wt = 8, 8

    key = jax.random.PRNGKey(0)
    k_in, k_xy = jax.random.split(key)
    inputs = (jax.random.uniform(k_in, (B, H, W), dtype=jnp.float32) * 20.0)
    # Coordinates (x, y); one near the border to exercise zero padding.
    coordinates = jnp.array([[3, 12], [15, 0]], dtype=jnp.int32)

    out = crop(inputs, coordinates, height_target=Ht, width_target=Wt)
    out = jax.block_until_ready(out)

    ref = crop_reference(inputs, coordinates, height_target=Ht, width_target=Wt)
    np.testing.assert_array_equal(np.asarray(out), np.asarray(ref))

    print("KERNEL_OK")
</pallas_src>

<mosaic_0001>
module attributes {stable_mosaic.version = 11 : i64} {
  func.func @_crop_kernel(%arg0: i32, %arg1: memref<2x128xf32, #tpu.memory_space<vmem>>, %arg2: memref<16x16x128xf32, #tpu.memory_space<vmem>>, %arg3: memref<8x8x128xi32, #tpu.memory_space<vmem>>) attributes {dimension_semantics = [#tpu.dimension_semantics<parallel>], iteration_bounds = array<i64: 1>, scalar_prefetch = 0 : i64, scratch_operands = 0 : i64, tpu.core_type = #tpu.core_type<tc>, window_params = [{transform_indices = @transform_0, window_bounds = array<i64: 2, 128>}, {transform_indices = @transform_1, window_bounds = array<i64: 16, 16, 128>}, {transform_indices = @transform_2, window_bounds = array<i64: 8, 8, 128>}]} {
    %c0 = arith.constant 0 : index
    %c0_0 = arith.constant 0 : index
    %0 = vector.load %arg1[%c0, %c0_0] : memref<2x128xf32, #tpu.memory_space<vmem>>, vector<1x128xf32>
    %c1 = arith.constant 1 : index
    %c0_1 = arith.constant 0 : index
    %1 = vector.load %arg1[%c1, %c0_1] : memref<2x128xf32, #tpu.memory_space<vmem>>, vector<1x128xf32>
    %2 = tpu.iota {dimensions = array<i32: 0>} : vector<8x128xi32>
    %3 = arith.sitofp %2 : vector<8x128xi32> to vector<8x128xf32>
    %4 = tpu.iota {dimensions = array<i32: 0>} : vector<8x128xi32>
    %5 = arith.sitofp %4 : vector<8x128xi32> to vector<8x128xf32>
    %6 = vector.broadcast %0 : vector<1x128xf32> to vector<8x128xf32>
    %7 = arith.addf %3, %6 : vector<8x128xf32>
    %cst = arith.constant -4.500000e+00 : f32
    %8 = vector.broadcast %cst : f32 to vector<8x128xf32>
    %9 = arith.addf %7, %8 : vector<8x128xf32>
    %10 = vector.broadcast %1 : vector<1x128xf32> to vector<8x128xf32>
    %11 = arith.addf %5, %10 : vector<8x128xf32>
    %cst_2 = arith.constant -4.500000e+00 : f32
    %12 = vector.broadcast %cst_2 : f32 to vector<8x128xf32>
    %13 = arith.addf %11, %12 : vector<8x128xf32>
    %cst_3 = arith.constant 0.000000e+00 : f32
    %14 = vector.broadcast %cst_3 : f32 to vector<16x8x128xf32>
    %cst_4 = arith.constant 0.000000e+00 : f32
    %15 = vector.broadcast %cst_4 : f32 to vector<8x128xf32>
    %16 = arith.subf %9, %15 : vector<8x128xf32>
    %17 = math.absf %16 : vector<8x128xf32>
    %cst_5 = arith.constant 1.000000e+00 : f32
    %18 = vector.broadcast %cst_5 : f32 to vector<8x128xf32>
    %19 = arith.subf %18, %17 : vector<8x128xf32>
    %cst_6 = arith.constant 0.000000e+00 : f32
    %20 = vector.broadcast %cst_6 : f32 to vector<8x128xf32>
    %21 = arith.maximumf %20, %19 : vector<8x128xf32>
    %c0_7 = arith.constant 0 : index
    %c0_8 = arith.constant 0 : index
    %c0_9 = arith.constant 0 : index
    %22 = vector.load %arg2[%c0_7, %c0_8, %c0_9] : memref<16x16x128xf32, #tpu.memory_space<vmem>>, vector<1x16x128xf32>
    %23 = vector.shape_cast %22 : vector<1x16x128xf32> to vector<16x128xf32>
    %24 = vector.shape_cast %23 : vector<16x128xf32> to vector<16x1x128xf32>
    %25 = vector.shape_cast %21 : vector<8x128xf32> to vector<1x8x128xf32>
    %26 = vector.broadcast %24 : vector<16x1x128xf32> to vector<16x8x128xf32>
    %27 = vector.broadcast %25 : vector<1x8x128xf32> to vector<16x8x128xf32>
    %28 = arith.mulf %26, %27 : vector<16x8x128xf32>
    %29 = arith.addf %14, %28 : vector<16x8x128xf32>
    %cst_10 = arith.constant 1.000000e+00 : f32
    %30 = vector.broadcast %cst_10 : f32 to vector<8x128xf32>
    %31 = arith.subf %9, %30 : vector<8x128xf32>
    %32 = math.absf %31 : vector<8x128xf32>
    %cst_11 = arith.constant 1.000000e+00 : f32
    %33 = vector.broadcast %cst_11 : f32 to vector<8x128xf32>
    %34 = arith.subf %33, %32 : vector<8x128xf32>
    %cst_12 = arith.constant 0.000000e+00 : f32
    %35 = vector.broadcast %cst_12 : f32 to vector<8x128xf32>
    %36 = arith.maximumf %35, %34 : vector<8x128xf32>
    %c1_13 = arith.constant 1 : index
    %c0_14 = arith.constant 0 : index
    %c0_15 = arith.constant 0 : index
    %37 = vector.load %arg2[%c1_13, %c0_14, %c0_15] : memref<16x16x128xf32, #tpu.memory_space<vmem>>, vector<1x16x128xf32>
    %38 = vector.shape_cast %37 : vector<1x16x128xf32> to vector<16x128xf32>
    %39 = vector.shape_cast %38 : vector<16x128xf32> to vector<16x1x128xf32>
    %40 = vector.shape_cast %36 : vector<8x128xf32> to vector<1x8x128xf32>
    %41 = vector.broadcast %39 : vector<16x1x128xf32> to vector<16x8x128xf32>
    %42 = vector.broadcast %40 : vector<1x8x128xf32> to vector<16x8x128xf32>
    %43 = arith.mulf %41, %42 : vector<16x8x128xf32>
    %44 = arith.addf %29, %43 : vector<16x8x128xf32>
    %cst_16 = arith.constant 2.000000e+00 : f32
    %45 = vector.broadcast %cst_16 : f32 to vector<8x128xf32>
    %46 = arith.subf %9, %45 : vector<8x128xf32>
    %47 = math.absf %46 : vector<8x128xf32>
    %cst_17 = arith.constant 1.000000e+00 : f32
    %48 = vector.broadcast %cst_17 : f32 to vector<8x128xf32>
    %49 = arith.subf %48, %47 : vector<8x128xf32>
    %cst_18 = arith.constant 0.000000e+00 : f32
    %50 = vector.broadcast %cst_18 : f32 to vector<8x128xf32>
    %51 = arith.maximumf %50, %49 : vector<8x128xf32>
    %c2 = arith.constant 2 : index
    %c0_19 = arith.constant 0 : index
    %c0_20 = arith.constant 0 : index
    %52 = vector.load %arg2[%c2, %c0_19, %c0_20] : memref<16x16x128xf32, #tpu.memory_space<vmem>>, vector<1x16x128xf32>
    %53 = vector.shape_cast %52 : vector<1x16x128xf32> to vector<16x128xf32>
    %54 = vector.shape_cast %53 : vector<16x128xf32> to vector<16x1x128xf32>
    %55 = vector.shape_cast %51 : vector<8x128xf32> to vector<1x8x128xf32>
    %56 = vector.broadcast %54 : vector<16x1x128xf32> to vector<16x8x128xf32>
    %57 = vector.broadcast %55 : vector<1x8x128xf32> to vector<16x8x128xf32>
    %58 = arith.mulf %56, %57 : vector<16x8x128xf32>
    %59 = arith.addf %44, %58 : vector<16x8x128xf32>
    %cst_21 = arith.constant 3.000000e+00 : f32
    %60 = vector.broadcast %cst_21 : f32 to vector<8x128xf32>
    %61 = arith.subf %9, %60 : vector<8x128xf32>
    %62 = math.absf %61 : vector<8x128xf32>
    %cst_22 = arith.constant 1.000000e+00 : f32
    %63 = vector.broadcast %cst_22 : f32 to vector<8x128xf32>
    %64 = arith.subf %63, %62 : vector<8x128xf32>
    %cst_23 = arith.constant 0.000000e+00 : f32
    %65 = vector.broadcast %cst_23 : f32 to vector<8x128xf32>
    %66 = arith.maximumf %65, %64 : vector<8x128xf32>
    %c3 = arith.constant 3 : index
    %c0_24 = arith.constant 0 : index
    %c0_25 = arith.constant 0 : index
    %67 = vector.load %arg2[%c3, %c0_24, %c0_25] : memref<16x16x128xf32, #tpu.memory_space<vmem>>, vector<1x16x128xf32>
    %68 = vector.shape_cast %67 : vector<1x16x128xf32> to vector<16x128xf32>
    %69 = vector.shape_cast %68 : vector<16x128xf32> to vector<16x1x128xf32>
    %70 = vector.shape_cast %66 : vector<8x128xf32> to vector<1x8x128xf32>
    %71 = vector.broadcast %69 : vector<16x1x128xf32> to vector<16x8x128xf32>
    %72 = vector.broadcast %70 : vector<1x8x128xf32> to vector<16x8x128xf32>
    %73 = arith.mulf %71, %72 : vector<16x8x128xf32>
    %74 = arith.addf %59, %73 : vector<16x8x128xf32>
    %cst_26 = arith.constant 4.000000e+00 : f32
    %75 = vector.broadcast %cst_26 : f32 to vector<8x128xf32>
    %76 = arith.subf %9, %75 : vector<8x128xf32>
    %77 = math.absf %76 : vector<8x128xf32>
    %cst_27 = arith.constant 1.000000e+00 : f32
    %78 = vector.broadcast %cst_27 : f32 to vector<8x128xf32>
    %79 = arith.subf %78, %77 : vector<8x128xf32>
    %cst_28 = arith.constant 0.000000e+00 : f32
    %80 = vector.broadcast %cst_28 : f32 to vector<8x128xf32>
    %81 = arith.maximumf %80, %79 : vector<8x128xf32>
    %c4 = arith.constant 4 : index
    %c0_29 = arith.constant 0 : index
    %c0_30 = arith.constant 0 : index
    %82 = vector.load %arg2[%c4, %c0_29, %c0_30] : memref<16x16x128xf32, #tpu.memory_space<vmem>>, vector<1x16x128xf32>
    %83 = vector.shape_cast %82 : vector<1x16x128xf32> to vector<16x128xf32>
    %84 = vector.shape_cast %83 : vector<16x128xf32> to vector<16x1x128xf32>
    %85 = vector.shape_cast %81 : vector<8x128xf32> to vector<1x8x128xf32>
    %86 = vector.broadcast %84 : vector<16x1x128xf32> to vector<16x8x128xf32>
    %87 = vector.broadcast %85 : vector<1x8x128xf32> to vector<16x8x128xf32>
    %88 = arith.mulf %86, %87 : vector<16x8x128xf32>
    %89 = arith.addf %74, %88 : vector<16x8x128xf32>
    %cst_31 = arith.constant 5.000000e+00 : f32
    %90 = vector.broadcast %cst_31 : f32 to vector<8x128xf32>
    %91 = arith.subf %9, %90 : vector<8x128xf32>
    %92 = math.absf %91 : vector<8x128xf32>
    %cst_32 = arith.constant 1.000000e+00 : f32
    %93 = vector.broadcast %cst_32 : f32 to vector<8x128xf32>
    %94 = arith.subf %93, %92 : vector<8x128xf32>
    %cst_33 = arith.constant 0.000000e+00 : f32
    %95 = vector.broadcast %cst_33 : f32 to vector<8x128xf32>
    %96 = arith.maximumf %95, %94 : vector<8x128xf32>
    %c5 = arith.constant 5 : index
    %c0_34 = arith.constant 0 : index
    %c0_35 = arith.constant 0 : index
    %97 = vector.load %arg2[%c5, %c0_34, %c0_35] : memref<16x16x128xf32, #tpu.memory_space<vmem>>, vector<1x16x128xf32>
    %98 = vector.shape_cast %97 : vector<1x16x128xf32> to vector<16x128xf32>
    %99 = vector.shape_cast %98 : vector<16x128xf32> to vector<16x1x128xf32>
    %100 = vector.shape_cast %96 : vector<8x128xf32> to vector<1x8x128xf32>
    %101 = vector.broadcast %99 : vector<16x1x128xf32> to vector<16x8x128xf32>
    %102 = vector.broadcast %100 : vector<1x8x128xf32> to vector<16x8x128xf32>
    %103 = arith.mulf %101, %102 : vector<16x8x128xf32>
    %104 = arith.addf %89, %103 : vector<16x8x128xf32>
    %cst_36 = arith.constant 6.000000e+00 : f32
    %105 = vector.broadcast %cst_36 : f32 to vector<8x128xf32>
    %106 = arith.subf %9, %105 : vector<8x128xf32>
    %107 = math.absf %106 : vector<8x128xf32>
    %cst_37 = arith.constant 1.000000e+00 : f32
    %108 = vector.broadcast %cst_37 : f32 to vector<8x128xf32>
    %109 = arith.subf %108, %107 : vector<8x128xf32>
    %cst_38 = arith.constant 0.000000e+00 : f32
    %110 = vector.broadcast %cst_38 : f32 to vector<8x128xf32>
    %111 = arith.maximumf %110, %109 : vector<8x128xf32>
    %c6 = arith.constant 6 : index
    %c0_39 = arith.constant 0 : index
    %c0_40 = arith.constant 0 : index
    %112 = vector.load %arg2[%c6, %c0_39, %c0_40] : memref<16x16x128xf32, #tpu.memory_space<vmem>>, vector<1x16x128xf32>
    %113 = vector.shape_cast %112 : vector<1x16x128xf32> to vector<16x128xf32>
    %114 = vector.shape_cast %113 : vector<16x128xf32> to vector<16x1x128xf32>
    %115 = vector.shape_cast %111 : vector<8x128xf32> to vector<1x8x128xf32>
    %116 = vector.broadcast %114 : vector<16x1x128xf32> to vector<16x8x128xf32>
    %117 = vector.broadcast %115 : vector<1x8x128xf32> to vector<16x8x128xf32>
    %118 = arith.mulf %116, %117 : vector<16x8x128xf32>
    %119 = arith.addf %104, %118 : vector<16x8x128xf32>
    %cst_41 = arith.constant 7.000000e+00 : f32
    %120 = vector.broadcast %cst_41 : f32 to vector<8x128xf32>
    %121 = arith.subf %9, %120 : vector<8x128xf32>
    %122 = math.absf %121 : vector<8x128xf32>
    %cst_42 = arith.constant 1.000000e+00 : f32
    %123 = vector.broadcast %cst_42 : f32 to vector<8x128xf32>
    %124 = arith.subf %123, %122 : vector<8x128xf32>
    %cst_43 = arith.constant 0.000000e+00 : f32
    %125 = vector.broadcast %cst_43 : f32 to vector<8x128xf32>
    %126 = arith.maximumf %125, %124 : vector<8x128xf32>
    %c7 = arith.constant 7 : index
    %c0_44 = arith.constant 0 : index
    %c0_45 = arith.constant 0 : index
    %127 = vector.load %arg2[%c7, %c0_44, %c0_45] : memref<16x16x128xf32, #tpu.memory_space<vmem>>, vector<1x16x128xf32>
    %128 = vector.shape_cast %127 : vector<1x16x128xf32> to vector<16x128xf32>
    %129 = vector.shape_cast %128 : vector<16x128xf32> to vector<16x1x128xf32>
    %130 = vector.shape_cast %126 : vector<8x128xf32> to vector<1x8x128xf32>
    %131 = vector.broadcast %129 : vector<16x1x128xf32> to vector<16x8x128xf32>
    %132 = vector.broadcast %130 : vector<1x8x128xf32> to vector<16x8x128xf32>
    %133 = arith.mulf %131, %132 : vector<16x8x128xf32>
    %134 = arith.addf %119, %133 : vector<16x8x128xf32>
    %cst_46 = arith.constant 8.000000e+00 : f32
    %135 = vector.broadcast %cst_46 : f32 to vector<8x128xf32>
    %136 = arith.subf %9, %135 : vector<8x128xf32>
    %137 = math.absf %136 : vector<8x128xf32>
    %cst_47 = arith.constant 1.000000e+00 : f32
    %138 = vector.broadcast %cst_47 : f32 to vector<8x128xf32>
    %139 = arith.subf %138, %137 : vector<8x128xf32>
    %cst_48 = arith.constant 0.000000e+00 : f32
    %140 = vector.broadcast %cst_48 : f32 to vector<8x128xf32>
    %141 = arith.maximumf %140, %139 : vector<8x128xf32>
    %c8 = arith.constant 8 : index
    %c0_49 = arith.constant 0 : index
    %c0_50 = arith.constant 0 : index
    %142 = vector.load %arg2[%c8, %c0_49, %c0_50] : memref<16x16x128xf32, #tpu.memory_space<vmem>>, vector<1x16x128xf32>
    %143 = vector.shape_cast %142 : vector<1x16x128xf32> to vector<16x128xf32>
    %144 = vector.shape_cast %143 : vector<16x128xf32> to vector<16x1x128xf32>
    %145 = vector.shape_cast %141 : vector<8x128xf32> to vector<1x8x128xf32>
    %146 = vector.broadcast %144 : vector<16x1x128xf32> to vector<16x8x128xf32>
    %147 = vector.broadcast %145 : vector<1x8x128xf32> to vector<16x8x128xf32>
    %148 = arith.mulf %146, %147 : vector<16x8x128xf32>
    %149 = arith.addf %134, %148 : vector<16x8x128xf32>
    %cst_51 = arith.constant 9.000000e+00 : f32
    %150 = vector.broadcast %cst_51 : f32 to vector<8x128xf32>
    %151 = arith.subf %9, %150 : vector<8x128xf32>
    %152 = math.absf %151 : vector<8x128xf32>
    %cst_52 = arith.constant 1.000000e+00 : f32
    %153 = vector.broadcast %cst_52 : f32 to vector<8x128xf32>
    %154 = arith.subf %153, %152 : vector<8x128xf32>
    %cst_53 = arith.constant 0.000000e+00 : f32
    %155 = vector.broadcast %cst_53 : f32 to vector<8x128xf32>
    %156 = arith.maximumf %155, %154 : vector<8x128xf32>
    %c9 = arith.constant 9 : index
    %c0_54 = arith.constant 0 : index
    %c0_55 = arith.constant 0 : index
    %157 = vector.load %arg2[%c9, %c0_54, %c0_55] : memref<16x16x128xf32, #tpu.memory_space<vmem>>, vector<1x16x128xf32>
    %158 = vector.shape_cast %157 : vector<1x16x128xf32> to vector<16x128xf32>
    %159 = vector.shape_cast %158 : vector<16x128xf32> to vector<16x1x128xf32>
    %160 = vector.shape_cast %156 : vector<8x128xf32> to vector<1x8x128xf32>
    %161 = vector.broadcast %159 : vector<16x1x128xf32> to vector<16x8x128xf32>
    %162 = vector.broadcast %160 : vector<1x8x128xf32> to vector<16x8x128xf32>
    %163 = arith.mulf %161, %162 : vector<16x8x128xf32>
    %164 = arith.addf %149, %163 : vector<16x8x128xf32>
    %cst_56 = arith.constant 1.000000e+01 : f32
    %165 = vector.broadcast %cst_56 : f32 to vector<8x128xf32>
    %166 = arith.subf %9, %165 : vector<8x128xf32>
    %167 = math.absf %166 : vector<8x128xf32>
    %cst_57 = arith.constant 1.000000e+00 : f32
    %168 = vector.broadcast %cst_57 : f32 to vector<8x128xf32>
    %169 = arith.subf %168, %167 : vector<8x128xf32>
    %cst_58 = arith.constant 0.000000e+00 : f32
    %170 = vector.broadcast %cst_58 : f32 to vector<8x128xf32>
    %171 = arith.maximumf %170, %169 : vector<8x128xf32>
    %c10 = arith.constant 10 : index
    %c0_59 = arith.constant 0 : index
    %c0_60 = arith.constant 0 : index
    %172 = vector.load %arg2[%c10, %c0_59, %c0_60] : memref<16x16x128xf32, #tpu.memory_space<vmem>>, vector<1x16x128xf32>
    %173 = vector.shape_cast %172 : vector<1x16x128xf32> to vector<16x128xf32>
    %174 = vector.shape_cast %173 : vector<16x128xf32> to vector<16x1x128xf32>
    %175 = vector.shape_cast %171 : vector<8x128xf32> to vector<1x8x128xf32>
    %176 = vector.broadcast %174 : vector<16x1x128xf32> to vector<16x8x128xf32>
    %177 = vector.broadcast %175 : vector<1x8x128xf32> to vector<16x8x128xf32>
    %178 = arith.mulf %176, %177 : vector<16x8x128xf32>
    %179 = arith.addf %164, %178 : vector<16x8x128xf32>
    %cst_61 = arith.constant 1.100000e+01 : f32
    %180 = vector.broadcast %cst_61 : f32 to vector<8x128xf32>
    %181 = arith.subf %9, %180 : vector<8x128xf32>
    %182 = math.absf %181 : vector<8x128xf32>
    %cst_62 = arith.constant 1.000000e+00 : f32
    %183 = vector.broadcast %cst_62 : f32 to vector<8x128xf32>
    %184 = arith.subf %183, %182 : vector<8x128xf32>
    %cst_63 = arith.constant 0.000000e+00 : f32
    %185 = vector.broadcast %cst_63 : f32 to vector<8x128xf32>
    %186 = arith.maximumf %185, %184 : vector<8x128xf32>
    %c11 = arith.constant 11 : index
    %c0_64 = arith.constant 0 : index
    %c0_65 = arith.constant 0 : index
    %187 = vector.load %arg2[%c11, %c0_64, %c0_65] : memref<16x16x128xf32, #tpu.memory_space<vmem>>, vector<1x16x128xf32>
    %188 = vector.shape_cast %187 : vector<1x16x128xf32> to vector<16x128xf32>
    %189 = vector.shape_cast %188 : vector<16x128xf32> to vector<16x1x128xf32>
    %190 = vector.shape_cast %186 : vector<8x128xf32> to vector<1x8x128xf32>
    %191 = vector.broadcast %189 : vector<16x1x128xf32> to vector<16x8x128xf32>
    %192 = vector.broadcast %190 : vector<1x8x128xf32> to vector<16x8x128xf32>
    %193 = arith.mulf %191, %192 : vector<16x8x128xf32>
    %194 = arith.addf %179, %193 : vector<16x8x128xf32>
    %cst_66 = arith.constant 1.200000e+01 : f32
    %195 = vector.broadcast %cst_66 : f32 to vector<8x128xf32>
    %196 = arith.subf %9, %195 : vector<8x128xf32>
    %197 = math.absf %196 : vector<8x128xf32>
    %cst_67 = arith.constant 1.000000e+00 : f32
    %198 = vector.broadcast %cst_67 : f32 to vector<8x128xf32>
    %199 = arith.subf %198, %197 : vector<8x128xf32>
    %cst_68 = arith.constant 0.000000e+00 : f32
    %200 = vector.broadcast %cst_68 : f32 to vector<8x128xf32>
    %201 = arith.maximumf %200, %199 : vector<8x128xf32>
    %c12 = arith.constant 12 : index
    %c0_69 = arith.constant 0 : index
    %c0_70 = arith.constant 0 : index
    %202 = vector.load %arg2[%c12, %c0_69, %c0_70] : memref<16x16x128xf32, #tpu.memory_space<vmem>>, vector<1x16x128xf32>
    %203 = vector.shape_cast %202 : vector<1x16x128xf32> to vector<16x128xf32>
    %204 = vector.shape_cast %203 : vector<16x128xf32> to vector<16x1x128xf32>
    %205 = vector.shape_cast %201 : vector<8x128xf32> to vector<1x8x128xf32>
    %206 = vector.broadcast %204 : vector<16x1x128xf32> to vector<16x8x128xf32>
    %207 = vector.broadcast %205 : vector<1x8x128xf32> to vector<16x8x128xf32>
    %208 = arith.mulf %206, %207 : vector<16x8x128xf32>
    %209 = arith.addf %194, %208 : vector<16x8x128xf32>
    %cst_71 = arith.constant 1.300000e+01 : f32
    %210 = vector.broadcast %cst_71 : f32 to vector<8x128xf32>
    %211 = arith.subf %9, %210 : vector<8x128xf32>
    %212 = math.absf %211 : vector<8x128xf32>
    %cst_72 = arith.constant 1.000000e+00 : f32
    %213 = vector.broadcast %cst_72 : f32 to vector<8x128xf32>
    %214 = arith.subf %213, %212 : vector<8x128xf32>
    %cst_73 = arith.constant 0.000000e+00 : f32
    %215 = vector.broadcast %cst_73 : f32 to vector<8x128xf32>
    %216 = arith.maximumf %215, %214 : vector<8x128xf32>
    %c13 = arith.constant 13 : index
    %c0_74 = arith.constant 0 : index
    %c0_75 = arith.constant 0 : index
    %217 = vector.load %arg2[%c13, %c0_74, %c0_75] : memref<16x16x128xf32, #tpu.memory_space<vmem>>, vector<1x16x128xf32>
    %218 = vector.shape_cast %217 : vector<1x16x128xf32> to vector<16x128xf32>
    %219 = vector.shape_cast %218 : vector<16x128xf32> to vector<16x1x128xf32>
    %220 = vector.shape_cast %216 : vector<8x128xf32> to vector<1x8x128xf32>
    %221 = vector.broadcast %219 : vector<16x1x128xf32> to vector<16x8x128xf32>
    %222 = vector.broadcast %220 : vector<1x8x128xf32> to vector<16x8x128xf32>
    %223 = arith.mulf %221, %222 : vector<16x8x128xf32>
    %224 = arith.addf %209, %223 : vector<16x8x128xf32>
    %cst_76 = arith.constant 1.400000e+01 : f32
    %225 = vector.broadcast %cst_76 : f32 to vector<8x128xf32>
    %226 = arith.subf %9, %225 : vector<8x128xf32>
    %227 = math.absf %226 : vector<8x128xf32>
    %cst_77 = arith.constant 1.000000e+00 : f32
    %228 = vector.broadcast %cst_77 : f32 to vector<8x128xf32>
    %229 = arith.subf %228, %227 : vector<8x128xf32>
    %cst_78 = arith.constant 0.000000e+00 : f32
    %230 = vector.broadcast %cst_78 : f32 to vector<8x128xf32>
    %231 = arith.maximumf %230, %229 : vector<8x128xf32>
    %c14 = arith.constant 14 : index
    %c0_79 = arith.constant 0 : index
    %c0_80 = arith.constant 0 : index
    %232 = vector.load %arg2[%c14, %c0_79, %c0_80] : memref<16x16x128xf32, #tpu.memory_space<vmem>>, vector<1x16x128xf32>
    %233 = vector.shape_cast %232 : vector<1x16x128xf32> to vector<16x128xf32>
    %234 = vector.shape_cast %233 : vector<16x128xf32> to vector<16x1x128xf32>
    %235 = vector.shape_cast %231 : vector<8x128xf32> to vector<1x8x128xf32>
    %236 = vector.broadcast %234 : vector<16x1x128xf32> to vector<16x8x128xf32>
    %237 = vector.broadcast %235 : vector<1x8x128xf32> to vector<16x8x128xf32>
    %238 = arith.mulf %236, %237 : vector<16x8x128xf32>
    %239 = arith.addf %224, %238 : vector<16x8x128xf32>
    %cst_81 = arith.constant 1.500000e+01 : f32
    %240 = vector.broadcast %cst_81 : f32 to vector<8x128xf32>
    %241 = arith.subf %9, %240 : vector<8x128xf32>
    %242 = math.absf %241 : vector<8x128xf32>
    %cst_82 = arith.constant 1.000000e+00 : f32
    %243 = vector.broadcast %cst_82 : f32 to vector<8x128xf32>
    %244 = arith.subf %243, %242 : vector<8x128xf32>
    %cst_83 = arith.constant 0.000000e+00 : f32
    %245 = vector.broadcast %cst_83 : f32 to vector<8x128xf32>
    %246 = arith.maximumf %245, %244 : vector<8x128xf32>
    %c15 = arith.constant 15 : index
    %c0_84 = arith.constant 0 : index
    %c0_85 = arith.constant 0 : index
    %247 = vector.load %arg2[%c15, %c0_84, %c0_85] : memref<16x16x128xf32, #tpu.memory_space<vmem>>, vector<1x16x128xf32>
    %248 = vector.shape_cast %247 : vector<1x16x128xf32> to vector<16x128xf32>
    %249 = vector.shape_cast %248 : vector<16x128xf32> to vector<16x1x128xf32>
    %250 = vector.shape_cast %246 : vector<8x128xf32> to vector<1x8x128xf32>
    %251 = vector.broadcast %249 : vector<16x1x128xf32> to vector<16x8x128xf32>
    %252 = vector.broadcast %250 : vector<1x8x128xf32> to vector<16x8x128xf32>
    %253 = arith.mulf %251, %252 : vector<16x8x128xf32>
    %254 = arith.addf %239, %253 : vector<16x8x128xf32>
    %cst_86 = arith.constant 0.000000e+00 : f32
    %255 = vector.broadcast %cst_86 : f32 to vector<8x8x128xf32>
    %cst_87 = arith.constant 0.000000e+00 : f32
    %256 = vector.broadcast %cst_87 : f32 to vector<8x128xf32>
    %257 = arith.subf %13, %256 : vector<8x128xf32>
    %258 = math.absf %257 : vector<8x128xf32>
    %cst_88 = arith.constant 1.000000e+00 : f32
    %259 = vector.broadcast %cst_88 : f32 to vector<8x128xf32>
    %260 = arith.subf %259, %258 : vector<8x128xf32>
    %cst_89 = arith.constant 0.000000e+00 : f32
    %261 = vector.broadcast %cst_89 : f32 to vector<8x128xf32>
    %262 = arith.maximumf %261, %260 : vector<8x128xf32>
    %263 = vector.shape_cast %262 : vector<8x128xf32> to vector<8x1x128xf32>
    %264 = vector.extract_strided_slice %254 {offsets = [0, 0, 0], sizes = [1, 8, 128], strides = [1, 1, 1]} : vector<16x8x128xf32> to vector<1x8x128xf32>
    %265 = vector.shape_cast %264 : vector<1x8x128xf32> to vector<8x128xf32>
    %266 = vector.shape_cast %265 : vector<8x128xf32> to vector<1x8x128xf32>
    %267 = vector.broadcast %263 : vector<8x1x128xf32> to vector<8x8x128xf32>
    %268 = vector.broadcast %266 : vector<1x8x128xf32> to vector<8x8x128xf32>
    %269 = arith.mulf %267, %268 : vector<8x8x128xf32>
    %270 = arith.addf %255, %269 : vector<8x8x128xf32>
    %cst_90 = arith.constant 1.000000e+00 : f32
    %271 = vector.broadcast %cst_90 : f32 to vector<8x128xf32>
    %272 = arith.subf %13, %271 : vector<8x128xf32>
    %273 = math.absf %272 : vector<8x128xf32>
    %cst_91 = arith.constant 1.000000e+00 : f32
    %274 = vector.broadcast %cst_91 : f32 to vector<8x128xf32>
    %275 = arith.subf %274, %273 : vector<8x128xf32>
    %cst_92 = arith.constant 0.000000e+00 : f32
    %276 = vector.broadcast %cst_92 : f32 to vector<8x128xf32>
    %277 = arith.maximumf %276, %275 : vector<8x128xf32>
    %278 = vector.shape_cast %277 : vector<8x128xf32> to vector<8x1x128xf32>
    %279 = vector.extract_strided_slice %254 {offsets = [1, 0, 0], sizes = [1, 8, 128], strides = [1, 1, 1]} : vector<16x8x128xf32> to vector<1x8x128xf32>
    %280 = vector.shape_cast %279 : vector<1x8x128xf32> to vector<8x128xf32>
    %281 = vector.shape_cast %280 : vector<8x128xf32> to vector<1x8x128xf32>
    %282 = vector.broadcast %278 : vector<8x1x128xf32> to vector<8x8x128xf32>
    %283 = vector.broadcast %281 : vector<1x8x128xf32> to vector<8x8x128xf32>
    %284 = arith.mulf %282, %283 : vector<8x8x128xf32>
    %285 = arith.addf %270, %284 : vector<8x8x128xf32>
    %cst_93 = arith.constant 2.000000e+00 : f32
    %286 = vector.broadcast %cst_93 : f32 to vector<8x128xf32>
    %287 = arith.subf %13, %286 : vector<8x128xf32>
    %288 = math.absf %287 : vector<8x128xf32>
    %cst_94 = arith.constant 1.000000e+00 : f32
    %289 = vector.broadcast %cst_94 : f32 to vector<8x128xf32>
    %290 = arith.subf %289, %288 : vector<8x128xf32>
    %cst_95 = arith.constant 0.000000e+00 : f32
    %291 = vector.broadcast %cst_95 : f32 to vector<8x128xf32>
    %292 = arith.maximumf %291, %290 : vector<8x128xf32>
    %293 = vector.shape_cast %292 : vector<8x128xf32> to vector<8x1x128xf32>
    %294 = vector.extract_strided_slice %254 {offsets = [2, 0, 0], sizes = [1, 8, 128], strides = [1, 1, 1]} : vector<16x8x128xf32> to vector<1x8x128xf32>
    %295 = vector.shape_cast %294 : vector<1x8x128xf32> to vector<8x128xf32>
    %296 = vector.shape_cast %295 : vector<8x128xf32> to vector<1x8x128xf32>
    %297 = vector.broadcast %293 : vector<8x1x128xf32> to vector<8x8x128xf32>
    %298 = vector.broadcast %296 : vector<1x8x128xf32> to vector<8x8x128xf32>
    %299 = arith.mulf %297, %298 : vector<8x8x128xf32>
    %300 = arith.addf %285, %299 : vector<8x8x128xf32>
    %cst_96 = arith.constant 3.000000e+00 : f32
    %301 = vector.broadcast %cst_96 : f32 to vector<8x128xf32>
    %302 = arith.subf %13, %301 : vector<8x128xf32>
    %303 = math.absf %302 : vector<8x128xf32>
    %cst_97 = arith.constant 1.000000e+00 : f32
    %304 = vector.broadcast %cst_97 : f32 to vector<8x128xf32>
    %305 = arith.subf %304, %303 : vector<8x128xf32>
    %cst_98 = arith.constant 0.000000e+00 : f32
    %306 = vector.broadcast %cst_98 : f32 to vector<8x128xf32>
    %307 = arith.maximumf %306, %305 : vector<8x128xf32>
    %308 = vector.shape_cast %307 : vector<8x128xf32> to vector<8x1x128xf32>
    %309 = vector.extract_strided_slice %254 {offsets = [3, 0, 0], sizes = [1, 8, 128], strides = [1, 1, 1]} : vector<16x8x128xf32> to vector<1x8x128xf32>
    %310 = vector.shape_cast %309 : vector<1x8x128xf32> to vector<8x128xf32>
    %311 = vector.shape_cast %310 : vector<8x128xf32> to vector<1x8x128xf32>
    %312 = vector.broadcast %308 : vector<8x1x128xf32> to vector<8x8x128xf32>
    %313 = vector.broadcast %311 : vector<1x8x128xf32> to vector<8x8x128xf32>
    %314 = arith.mulf %312, %313 : vector<8x8x128xf32>
    %315 = arith.addf %300, %314 : vector<8x8x128xf32>
    %cst_99 = arith.constant 4.000000e+00 : f32
    %316 = vector.broadcast %cst_99 : f32 to vector<8x128xf32>
    %317 = arith.subf %13, %316 : vector<8x128xf32>
    %318 = math.absf %317 : vector<8x128xf32>
    %cst_100 = arith.constant 1.000000e+00 : f32
    %319 = vector.broadcast %cst_100 : f32 to vector<8x128xf32>
    %320 = arith.subf %319, %318 : vector<8x128xf32>
    %cst_101 = arith.constant 0.000000e+00 : f32
    %321 = vector.broadcast %cst_101 : f32 to vector<8x128xf32>
    %322 = arith.maximumf %321, %320 : vector<8x128xf32>
    %323 = vector.shape_cast %322 : vector<8x128xf32> to vector<8x1x128xf32>
    %324 = vector.extract_strided_slice %254 {offsets = [4, 0, 0], sizes = [1, 8, 128], strides = [1, 1, 1]} : vector<16x8x128xf32> to vector<1x8x128xf32>
    %325 = vector.shape_cast %324 : vector<1x8x128xf32> to vector<8x128xf32>
    %326 = vector.shape_cast %325 : vector<8x128xf32> to vector<1x8x128xf32>
    %327 = vector.broadcast %323 : vector<8x1x128xf32> to vector<8x8x128xf32>
    %328 = vector.broadcast %326 : vector<1x8x128xf32> to vector<8x8x128xf32>
    %329 = arith.mulf %327, %328 : vector<8x8x128xf32>
    %330 = arith.addf %315, %329 : vector<8x8x128xf32>
    %cst_102 = arith.constant 5.000000e+00 : f32
    %331 = vector.broadcast %cst_102 : f32 to vector<8x128xf32>
    %332 = arith.subf %13, %331 : vector<8x128xf32>
    %333 = math.absf %332 : vector<8x128xf32>
    %cst_103 = arith.constant 1.000000e+00 : f32
    %334 = vector.broadcast %cst_103 : f32 to vector<8x128xf32>
    %335 = arith.subf %334, %333 : vector<8x128xf32>
    %cst_104 = arith.constant 0.000000e+00 : f32
    %336 = vector.broadcast %cst_104 : f32 to vector<8x128xf32>
    %337 = arith.maximumf %336, %335 : vector<8x128xf32>
    %338 = vector.shape_cast %337 : vector<8x128xf32> to vector<8x1x128xf32>
    %339 = vector.extract_strided_slice %254 {offsets = [5, 0, 0], sizes = [1, 8, 128], strides = [1, 1, 1]} : vector<16x8x128xf32> to vector<1x8x128xf32>
    %340 = vector.shape_cast %339 : vector<1x8x128xf32> to vector<8x128xf32>
    %341 = vector.shape_cast %340 : vector<8x128xf32> to vector<1x8x128xf32>
    %342 = vector.broadcast %338 : vector<8x1x128xf32> to vector<8x8x128xf32>
    %343 = vector.broadcast %341 : vector<1x8x128xf32> to vector<8x8x128xf32>
    %344 = arith.mulf %342, %343 : vector<8x8x128xf32>
    %345 = arith.addf %330, %344 : vector<8x8x128xf32>
    %cst_105 = arith.constant 6.000000e+00 : f32
    %346 = vector.broadcast %cst_105 : f32 to vector<8x128xf32>
    %347 = arith.subf %13, %346 : vector<8x128xf32>
    %348 = math.absf %347 : vector<8x128xf32>
    %cst_106 = arith.constant 1.000000e+00 : f32
    %349 = vector.broadcast %cst_106 : f32 to vector<8x128xf32>
    %350 = arith.subf %349, %348 : vector<8x128xf32>
    %cst_107 = arith.constant 0.000000e+00 : f32
    %351 = vector.broadcast %cst_107 : f32 to vector<8x128xf32>
    %352 = arith.maximumf %351, %350 : vector<8x128xf32>
    %353 = vector.shape_cast %352 : vector<8x128xf32> to vector<8x1x128xf32>
    %354 = vector.extract_strided_slice %254 {offsets = [6, 0, 0], sizes = [1, 8, 128], strides = [1, 1, 1]} : vector<16x8x128xf32> to vector<1x8x128xf32>
    %355 = vector.shape_cast %354 : vector<1x8x128xf32> to vector<8x128xf32>
    %356 = vector.shape_cast %355 : vector<8x128xf32> to vector<1x8x128xf32>
    %357 = vector.broadcast %353 : vector<8x1x128xf32> to vector<8x8x128xf32>
    %358 = vector.broadcast %356 : vector<1x8x128xf32> to vector<8x8x128xf32>
    %359 = arith.mulf %357, %358 : vector<8x8x128xf32>
    %360 = arith.addf %345, %359 : vector<8x8x128xf32>
    %cst_108 = arith.constant 7.000000e+00 : f32
    %361 = vector.broadcast %cst_108 : f32 to vector<8x128xf32>
    %362 = arith.subf %13, %361 : vector<8x128xf32>
    %363 = math.absf %362 : vector<8x128xf32>
    %cst_109 = arith.constant 1.000000e+00 : f32
    %364 = vector.broadcast %cst_109 : f32 to vector<8x128xf32>
    %365 = arith.subf %364, %363 : vector<8x128xf32>
    %cst_110 = arith.constant 0.000000e+00 : f32
    %366 = vector.broadcast %cst_110 : f32 to vector<8x128xf32>
    %367 = arith.maximumf %366, %365 : vector<8x128xf32>
    %368 = vector.shape_cast %367 : vector<8x128xf32> to vector<8x1x128xf32>
    %369 = vector.extract_strided_slice %254 {offsets = [7, 0, 0], sizes = [1, 8, 128], strides = [1, 1, 1]} : vector<16x8x128xf32> to vector<1x8x128xf32>
    %370 = vector.shape_cast %369 : vector<1x8x128xf32> to vector<8x128xf32>
    %371 = vector.shape_cast %370 : vector<8x128xf32> to vector<1x8x128xf32>
    %372 = vector.broadcast %368 : vector<8x1x128xf32> to vector<8x8x128xf32>
    %373 = vector.broadcast %371 : vector<1x8x128xf32> to vector<8x8x128xf32>
    %374 = arith.mulf %372, %373 : vector<8x8x128xf32>
    %375 = arith.addf %360, %374 : vector<8x8x128xf32>
    %cst_111 = arith.constant 8.000000e+00 : f32
    %376 = vector.broadcast %cst_111 : f32 to vector<8x128xf32>
    %377 = arith.subf %13, %376 : vector<8x128xf32>
    %378 = math.absf %377 : vector<8x128xf32>
    %cst_112 = arith.constant 1.000000e+00 : f32
    %379 = vector.broadcast %cst_112 : f32 to vector<8x128xf32>
    %380 = arith.subf %379, %378 : vector<8x128xf32>
    %cst_113 = arith.constant 0.000000e+00 : f32
    %381 = vector.broadcast %cst_113 : f32 to vector<8x128xf32>
    %382 = arith.maximumf %381, %380 : vector<8x128xf32>
    %383 = vector.shape_cast %382 : vector<8x128xf32> to vector<8x1x128xf32>
    %384 = vector.extract_strided_slice %254 {offsets = [8, 0, 0], sizes = [1, 8, 128], strides = [1, 1, 1]} : vector<16x8x128xf32> to vector<1x8x128xf32>
    %385 = vector.shape_cast %384 : vector<1x8x128xf32> to vector<8x128xf32>
    %386 = vector.shape_cast %385 : vector<8x128xf32> to vector<1x8x128xf32>
    %387 = vector.broadcast %383 : vector<8x1x128xf32> to vector<8x8x128xf32>
    %388 = vector.broadcast %386 : vector<1x8x128xf32> to vector<8x8x128xf32>
    %389 = arith.mulf %387, %388 : vector<8x8x128xf32>
    %390 = arith.addf %375, %389 : vector<8x8x128xf32>
    %cst_114 = arith.constant 9.000000e+00 : f32
    %391 = vector.broadcast %cst_114 : f32 to vector<8x128xf32>
    %392 = arith.subf %13, %391 : vector<8x128xf32>
    %393 = math.absf %392 : vector<8x128xf32>
    %cst_115 = arith.constant 1.000000e+00 : f32
    %394 = vector.broadcast %cst_115 : f32 to vector<8x128xf32>
    %395 = arith.subf %394, %393 : vector<8x128xf32>
    %cst_116 = arith.constant 0.000000e+00 : f32
    %396 = vector.broadcast %cst_116 : f32 to vector<8x128xf32>
    %397 = arith.maximumf %396, %395 : vector<8x128xf32>
    %398 = vector.shape_cast %397 : vector<8x128xf32> to vector<8x1x128xf32>
    %399 = vector.extract_strided_slice %254 {offsets = [9, 0, 0], sizes = [1, 8, 128], strides = [1, 1, 1]} : vector<16x8x128xf32> to vector<1x8x128xf32>
    %400 = vector.shape_cast %399 : vector<1x8x128xf32> to vector<8x128xf32>
    %401 = vector.shape_cast %400 : vector<8x128xf32> to vector<1x8x128xf32>
    %402 = vector.broadcast %398 : vector<8x1x128xf32> to vector<8x8x128xf32>
    %403 = vector.broadcast %401 : vector<1x8x128xf32> to vector<8x8x128xf32>
    %404 = arith.mulf %402, %403 : vector<8x8x128xf32>
    %405 = arith.addf %390, %404 : vector<8x8x128xf32>
    %cst_117 = arith.constant 1.000000e+01 : f32
    %406 = vector.broadcast %cst_117 : f32 to vector<8x128xf32>
    %407 = arith.subf %13, %406 : vector<8x128xf32>
    %408 = math.absf %407 : vector<8x128xf32>
    %cst_118 = arith.constant 1.000000e+00 : f32
    %409 = vector.broadcast %cst_118 : f32 to vector<8x128xf32>
    %410 = arith.subf %409, %408 : vector<8x128xf32>
    %cst_119 = arith.constant 0.000000e+00 : f32
    %411 = vector.broadcast %cst_119 : f32 to vector<8x128xf32>
    %412 = arith.maximumf %411, %410 : vector<8x128xf32>
    %413 = vector.shape_cast %412 : vector<8x128xf32> to vector<8x1x128xf32>
    %414 = vector.extract_strided_slice %254 {offsets = [10, 0, 0], sizes = [1, 8, 128], strides = [1, 1, 1]} : vector<16x8x128xf32> to vector<1x8x128xf32>
    %415 = vector.shape_cast %414 : vector<1x8x128xf32> to vector<8x128xf32>
    %416 = vector.shape_cast %415 : vector<8x128xf32> to vector<1x8x128xf32>
    %417 = vector.broadcast %413 : vector<8x1x128xf32> to vector<8x8x128xf32>
    %418 = vector.broadcast %416 : vector<1x8x128xf32> to vector<8x8x128xf32>
    %419 = arith.mulf %417, %418 : vector<8x8x128xf32>
    %420 = arith.addf %405, %419 : vector<8x8x128xf32>
    %cst_120 = arith.constant 1.100000e+01 : f32
    %421 = vector.broadcast %cst_120 : f32 to vector<8x128xf32>
    %422 = arith.subf %13, %421 : vector<8x128xf32>
    %423 = math.absf %422 : vector<8x128xf32>
    %cst_121 = arith.constant 1.000000e+00 : f32
    %424 = vector.broadcast %cst_121 : f32 to vector<8x128xf32>
    %425 = arith.subf %424, %423 : vector<8x128xf32>
    %cst_122 = arith.constant 0.000000e+00 : f32
    %426 = vector.broadcast %cst_122 : f32 to vector<8x128xf32>
    %427 = arith.maximumf %426, %425 : vector<8x128xf32>
    %428 = vector.shape_cast %427 : vector<8x128xf32> to vector<8x1x128xf32>
    %429 = vector.extract_strided_slice %254 {offsets = [11, 0, 0], sizes = [1, 8, 128], strides = [1, 1, 1]} : vector<16x8x128xf32> to vector<1x8x128xf32>
    %430 = vector.shape_cast %429 : vector<1x8x128xf32> to vector<8x128xf32>
    %431 = vector.shape_cast %430 : vector<8x128xf32> to vector<1x8x128xf32>
    %432 = vector.broadcast %428 : vector<8x1x128xf32> to vector<8x8x128xf32>
    %433 = vector.broadcast %431 : vector<1x8x128xf32> to vector<8x8x128xf32>
    %434 = arith.mulf %432, %433 : vector<8x8x128xf32>
    %435 = arith.addf %420, %434 : vector<8x8x128xf32>
    %cst_123 = arith.constant 1.200000e+01 : f32
    %436 = vector.broadcast %cst_123 : f32 to vector<8x128xf32>
    %437 = arith.subf %13, %436 : vector<8x128xf32>
    %438 = math.absf %437 : vector<8x128xf32>
    %cst_124 = arith.constant 1.000000e+00 : f32
    %439 = vector.broadcast %cst_124 : f32 to vector<8x128xf32>
    %440 = arith.subf %439, %438 : vector<8x128xf32>
    %cst_125 = arith.constant 0.000000e+00 : f32
    %441 = vector.broadcast %cst_125 : f32 to vector<8x128xf32>
    %442 = arith.maximumf %441, %440 : vector<8x128xf32>
    %443 = vector.shape_cast %442 : vector<8x128xf32> to vector<8x1x128xf32>
    %444 = vector.extract_strided_slice %254 {offsets = [12, 0, 0], sizes = [1, 8, 128], strides = [1, 1, 1]} : vector<16x8x128xf32> to vector<1x8x128xf32>
    %445 = vector.shape_cast %444 : vector<1x8x128xf32> to vector<8x128xf32>
    %446 = vector.shape_cast %445 : vector<8x128xf32> to vector<1x8x128xf32>
    %447 = vector.broadcast %443 : vector<8x1x128xf32> to vector<8x8x128xf32>
    %448 = vector.broadcast %446 : vector<1x8x128xf32> to vector<8x8x128xf32>
    %449 = arith.mulf %447, %448 : vector<8x8x128xf32>
    %450 = arith.addf %435, %449 : vector<8x8x128xf32>
    %cst_126 = arith.constant 1.300000e+01 : f32
    %451 = vector.broadcast %cst_126 : f32 to vector<8x128xf32>
    %452 = arith.subf %13, %451 : vector<8x128xf32>
    %453 = math.absf %452 : vector<8x128xf32>
    %cst_127 = arith.constant 1.000000e+00 : f32
    %454 = vector.broadcast %cst_127 : f32 to vector<8x128xf32>
    %455 = arith.subf %454, %453 : vector<8x128xf32>
    %cst_128 = arith.constant 0.000000e+00 : f32
    %456 = vector.broadcast %cst_128 : f32 to vector<8x128xf32>
    %457 = arith.maximumf %456, %455 : vector<8x128xf32>
    %458 = vector.shape_cast %457 : vector<8x128xf32> to vector<8x1x128xf32>
    %459 = vector.extract_strided_slice %254 {offsets = [13, 0, 0], sizes = [1, 8, 128], strides = [1, 1, 1]} : vector<16x8x128xf32> to vector<1x8x128xf32>
    %460 = vector.shape_cast %459 : vector<1x8x128xf32> to vector<8x128xf32>
    %461 = vector.shape_cast %460 : vector<8x128xf32> to vector<1x8x128xf32>
    %462 = vector.broadcast %458 : vector<8x1x128xf32> to vector<8x8x128xf32>
    %463 = vector.broadcast %461 : vector<1x8x128xf32> to vector<8x8x128xf32>
    %464 = arith.mulf %462, %463 : vector<8x8x128xf32>
    %465 = arith.addf %450, %464 : vector<8x8x128xf32>
    %cst_129 = arith.constant 1.400000e+01 : f32
    %466 = vector.broadcast %cst_129 : f32 to vector<8x128xf32>
    %467 = arith.subf %13, %466 : vector<8x128xf32>
    %468 = math.absf %467 : vector<8x128xf32>
    %cst_130 = arith.constant 1.000000e+00 : f32
    %469 = vector.broadcast %cst_130 : f32 to vector<8x128xf32>
    %470 = arith.subf %469, %468 : vector<8x128xf32>
    %cst_131 = arith.constant 0.000000e+00 : f32
    %471 = vector.broadcast %cst_131 : f32 to vector<8x128xf32>
    %472 = arith.maximumf %471, %470 : vector<8x128xf32>
    %473 = vector.shape_cast %472 : vector<8x128xf32> to vector<8x1x128xf32>
    %474 = vector.extract_strided_slice %254 {offsets = [14, 0, 0], sizes = [1, 8, 128], strides = [1, 1, 1]} : vector<16x8x128xf32> to vector<1x8x128xf32>
    %475 = vector.shape_cast %474 : vector<1x8x128xf32> to vector<8x128xf32>
    %476 = vector.shape_cast %475 : vector<8x128xf32> to vector<1x8x128xf32>
    %477 = vector.broadcast %473 : vector<8x1x128xf32> to vector<8x8x128xf32>
    %478 = vector.broadcast %476 : vector<1x8x128xf32> to vector<8x8x128xf32>
    %479 = arith.mulf %477, %478 : vector<8x8x128xf32>
    %480 = arith.addf %465, %479 : vector<8x8x128xf32>
    %cst_132 = arith.constant 1.500000e+01 : f32
    %481 = vector.broadcast %cst_132 : f32 to vector<8x128xf32>
    %482 = arith.subf %13, %481 : vector<8x128xf32>
    %483 = math.absf %482 : vector<8x128xf32>
    %cst_133 = arith.constant 1.000000e+00 : f32
    %484 = vector.broadcast %cst_133 : f32 to vector<8x128xf32>
    %485 = arith.subf %484, %483 : vector<8x128xf32>
    %cst_134 = arith.constant 0.000000e+00 : f32
    %486 = vector.broadcast %cst_134 : f32 to vector<8x128xf32>
    %487 = arith.maximumf %486, %485 : vector<8x128xf32>
    %488 = vector.shape_cast %487 : vector<8x128xf32> to vector<8x1x128xf32>
    %489 = vector.extract_strided_slice %254 {offsets = [15, 0, 0], sizes = [1, 8, 128], strides = [1, 1, 1]} : vector<16x8x128xf32> to vector<1x8x128xf32>
    %490 = vector.shape_cast %489 : vector<1x8x128xf32> to vector<8x128xf32>
    %491 = vector.shape_cast %490 : vector<8x128xf32> to vector<1x8x128xf32>
    %492 = vector.broadcast %488 : vector<8x1x128xf32> to vector<8x8x128xf32>
    %493 = vector.broadcast %491 : vector<1x8x128xf32> to vector<8x8x128xf32>
    %494 = arith.mulf %492, %493 : vector<8x8x128xf32>
    %495 = arith.addf %480, %494 : vector<8x8x128xf32>
    %496 = math.roundeven %495 : vector<8x8x128xf32>
    %497 = arith.fptosi %496 : vector<8x8x128xf32> to vector<8x8x128xi32>
    %c0_135 = arith.constant 0 : index
    %c0_136 = arith.constant 0 : index
    %c0_137 = arith.constant 0 : index
    %498 = vector.load %arg3[%c0_135, %c0_136, %c0_137] : memref<8x8x128xi32, #tpu.memory_space<vmem>>, vector<8x8x128xi32>
    tpu.vector_store %arg3[%c0_135, %c0_136, %c0_137], %497 {strides = array<i32>} : memref<8x8x128xi32, #tpu.memory_space<vmem>>, vector<8x8x128xi32>,
    return
  }
  func.func @transform_0(%arg0: i32) -> (i32, i32) {
    %c0_i32 = arith.constant 0 : i32
    %c0_i32_0 = arith.constant 0 : i32
    return %c0_i32, %arg0 : i32, i32
  }
  func.func @transform_1(%arg0: i32) -> (i32, i32, i32) {
    %c0_i32 = arith.constant 0 : i32
    %c0_i32_0 = arith.constant 0 : i32
    %c0_i32_1 = arith.constant 0 : i32
    return %c0_i32, %c0_i32_0, %arg0 : i32, i32, i32
  }
  func.func @transform_2(%arg0: i32) -> (i32, i32, i32) {
    %c0_i32 = arith.constant 0 : i32
    %c0_i32_0 = arith.constant 0 : i32
    %c0_i32_1 = arith.constant 0 : i32
    return %c0_i32, %c0_i32_0, %arg0 : i32, i32, i32
  }
}

</mosaic_0001>

<bundles_post_ra>
// kernel: tpu_custom_call.1
= control target key start
LH: loop header
LB: loop body
LE: loop exit
PB: predicated region body
PF: predicated region fallthrough
CT: control target
= control target key end

     0   :  { %7 = vsyncpa [#allocation3], 0  ;;  %s7246_s0 = inlined_call_operand.hbm [shape: f32[2,128], index: 0, kind: input, shape index: {}]   ;;  %s7247_s1 = inlined_call_operand.hbm [shape: f32[16,16,128], index: 1, kind: input, shape index: {}]   ;;  %s7248_s2 = inlined_call_operand.hbm [shape: s32[8,8,128], index: 2, kind: output, shape index: {}]  }
   0x1   :  { %8 = vsyncpa [#allocation6], 0 }
   0x2   :  { %9 = vsyncpa [#allocation4], 0  ;;  %s5516_s9 = smov [#allocation2]   ;;  %s5517_s11 = smov [#allocation5]  }
   0x3   :  { %s16_s10 = sshll.u32 %s5516_s9, 4  ;;  %s25_s12 = sshll.u32 %s5517_s11, 4  ;;  %s17_s10 = int_to_ptr.vmem [resolvable:$true] %s16_s10  ;;  %s5537_s12 = int_to_ptr.vmem [resolvable:$true] %s25_s12 }
   0x4   :  { %s5444_s15 = scalar_lea.hbm %s7246_s0, 32 }
   0x5   :  { %p5445_p0 = scmp.ne.s32.totalorder %s7246_s0, %s5444_s15  ;;  %p5448_p1 = scmp.lt.u32.totalorder %s5444_s15, %s7246_s0 }
   0x7   :  { %p5450_p2 = pnand %p5448_p1, %p5445_p0 }
   0x9   :  { %5453 = shalt.err (!%p5450_p2)
}
   0xa   :  { %s5454_s20 = scalar_lea.vmem %s17_s10, 32  ;;  %p5459_p4 = scmp.lt.s32.totalorder %s17_s10, %s17_s10 }
   0xb   :  { %p5455_p3 = scmp.ne.s32.totalorder %s17_s10, %s5454_s20  ;;  %p5460_p5 = scmp.lt.s32.totalorder %s5454_s20, %s5454_s20 }
   0xd   :  { %p5461_p6 = por %p5460_p5, %p5459_p4 }
   0xf   :  { %p5462_p7 = pnand %p5461_p6, %p5455_p3 }
  0x11   :  { %5465 = shalt.err (!%p5462_p7)
}
  0x12   :  { %19 = dma.hbm_to_vmem [thread:$0]  %s7246_s0, 32, %s17_s10, [#allocation3]  }
  0x13   :  { %s5466_s25 = scalar_lea.hbm %s7247_s1, 4096 }
  0x14   :  { %p5467_p8 = scmp.ne.s32.totalorder %s7247_s1, %s5466_s25  ;;  %p5470_p9 = scmp.lt.u32.totalorder %s5466_s25, %s7247_s1 }
  0x16   :  { %p5472_p10 = pnand %p5470_p9, %p5467_p8 }
  0x18   :  { %5475 = shalt.err (!%p5472_p10)
}
  0x19   :  { %s5476_s30 = scalar_lea.vmem %s5537_s12, 4096  ;;  %p5481_p12 = scmp.lt.s32.totalorder %s5537_s12, %s5537_s12 }
  0x1a   :  { %p5477_p11 = scmp.ne.s32.totalorder %s5537_s12, %s5476_s30  ;;  %p5482_p13 = scmp.lt.s32.totalorder %s5476_s30, %s5476_s30 }
  0x1c   :  { %p5483_p0 = por %p5482_p13, %p5481_p12 }
  0x1e   :  { %p5484_p1 = pnand %p5483_p0, %p5477_p11 }
  0x20   :  { %5487 = shalt.err (!%p5484_p1)
}
  0x21   :  { %s5518_s0 = smov 128   ;;  %s5519_s3 = smov 8  }
  0x22   :  { %31 = dma.hbm_to_vmem [thread:$0]  %s7247_s1, 4096, %s5537_s12, [#allocation6], %s5518_s0, %s5518_s0, %s5519_s3  }
  0x23   :  { %5510 = dma.done.wait [#allocation3], 32  }
  0x24   :  { %5511 = vsyncadd [#allocation3], 4294967264 }
  0x25   :  { %5512 = dma.done.wait [#allocation6], 4096  }
  0x26   :  { %5513 = vsyncadd [#allocation6], 4294963200  ;;  %v40_v0 = vlaneseq  ;;  %v5520_v1 = vmov 1966171168   ;;  %v5350_v7 = vld [vmem:[#allocation2] ss:$0 sm:$0xff] }
  0x27   :  { %v64_v2 = vunpack.c.l.s4 %v5520_v1  ;;  %v58_v8 = vld [vmem:[#allocation5] sm:$0xff]  ;;  %v59_v10 = vld [vmem:[#allocation5 + $0x8] sm:$0xff]  ;;  %v5351_v18 = vld [vmem:[#allocation2 + $0x1] ss:$0 sm:$0xff]  ;;  %s5521_s1 = smov [#allocation7]  }
  0x28   :  { %v41_v3 = vshrl.u32 %v40_v0, 7  ;;  %v62_v11 = vcombine.high %v58_v8, %v58_v8  ;;  %v111_v13 = vcombine.high %v59_v10, %v59_v10  ;;  %v277_v25 = vld [vmem:[#allocation5 + $0x10] sm:$0xff]  ;;  %s5337_s6 = sshll.u32 %s5521_s1, 4  ;;  %s5338_s6 = int_to_ptr.vmem [resolvable:$true] %s5337_s6 }
  0x29   :  { %v65_v4 = vunpack.c.0.s8 %v64_v2  ;;  %v281_v29 = vcombine.high %v277_v25, %v277_v25  ;;  %v278_v2 = vld [vmem:[#allocation5 + $0x18] sm:$0xff]  ;;  %s5488_s7 = scalar_lea.vmem %s5338_s6, 1024  ;;  %p5493_p3 = scmp.lt.s32.totalorder %s5338_s6, %s5338_s6 }
  0x2a   :  { %v42_v5 = vcvt.s32.f32 %v41_v3  ;;  %v5582_v28 = vsub.s32 0, %v41_v3  ;;  %p5489_p2 = scmp.ne.s32.totalorder %s5338_s6, %s5488_s7  ;;  %p5494_p4 = scmp.lt.s32.totalorder %s5488_s7, %s5488_s7 }
  0x2b   :  { %v5571_v6 = vsub.s32 %v65_v4, %v41_v3 }
  0x2c   :  { %v47_v9 = vadd.f32 %v5350_v7, %v42_v5  ;;  %v53_v26 = vadd.f32 %v5351_v18, %v42_v5  ;;  %p5495_p5 = por %p5494_p4, %p5493_p3 }
  0x2d   :  { %v69_v12 = vrot.slane %v58_v8, %v5571_v6  ;;  %v118_v14 = vrot.slane %v59_v10, %v5571_v6  ;;  %v76_v16 = vrot.slane %v62_v11, %v5571_v6  ;;  %v125_v19 = vrot.slane %v111_v13, %v5571_v6 }
  0x2e   :  { %v5575_v15 = vadd.f32 -4.5, %v47_v9  ;;  %v288_v41 = vrot.slane %v277_v25, %v5571_v6  ;;  %v5591_v42 = vadd.f32 -4.5, %v53_v26  ;;  %v295_v9 = vrot.slane %v281_v29, %v5571_v6  ;;  %p5496_p6 = pnand %p5495_p5, %p5489_p2 }
  0x2f   :  { %v77_v17 = vcombine.high %v69_v12, %v69_v12  ;;  %v78_v21 = vcombine.high %v76_v16, %v76_v16  ;;  %v85_v22 = vrot.slane %v69_v12, %v5571_v6  ;;  %v126_v23 = vcombine.high %v118_v14, %v118_v14 }
  0x30   :  { %v55_v20 = vand.u32 2147483647, %v5575_v15  ;;  %v127_v24 = vcombine.high %v125_v19, %v125_v19  ;;  %v92_v31 = vrot.slane %v76_v16, %v5571_v6  ;;  %v134_v33 = vrot.slane %v118_v14, %v5571_v6 }
  0x31   :  { %v99_v27 = vrot.slane %v77_v17, %v5571_v6  ;;  %v106_v32 = vrot.slane %v78_v21, %v5571_v6  ;;  %v107_v34 = vcombine.high %v85_v22, %v85_v22  ;;  %v141_v36 = vrot.slane %v125_v19, %v5571_v6 }
  0x32   :  { %v56_v30 = vsub.f32 1.0, %v55_v20  ;;  %v148_v37 = vrot.slane %v126_v23, %v5571_v6  ;;  %v108_v38 = vcombine.high %v92_v31, %v92_v31  ;;  %v155_v40 = vrot.slane %v127_v24, %v5571_v6 }
  0x33   :  { %v109_v35 = vcombine.high %v99_v27, %v99_v27  ;;  %v110_v39 = vcombine.high %v106_v32, %v106_v32  ;;  %v156_v43 = vcombine.high %v134_v33, %v134_v33  ;;  %v157_v44 = vcombine.high %v141_v36, %v141_v36 }
  0x34   :  { %v158_v45 = vcombine.high %v148_v37, %v148_v37  ;;  %v57_v46 = vmax.f32 %v56_v30, 0.0  ;;  %v159_v47 = vcombine.high %v155_v40, %v155_v40  ;;  %v163_v48 = vrot.slane %v85_v22, %v5582_v28 }
  0x35   :  { %v167_v49 = vrot.slane %v99_v27, %v5582_v28  ;;  %v171_v50 = vrot.slane %v107_v34, %v5582_v28  ;;  %v175_v51 = vrot.slane %v109_v35, %v5582_v28  ;;  %v179_v52 = vrot.slane %v92_v31, %v5582_v28 }
  0x36   :  { %v183_v53 = vrot.slane %v106_v32, %v5582_v28  ;;  %v187_v54 = vrot.slane %v108_v38, %v5582_v28  ;;  %v191_v55 = vrot.slane %v110_v39, %v5582_v28  ;;  %v195_v56 = vrot.slane %v134_v33, %v5582_v28 }
  0x37   :  { %v199_v57 = vrot.slane %v148_v37, %v5582_v28  ;;  %v203_v58 = vrot.slane %v156_v43, %v5582_v28  ;;  %v207_v59 = vrot.slane %v158_v45, %v5582_v28  ;;  %v211_v60 = vrot.slane %v141_v36, %v5582_v28 }
  0x38   :  { %v215_v61 = vrot.slane %v155_v40, %v5582_v28  ;;  %v219_v62 = vrot.slane %v157_v44, %v5582_v28  ;;  %v223_v63 = vrot.slane %v159_v47, %v5582_v28  ;;  %v5609_v0 = vmul.f32 %v163_v48, %v57_v46  ;;  %v496_v48 = vld [vmem:[#allocation5 + $0x20] sm:$0xff] }
  0x39   :  { %v5611_v1 = vmul.f32 %v167_v49, %v57_v46  ;;  %v5613_v3 = vmul.f32 %v171_v50, %v57_v46  ;;  %v5615_v4 = vmul.f32 %v175_v51, %v57_v46  ;;  %v5617_v5 = vmul.f32 %v179_v52, %v57_v46 }
  0x3a   :  { %v5352_v7 = vadd.f32 -1.0, %v5575_v15  ;;  %v5620_v8 = vmul.f32 %v183_v53, %v57_v46  ;;  %v296_v10 = vcombine.high %v288_v41, %v288_v41  ;;  %v330_v11 = vcombine.high %v278_v2, %v278_v2 }
  0x3b   :  { %v5623_v12 = vmul.f32 %v187_v54, %v57_v46  ;;  %v5625_v13 = vmul.f32 %v191_v55, %v57_v46  ;;  %v304_v14 = vrot.slane %v288_v41, %v5571_v6  ;;  %v337_v16 = vrot.slane %v278_v2, %v5571_v6 }
  0x3c   :  { %v5629_v17 = vmul.f32 %v195_v56, %v57_v46  ;;  %v5631_v18 = vmul.f32 %v199_v57, %v57_v46  ;;  %v273_v19 = vand.u32 2147483647, %v5352_v7  ;;  %v297_v20 = vcombine.high %v295_v9, %v295_v9 }
  0x3d   :  { %v5633_v21 = vmul.f32 %v203_v58, %v57_v46  ;;  %v5635_v22 = vmul.f32 %v207_v59, %v57_v46  ;;  %v344_v23 = vrot.slane %v330_v11, %v5571_v6  ;;  %v345_v24 = vcombine.high %v337_v16, %v337_v16 }
  0x3e   :  { %v5638_v25 = vmul.f32 %v211_v60, %v57_v46  ;;  %v5640_v26 = vmul.f32 %v215_v61, %v57_v46  ;;  %v5642_v27 = vmul.f32 %v219_v62, %v57_v46  ;;  %v318_v29 = vrot.slane %v296_v10, %v5571_v6 }
  0x3f   :  { %v311_v30 = vrot.slane %v295_v9, %v5571_v6  ;;  %v325_v31 = vrot.slane %v297_v20, %v5571_v6  ;;  %v326_v32 = vcombine.high %v304_v14, %v304_v14  ;;  %v346_v33 = vcombine.high %v344_v23, %v344_v23 }
  0x40   :  { %v274_v34 = vsub.f32 1.0, %v273_v19  ;;  %v328_v35 = vcombine.high %v318_v29, %v318_v29  ;;  %v353_v36 = vrot.slane %v337_v16, %v5571_v6  ;;  %v367_v37 = vrot.slane %v345_v24, %v5571_v6 }
  0x41   :  { %v327_v38 = vcombine.high %v311_v30, %v311_v30  ;;  %v329_v39 = vcombine.high %v325_v31, %v325_v31  ;;  %v360_v40 = vrot.slane %v344_v23, %v5571_v6  ;;  %v374_v41 = vrot.slane %v346_v33, %v5571_v6 }
  0x42   :  { %v5651_v43 = vmul.f32 %v223_v63, %v57_v46  ;;  %v375_v44 = vcombine.high %v353_v36, %v353_v36  ;;  %v377_v45 = vcombine.high %v367_v37, %v367_v37  ;;  %v5654_v47 = vadd.f32 -2.0, %v5575_v15 }
  0x43   :  { %v376_v49 = vcombine.high %v360_v40, %v360_v40  ;;  %v378_v50 = vcombine.high %v374_v41, %v374_v41  ;;  %v382_v51 = vrot.slane %v304_v14, %v5582_v28  ;;  %v500_v52 = vcombine.high %v496_v48, %v496_v48 }
  0x44   :  { %v275_v53 = vmax.f32 %v274_v34, 0.0  ;;  %v386_v54 = vrot.slane %v318_v29, %v5582_v28  ;;  %v390_v55 = vrot.slane %v326_v32, %v5582_v28  ;;  %v394_v56 = vrot.slane %v328_v35, %v5582_v28 }
  0x45   :  { %v398_v46 = vrot.slane %v311_v30, %v5582_v28  ;;  %v402_v57 = vrot.slane %v325_v31, %v5582_v28  ;;  %v406_v58 = vrot.slane %v327_v38, %v5582_v28  ;;  %v410_v59 = vrot.slane %v329_v39, %v5582_v28  ;;  %v497_v38 = vld [vmem:[#allocation5 + $0x28] sm:$0xff] }
  0x46   :  { %v414_v60 = vrot.slane %v353_v36, %v5582_v28  ;;  %v418_v61 = vrot.slane %v367_v37, %v5582_v28  ;;  %v422_v62 = vrot.slane %v375_v44, %v5582_v28  ;;  %v426_v63 = vrot.slane %v377_v45, %v5582_v28 }
  0x47   :  { %v430_v2 = vrot.slane %v360_v40, %v5582_v28  ;;  %v434_v7 = vrot.slane %v374_v41, %v5582_v28  ;;  %v438_v9 = vrot.slane %v376_v49, %v5582_v28  ;;  %v442_v10 = vrot.slane %v378_v50, %v5582_v28 }
  0x48   :  { %v459_v11 = vmul.f32 %v382_v51, %v275_v53  ;;  %v460_v14 = vmul.f32 %v386_v54, %v275_v53  ;;  %v461_v16 = vmul.f32 %v390_v55, %v275_v53  ;;  %v462_v19 = vmul.f32 %v394_v56, %v275_v53 }
  0x49   :  { %v463_v20 = vmul.f32 %v398_v46, %v275_v53  ;;  %v464_v23 = vmul.f32 %v402_v57, %v275_v53  ;;  %v465_v24 = vmul.f32 %v406_v58, %v275_v53  ;;  %v466_v29 = vmul.f32 %v410_v59, %v275_v53 }
  0x4a   :  { %v467_v30 = vmul.f32 %v414_v60, %v275_v53  ;;  %v468_v31 = vmul.f32 %v418_v61, %v275_v53  ;;  %v469_v32 = vmul.f32 %v422_v62, %v275_v53  ;;  %v470_v33 = vmul.f32 %v426_v63, %v275_v53 }
  0x4b   :  { %v471_v34 = vmul.f32 %v430_v2, %v275_v53  ;;  %v472_v35 = vmul.f32 %v434_v7, %v275_v53  ;;  %v473_v36 = vmul.f32 %v438_v9, %v275_v53  ;;  %v474_v37 = vmul.f32 %v442_v10, %v275_v53  ;;  %v715_v7 = vld [vmem:[#allocation5 + $0x30] sm:$0xff] }
  0x4c   :  { %v5673_v39 = vadd.f32 %v459_v11, %v5609_v0  ;;  %v5676_v40 = vadd.f32 %v460_v14, %v5611_v1  ;;  %v5679_v41 = vadd.f32 %v461_v16, %v5613_v3  ;;  %v5682_v44 = vadd.f32 %v462_v19, %v5615_v4 }
  0x4d   :  { %v5685_v45 = vadd.f32 %v463_v20, %v5617_v5  ;;  %v5688_v49 = vadd.f32 %v464_v23, %v5620_v8  ;;  %v507_v50 = vrot.slane %v496_v48, %v5571_v6  ;;  %v514_v0 = vrot.slane %v500_v52, %v5571_v6 }
  0x4e   :  { %v5693_v51 = vadd.f32 %v465_v24, %v5623_v12  ;;  %v492_v1 = vand.u32 2147483647, %v5654_v47  ;;  %v549_v3 = vcombine.high %v497_v38, %v497_v38  ;;  %v556_v53 = vrot.slane %v497_v38, %v5571_v6 }
  0x4f   :  { %v5698_v4 = vadd.f32 %v466_v29, %v5625_v13  ;;  %v5701_v5 = vadd.f32 %v467_v30, %v5629_v17  ;;  %v515_v8 = vcombine.high %v507_v50, %v507_v50  ;;  %v516_v54 = vcombine.high %v514_v0, %v514_v0 }
  0x50   :  { %v5704_v48 = vadd.f32 %v468_v31, %v5631_v18  ;;  %v523_v52 = vrot.slane %v507_v50, %v5571_v6  ;;  %v563_v12 = vrot.slane %v549_v3, %v5571_v6  ;;  %v564_v55 = vcombine.high %v556_v53, %v556_v53 }
  0x51   :  { %v5709_v47 = vadd.f32 %v469_v32, %v5633_v21  ;;  %v5712_v56 = vadd.f32 %v470_v33, %v5635_v22  ;;  %v5715_v13 = vadd.f32 %v471_v34, %v5638_v25  ;;  %v5718_v17 = vadd.f32 %v472_v35, %v5640_v26 }
  0x52   :  { %v5721_v18 = vadd.f32 %v473_v36, %v5642_v27  ;;  %v493_v46 = vsub.f32 1.0, %v492_v1  ;;  %v537_v57 = vrot.slane %v515_v8, %v5571_v6  ;;  %v565_v58 = vcombine.high %v563_v12, %v563_v12 }
  0x53   :  { %v5725_v59 = vadd.f32 %v474_v37, %v5651_v43  ;;  %v530_v21 = vrot.slane %v514_v0, %v5571_v6  ;;  %v544_v22 = vrot.slane %v516_v54, %v5571_v6  ;;  %v5730_v25 = vadd.f32 -3.0, %v5575_v15 }
  0x54   :  { %v545_v60 = vcombine.high %v523_v52, %v523_v52  ;;  %v547_v26 = vcombine.high %v537_v57, %v537_v57  ;;  %v572_v61 = vrot.slane %v556_v53, %v5571_v6  ;;  %v586_v27 = vrot.slane %v564_v55, %v5571_v6 }
  0x55   :  { %v546_v62 = vcombine.high %v530_v21, %v530_v21  ;;  %v548_v63 = vcombine.high %v544_v22, %v544_v22  ;;  %v579_v2 = vrot.slane %v563_v12, %v5571_v6  ;;  %v593_v43 = vrot.slane %v565_v58, %v5571_v6 }
  0x56   :  { %v494_v9 = vmax.f32 %v493_v46, 0.0  ;;  %v594_v10 = vcombine.high %v572_v61, %v572_v61  ;;  %v596_v11 = vcombine.high %v586_v27, %v586_v27  ;;  %v719_v14 = vcombine.high %v715_v7, %v715_v7 }
  0x57   :  { %v595_v16 = vcombine.high %v579_v2, %v579_v2  ;;  %v597_v19 = vcombine.high %v593_v43, %v593_v43  ;;  %v601_v20 = vrot.slane %v523_v52, %v5582_v28  ;;  %v605_v23 = vrot.slane %v537_v57, %v5582_v28 }
  0x58   :  { %v609_v24 = vrot.slane %v545_v60, %v5582_v28  ;;  %v613_v29 = vrot.slane %v547_v26, %v5582_v28  ;;  %v617_v30 = vrot.slane %v530_v21, %v5582_v28  ;;  %v621_v31 = vrot.slane %v544_v22, %v5582_v28 }
  0x59   :  { %v625_v32 = vrot.slane %v546_v62, %v5582_v28  ;;  %v629_v33 = vrot.slane %v548_v63, %v5582_v28  ;;  %v633_v34 = vrot.slane %v572_v61, %v5582_v28  ;;  %v637_v35 = vrot.slane %v586_v27, %v5582_v28  ;;  %v716_v61 = vld [vmem:[#allocation5 + $0x38] sm:$0xff] }
  0x5a   :  { %v641_v36 = vrot.slane %v594_v10, %v5582_v28  ;;  %v645_v37 = vrot.slane %v596_v11, %v5582_v28  ;;  %v649_v38 = vrot.slane %v579_v2, %v5582_v28  ;;  %v653_v50 = vrot.slane %v593_v43, %v5582_v28 }
  0x5b   :  { %v657_v0 = vrot.slane %v595_v16, %v5582_v28  ;;  %v661_v1 = vrot.slane %v597_v19, %v5582_v28  ;;  %v678_v3 = vmul.f32 %v601_v20, %v494_v9  ;;  %v679_v53 = vmul.f32 %v605_v23, %v494_v9 }
  0x5c   :  { %v680_v8 = vmul.f32 %v609_v24, %v494_v9  ;;  %v681_v54 = vmul.f32 %v613_v29, %v494_v9  ;;  %v682_v52 = vmul.f32 %v617_v30, %v494_v9  ;;  %v683_v12 = vmul.f32 %v621_v31, %v494_v9 }
  0x5d   :  { %v684_v55 = vmul.f32 %v625_v32, %v494_v9  ;;  %v685_v46 = vmul.f32 %v629_v33, %v494_v9  ;;  %v686_v57 = vmul.f32 %v633_v34, %v494_v9  ;;  %v687_v58 = vmul.f32 %v637_v35, %v494_v9  ;;  %v934_v35 = vld [vmem:[#allocation5 + $0x40] sm:$0xff] }
  0x5e   :  { %v688_v21 = vmul.f32 %v641_v36, %v494_v9  ;;  %v689_v22 = vmul.f32 %v645_v37, %v494_v9  ;;  %v690_v60 = vmul.f32 %v649_v38, %v494_v9  ;;  %v691_v26 = vmul.f32 %v653_v50, %v494_v9 }
  0x5f   :  { %v692_v27 = vmul.f32 %v657_v0, %v494_v9  ;;  %v693_v62 = vmul.f32 %v661_v1, %v494_v9  ;;  %v5753_v63 = vadd.f32 %v678_v3, %v5673_v39  ;;  %v5756_v2 = vadd.f32 %v679_v53, %v5676_v40 }
  0x60   :  { %v5759_v43 = vadd.f32 %v680_v8, %v5679_v41  ;;  %v5762_v10 = vadd.f32 %v681_v54, %v5682_v44  ;;  %v5765_v11 = vadd.f32 %v682_v52, %v5685_v45  ;;  %v5768_v16 = vadd.f32 %v683_v12, %v5688_v49 }
  0x61   :  { %v726_v9 = vrot.slane %v715_v7, %v5571_v6  ;;  %v733_v39 = vrot.slane %v719_v14, %v5571_v6  ;;  %v768_v19 = vcombine.high %v716_v61, %v716_v61  ;;  %v775_v40 = vrot.slane %v716_v61, %v5571_v6 }
  0x62   :  { %v5774_v20 = vadd.f32 %v684_v55, %v5693_v51  ;;  %v5777_v41 = vadd.f32 %v685_v46, %v5698_v4  ;;  %v5780_v44 = vadd.f32 %v686_v57, %v5701_v5  ;;  %v711_v45 = vand.u32 2147483647, %v5730_v25 }
  0x63   :  { %v5784_v49 = vadd.f32 %v687_v58, %v5704_v48  ;;  %v734_v7 = vcombine.high %v726_v9, %v726_v9  ;;  %v735_v23 = vcombine.high %v733_v39, %v733_v39  ;;  %v742_v14 = vrot.slane %v726_v9, %v5571_v6 }
  0x64   :  { %v5788_v24 = vadd.f32 %v688_v21, %v5709_v47  ;;  %v5791_v51 = vadd.f32 %v689_v22, %v5712_v56  ;;  %v782_v4 = vrot.slane %v768_v19, %v5571_v6  ;;  %v783_v29 = vcombine.high %v775_v40, %v775_v40 }
  0x65   :  { %v5795_v5 = vadd.f32 %v690_v60, %v5715_v13  ;;  %v5798_v25 = vadd.f32 %v691_v26, %v5718_v17  ;;  %v5801_v48 = vadd.f32 %v692_v27, %v5721_v18  ;;  %v5804_v30 = vadd.f32 %v693_v62, %v5725_v59 }
  0x66   :  { %v712_v47 = vsub.f32 1.0, %v711_v45  ;;  %v749_v31 = vrot.slane %v733_v39, %v5571_v6  ;;  %v756_v56 = vrot.slane %v734_v7, %v5571_v6  ;;  %v784_v32 = vcombine.high %v782_v4, %v782_v4 }
  0x67   :  { %v763_v33 = vrot.slane %v735_v23, %v5571_v6  ;;  %v764_v34 = vcombine.high %v742_v14, %v742_v14  ;;  %v791_v13 = vrot.slane %v775_v40, %v5571_v6  ;;  %v5811_v17 = vadd.f32 -4.0, %v5575_v15 }
  0x68   :  { %v765_v18 = vcombine.high %v749_v31, %v749_v31  ;;  %v766_v36 = vcombine.high %v756_v56, %v756_v56  ;;  %v798_v59 = vrot.slane %v782_v4, %v5571_v6  ;;  %v805_v37 = vrot.slane %v783_v29, %v5571_v6 }
  0x69   :  { %v767_v38 = vcombine.high %v763_v33, %v763_v33  ;;  %v812_v50 = vrot.slane %v784_v32, %v5571_v6  ;;  %v813_v0 = vcombine.high %v791_v13, %v791_v13  ;;  %v938_v1 = vcombine.high %v934_v35, %v934_v35 }
  0x6a   :  { %v713_v3 = vmax.f32 %v712_v47, 0.0  ;;  %v814_v53 = vcombine.high %v798_v59, %v798_v59  ;;  %v815_v8 = vcombine.high %v805_v37, %v805_v37  ;;  %v945_v54 = vrot.slane %v934_v35, %v5571_v6 }
  0x6b   :  { %v816_v52 = vcombine.high %v812_v50, %v812_v50  ;;  %v820_v12 = vrot.slane %v742_v14, %v5582_v28  ;;  %v824_v55 = vrot.slane %v756_v56, %v5582_v28  ;;  %v828_v46 = vrot.slane %v764_v34, %v5582_v28 }
  0x6c   :  { %v832_v57 = vrot.slane %v766_v36, %v5582_v28  ;;  %v836_v58 = vrot.slane %v749_v31, %v5582_v28  ;;  %v840_v21 = vrot.slane %v763_v33, %v5582_v28  ;;  %v844_v22 = vrot.slane %v765_v18, %v5582_v28  ;;  %v935_v36 = vld [vmem:[#allocation5 + $0x48] sm:$0xff] }
  0x6d   :  { %v848_v60 = vrot.slane %v767_v38, %v5582_v28  ;;  %v852_v26 = vrot.slane %v791_v13, %v5582_v28  ;;  %v856_v61 = vrot.slane %v805_v37, %v5582_v28  ;;  %v860_v27 = vrot.slane %v813_v0, %v5582_v28 }
  0x6e   :  { %v864_v62 = vrot.slane %v815_v8, %v5582_v28  ;;  %v868_v9 = vrot.slane %v798_v59, %v5582_v28  ;;  %v872_v39 = vrot.slane %v812_v50, %v5582_v28  ;;  %v876_v19 = vrot.slane %v814_v53, %v5582_v28 }
  0x6f   :  { %v880_v40 = vrot.slane %v816_v52, %v5582_v28  ;;  %v897_v45 = vmul.f32 %v820_v12, %v713_v3  ;;  %v898_v7 = vmul.f32 %v824_v55, %v713_v3  ;;  %v899_v23 = vmul.f32 %v828_v46, %v713_v3 }
  0x70   :  { %v900_v14 = vmul.f32 %v832_v57, %v713_v3  ;;  %v901_v4 = vmul.f32 %v836_v58, %v713_v3  ;;  %v902_v29 = vmul.f32 %v840_v21, %v713_v3  ;;  %v903_v47 = vmul.f32 %v844_v22, %v713_v3 }
  0x71   :  { %v904_v31 = vmul.f32 %v848_v60, %v713_v3  ;;  %v905_v56 = vmul.f32 %v852_v26, %v713_v3  ;;  %v906_v32 = vmul.f32 %v856_v61, %v713_v3  ;;  %v907_v33 = vmul.f32 %v860_v27, %v713_v3 }
  0x72   :  { %v908_v34 = vmul.f32 %v864_v62, %v713_v3  ;;  %v909_v13 = vmul.f32 %v868_v9, %v713_v3  ;;  %v910_v35 = vmul.f32 %v872_v39, %v713_v3  ;;  %v911_v18 = vmul.f32 %v876_v19, %v713_v3 }
  0x73   :  { %v912_v59 = vmul.f32 %v880_v40, %v713_v3  ;;  %v5834_v37 = vadd.f32 %v897_v45, %v5753_v63  ;;  %v5837_v38 = vadd.f32 %v898_v7, %v5756_v2  ;;  %v5840_v50 = vadd.f32 %v899_v23, %v5759_v43 }
  0x74   :  { %v5843_v0 = vadd.f32 %v900_v14, %v5762_v10  ;;  %v5846_v53 = vadd.f32 %v901_v4, %v5765_v11  ;;  %v5849_v8 = vadd.f32 %v902_v29, %v5768_v16  ;;  %v952_v3 = vrot.slane %v938_v1, %v5571_v6 }
  0x75   :  { %v930_v63 = vand.u32 2147483647, %v5811_v17  ;;  %v953_v52 = vcombine.high %v945_v54, %v945_v54  ;;  %v987_v12 = vcombine.high %v935_v36, %v935_v36  ;;  %v994_v2 = vrot.slane %v935_v36, %v5571_v6 }
  0x76   :  { %v5855_v43 = vadd.f32 %v903_v47, %v5774_v20  ;;  %v5858_v10 = vadd.f32 %v904_v31, %v5777_v41  ;;  %v954_v55 = vcombine.high %v952_v3, %v952_v3  ;;  %v961_v11 = vrot.slane %v945_v54, %v5571_v6 }
  0x77   :  { %v5862_v16 = vadd.f32 %v905_v56, %v5780_v44  ;;  %v5865_v1 = vadd.f32 %v906_v32, %v5784_v49  ;;  %v1001_v17 = vrot.slane %v987_v12, %v5571_v6  ;;  %v1002_v46 = vcombine.high %v994_v2, %v994_v2 }
  0x78   :  { %v5869_v57 = vadd.f32 %v907_v33, %v5788_v24  ;;  %v5872_v20 = vadd.f32 %v908_v34, %v5791_v51  ;;  %v5875_v41 = vadd.f32 %v909_v13, %v5795_v5  ;;  %v5878_v54 = vadd.f32 %v910_v35, %v5798_v25 }
  0x79   :  { %v931_v44 = vsub.f32 1.0, %v930_v63  ;;  %v968_v58 = vrot.slane %v952_v3, %v5571_v6  ;;  %v975_v49 = vrot.slane %v953_v52, %v5571_v6  ;;  %v1003_v21 = vcombine.high %v1001_v17, %v1001_v17 }
  0x7a   :  { %v5883_v22 = vadd.f32 %v911_v18, %v5801_v48  ;;  %v982_v24 = vrot.slane %v954_v55, %v5571_v6  ;;  %v983_v60 = vcombine.high %v961_v11, %v961_v11  ;;  %v1010_v51 = vrot.slane %v994_v2, %v5571_v6 }
  0x7b   :  { %v984_v26 = vcombine.high %v968_v58, %v968_v58  ;;  %v985_v5 = vcombine.high %v975_v49, %v975_v49  ;;  %v1017_v61 = vrot.slane %v1001_v17, %v5571_v6  ;;  %v1024_v25 = vrot.slane %v1002_v46, %v5571_v6 }
  0x7c   :  { %v5890_v27 = vadd.f32 %v912_v59, %v5804_v30  ;;  %v986_v62 = vcombine.high %v982_v24, %v982_v24  ;;  %v1031_v9 = vrot.slane %v1003_v21, %v5571_v6  ;;  %v1032_v39 = vcombine.high %v1010_v51, %v1010_v51 }
  0x7d   :  { %v932_v48 = vmax.f32 %v931_v44, 0.0  ;;  %v1033_v19 = vcombine.high %v1017_v61, %v1017_v61  ;;  %v1034_v40 = vcombine.high %v1024_v25, %v1024_v25  ;;  %v5894_v45 = vadd.f32 -5.0, %v5575_v15 }
  0x7e   :  { %v1035_v7 = vcombine.high %v1031_v9, %v1031_v9  ;;  %v1039_v23 = vrot.slane %v961_v11, %v5582_v28  ;;  %v1043_v14 = vrot.slane %v975_v49, %v5582_v28  ;;  %v1047_v4 = vrot.slane %v983_v60, %v5582_v28 }
  0x7f   :  { %v1051_v30 = vrot.slane %v985_v5, %v5582_v28  ;;  %v1055_v29 = vrot.slane %v968_v58, %v5582_v28  ;;  %v1059_v47 = vrot.slane %v982_v24, %v5582_v28  ;;  %v1063_v31 = vrot.slane %v984_v26, %v5582_v28  ;;  %v1154_v26 = vld [vmem:[#allocation5 + $0x58] sm:$0xff] }
  0x80   :  { %v1067_v56 = vrot.slane %v986_v62, %v5582_v28  ;;  %v1071_v32 = vrot.slane %v1010_v51, %v5582_v28  ;;  %v1075_v33 = vrot.slane %v1024_v25, %v5582_v28  ;;  %v1079_v34 = vrot.slane %v1032_v39, %v5582_v28  ;;  %v1153_v51 = vld [vmem:[#allocation5 + $0x50] sm:$0xff] }
  0x81   :  { %v1083_v13 = vrot.slane %v1034_v40, %v5582_v28  ;;  %v1087_v35 = vrot.slane %v1017_v61, %v5582_v28  ;;  %v1091_v18 = vrot.slane %v1031_v9, %v5582_v28  ;;  %v1095_v36 = vrot.slane %v1033_v19, %v5582_v28 }
  0x82   :  { %v1099_v59 = vrot.slane %v1035_v7, %v5582_v28  ;;  %v1116_v3 = vmul.f32 %v1039_v23, %v932_v48  ;;  %v1117_v63 = vmul.f32 %v1043_v14, %v932_v48  ;;  %v1118_v52 = vmul.f32 %v1047_v4, %v932_v48 }
  0x83   :  { %v1119_v12 = vmul.f32 %v1051_v30, %v932_v48  ;;  %v1120_v2 = vmul.f32 %v1055_v29, %v932_v48  ;;  %v1121_v55 = vmul.f32 %v1059_v47, %v932_v48  ;;  %v1122_v11 = vmul.f32 %v1063_v31, %v932_v48 }
  0x84   :  { %v1123_v17 = vmul.f32 %v1067_v56, %v932_v48  ;;  %v1124_v46 = vmul.f32 %v1071_v32, %v932_v48  ;;  %v1125_v44 = vmul.f32 %v1075_v33, %v932_v48  ;;  %v1126_v58 = vmul.f32 %v1079_v34, %v932_v48 }
  0x85   :  { %v1127_v49 = vmul.f32 %v1083_v13, %v932_v48  ;;  %v1128_v21 = vmul.f32 %v1087_v35, %v932_v48  ;;  %v1129_v24 = vmul.f32 %v1091_v18, %v932_v48  ;;  %v1130_v60 = vmul.f32 %v1095_v36, %v932_v48  ;;  %v1372_v13 = vld [vmem:[#allocation5 + $0x60] sm:$0xff] }
  0x86   :  { %v1131_v5 = vmul.f32 %v1099_v59, %v932_v48  ;;  %v5913_v61 = vadd.f32 %v1116_v3, %v5834_v37  ;;  %v5916_v25 = vadd.f32 %v1117_v63, %v5837_v38  ;;  %v5919_v62 = vadd.f32 %v1118_v52, %v5840_v50 }
  0x87   :  { %v5922_v9 = vadd.f32 %v1119_v12, %v5843_v0  ;;  %v5925_v39 = vadd.f32 %v1120_v2, %v5846_v53  ;;  %v5928_v19 = vadd.f32 %v1121_v55, %v5849_v8  ;;  %v1157_v40 = vcombine.high %v1153_v51, %v1153_v51 }
  0x88   :  { %v5931_v48 = vadd.f32 %v1122_v11, %v5855_v43  ;;  %v1164_v37 = vrot.slane %v1153_v51, %v5571_v6  ;;  %v1206_v38 = vcombine.high %v1154_v26, %v1154_v26  ;;  %v1213_v7 = vrot.slane %v1154_v26, %v5571_v6 }
  0x89   :  { %v5936_v50 = vadd.f32 %v1123_v17, %v5858_v10  ;;  %v5939_v0 = vadd.f32 %v1124_v46, %v5862_v16  ;;  %v1149_v53 = vand.u32 2147483647, %v5894_v45  ;;  %v1171_v8 = vrot.slane %v1157_v40, %v5571_v6 }
  0x8a   :  { %v5944_v23 = vadd.f32 %v1125_v44, %v5865_v1  ;;  %v1172_v43 = vcombine.high %v1164_v37, %v1164_v37  ;;  %v1180_v14 = vrot.slane %v1164_v37, %v5571_v6  ;;  %v1220_v4 = vrot.slane %v1206_v38, %v5571_v6 }
  0x8b   :  { %v5949_v30 = vadd.f32 %v1126_v58, %v5869_v57  ;;  %v5952_v10 = vadd.f32 %v1127_v49, %v5872_v20  ;;  %v1173_v16 = vcombine.high %v1171_v8, %v1171_v8  ;;  %v1221_v29 = vcombine.high %v1213_v7, %v1213_v7 }
  0x8c   :  { %v5955_v45 = vadd.f32 %v1128_v21, %v5875_v41  ;;  %v5958_v47 = vadd.f32 %v1129_v24, %v5878_v54  ;;  %v5961_v1 = vadd.f32 %v1130_v60, %v5883_v22  ;;  %v1222_v31 = vcombine.high %v1220_v4, %v1220_v4 }
  0x8d   :  { %v5964_v56 = vadd.f32 %v1131_v5, %v5890_v27  ;;  %v1150_v57 = vsub.f32 1.0, %v1149_v53  ;;  %v1187_v32 = vrot.slane %v1171_v8, %v5571_v6  ;;  %v1194_v20 = vrot.slane %v1172_v43, %v5571_v6 }
  0x8e   :  { %v1201_v33 = vrot.slane %v1173_v16, %v5571_v6  ;;  %v1202_v34 = vcombine.high %v1180_v14, %v1180_v14  ;;  %v1229_v41 = vrot.slane %v1213_v7, %v5571_v6  ;;  %v5971_v54 = vadd.f32 -6.0, %v5575_v15 }
  0x8f   :  { %v1203_v22 = vcombine.high %v1187_v32, %v1187_v32  ;;  %v1204_v35 = vcombine.high %v1194_v20, %v1194_v20  ;;  %v1236_v18 = vrot.slane %v1220_v4, %v5571_v6  ;;  %v1243_v27 = vrot.slane %v1221_v29, %v5571_v6 }
  0x90   :  { %v1205_v36 = vcombine.high %v1201_v33, %v1201_v33  ;;  %v1250_v59 = vrot.slane %v1222_v31, %v5571_v6  ;;  %v1251_v3 = vcombine.high %v1229_v41, %v1229_v41  ;;  %v1376_v63 = vcombine.high %v1372_v13, %v1372_v13 }
  0x91   :  { %v1151_v52 = vmax.f32 %v1150_v57, 0.0  ;;  %v1252_v12 = vcombine.high %v1236_v18, %v1236_v18  ;;  %v1253_v2 = vcombine.high %v1243_v27, %v1243_v27  ;;  %v1383_v55 = vrot.slane %v1372_v13, %v5571_v6 }
  0x92   :  { %v1254_v11 = vcombine.high %v1250_v59, %v1250_v59  ;;  %v1258_v17 = vrot.slane %v1180_v14, %v5582_v28  ;;  %v1262_v46 = vrot.slane %v1194_v20, %v5582_v28  ;;  %v1266_v44 = vrot.slane %v1202_v34, %v5582_v28 }
  0x93   :  { %v1270_v58 = vrot.slane %v1204_v35, %v5582_v28  ;;  %v1274_v49 = vrot.slane %v1187_v32, %v5582_v28  ;;  %v1278_v21 = vrot.slane %v1201_v33, %v5582_v28  ;;  %v1282_v24 = vrot.slane %v1203_v22, %v5582_v28  ;;  %v1373_v35 = vld [vmem:[#allocation5 + $0x68] sm:$0xff] }
  0x94   :  { %v1286_v60 = vrot.slane %v1205_v36, %v5582_v28  ;;  %v1290_v51 = vrot.slane %v1229_v41, %v5582_v28  ;;  %v1294_v26 = vrot.slane %v1243_v27, %v5582_v28  ;;  %v1298_v5 = vrot.slane %v1251_v3, %v5582_v28 }
  0x95   :  { %v1302_v40 = vrot.slane %v1253_v2, %v5582_v28  ;;  %v1306_v37 = vrot.slane %v1236_v18, %v5582_v28  ;;  %v1310_v38 = vrot.slane %v1250_v59, %v5582_v28  ;;  %v1314_v7 = vrot.slane %v1252_v12, %v5582_v28 }
  0x96   :  { %v1318_v53 = vrot.slane %v1254_v11, %v5582_v28  ;;  %v1335_v8 = vmul.f32 %v1258_v17, %v1151_v52  ;;  %v1336_v43 = vmul.f32 %v1262_v46, %v1151_v52  ;;  %v1337_v14 = vmul.f32 %v1266_v44, %v1151_v52 }
  0x97   :  { %v1338_v4 = vmul.f32 %v1270_v58, %v1151_v52  ;;  %v1339_v16 = vmul.f32 %v1274_v49, %v1151_v52  ;;  %v1340_v29 = vmul.f32 %v1278_v21, %v1151_v52  ;;  %v1341_v31 = vmul.f32 %v1282_v24, %v1151_v52 }
  0x98   :  { %v1342_v57 = vmul.f32 %v1286_v60, %v1151_v52  ;;  %v1343_v32 = vmul.f32 %v1290_v51, %v1151_v52  ;;  %v1344_v20 = vmul.f32 %v1294_v26, %v1151_v52  ;;  %v1345_v33 = vmul.f32 %v1298_v5, %v1151_v52 }
  0x99   :  { %v1346_v34 = vmul.f32 %v1302_v40, %v1151_v52  ;;  %v1347_v41 = vmul.f32 %v1306_v37, %v1151_v52  ;;  %v1348_v13 = vmul.f32 %v1310_v38, %v1151_v52  ;;  %v1349_v22 = vmul.f32 %v1314_v7, %v1151_v52 }
  0x9a   :  { %v1350_v18 = vmul.f32 %v1318_v53, %v1151_v52  ;;  %v5994_v27 = vadd.f32 %v1335_v8, %v5913_v61  ;;  %v5997_v36 = vadd.f32 %v1336_v43, %v5916_v25  ;;  %v6000_v59 = vadd.f32 %v1337_v14, %v5919_v62 }
  0x9b   :  { %v6003_v3 = vadd.f32 %v1338_v4, %v5922_v9  ;;  %v6006_v12 = vadd.f32 %v1339_v16, %v5925_v39  ;;  %v6009_v2 = vadd.f32 %v1340_v29, %v5928_v19  ;;  %v1390_v52 = vrot.slane %v1376_v63, %v5571_v6 }
  0x9c   :  { %v1368_v61 = vand.u32 2147483647, %v5971_v54  ;;  %v1391_v11 = vcombine.high %v1383_v55, %v1383_v55  ;;  %v1425_v17 = vcombine.high %v1373_v35, %v1373_v35  ;;  %v1432_v25 = vrot.slane %v1373_v35, %v5571_v6 }
  0x9d   :  { %v6015_v62 = vadd.f32 %v1341_v31, %v5931_v48  ;;  %v6018_v9 = vadd.f32 %v1342_v57, %v5936_v50  ;;  %v1392_v46 = vcombine.high %v1390_v52, %v1390_v52  ;;  %v1399_v39 = vrot.slane %v1383_v55, %v5571_v6 }
  0x9e   :  { %v6022_v19 = vadd.f32 %v1343_v32, %v5939_v0  ;;  %v6025_v63 = vadd.f32 %v1344_v20, %v5944_v23  ;;  %v1439_v54 = vrot.slane %v1425_v17, %v5571_v6  ;;  %v1440_v44 = vcombine.high %v1432_v25, %v1432_v25 }
  0x9f   :  { %v6029_v58 = vadd.f32 %v1345_v33, %v5949_v30  ;;  %v6032_v48 = vadd.f32 %v1346_v34, %v5952_v10  ;;  %v6035_v50 = vadd.f32 %v1347_v41, %v5955_v45  ;;  %v6038_v55 = vadd.f32 %v1348_v13, %v5958_v47 }
  0xa0   :  { %v1369_v0 = vsub.f32 1.0, %v1368_v61  ;;  %v1406_v49 = vrot.slane %v1390_v52, %v5571_v6  ;;  %v1413_v23 = vrot.slane %v1391_v11, %v5571_v6  ;;  %v1441_v21 = vcombine.high %v1439_v54, %v1439_v54 }
  0xa1   :  { %v6043_v24 = vadd.f32 %v1349_v22, %v5961_v1  ;;  %v1420_v30 = vrot.slane %v1392_v46, %v5571_v6  ;;  %v1421_v60 = vcombine.high %v1399_v39, %v1399_v39  ;;  %v1448_v10 = vrot.slane %v1432_v25, %v5571_v6 }
  0xa2   :  { %v1422_v51 = vcombine.high %v1406_v49, %v1406_v49  ;;  %v1423_v45 = vcombine.high %v1413_v23, %v1413_v23  ;;  %v1455_v26 = vrot.slane %v1439_v54, %v5571_v6  ;;  %v1462_v47 = vrot.slane %v1440_v44, %v5571_v6 }
  0xa3   :  { %v6050_v5 = vadd.f32 %v1350_v18, %v5964_v56  ;;  %v1424_v40 = vcombine.high %v1420_v30, %v1420_v30  ;;  %v1469_v37 = vrot.slane %v1441_v21, %v5571_v6  ;;  %v1470_v38 = vcombine.high %v1448_v10, %v1448_v10 }
  0xa4   :  { %v1370_v1 = vmax.f32 %v1369_v0, 0.0  ;;  %v1471_v7 = vcombine.high %v1455_v26, %v1455_v26  ;;  %v1472_v53 = vcombine.high %v1462_v47, %v1462_v47  ;;  %v6054_v8 = vadd.f32 -7.0, %v5575_v15 }
  0xa5   :  { %v1473_v43 = vcombine.high %v1469_v37, %v1469_v37  ;;  %v1477_v14 = vrot.slane %v1399_v39, %v5582_v28  ;;  %v1481_v4 = vrot.slane %v1413_v23, %v5582_v28  ;;  %v1485_v16 = vrot.slane %v1421_v60, %v5582_v28 }
  0xa6   :  { %v1489_v56 = vrot.slane %v1423_v45, %v5582_v28  ;;  %v1493_v29 = vrot.slane %v1406_v49, %v5582_v28  ;;  %v1497_v31 = vrot.slane %v1420_v30, %v5582_v28  ;;  %v1501_v57 = vrot.slane %v1422_v51, %v5582_v28  ;;  %v1592_v51 = vld [vmem:[#allocation5 + $0x78] sm:$0xff] }
  0xa7   :  { %v1505_v32 = vrot.slane %v1424_v40, %v5582_v28  ;;  %v1509_v20 = vrot.slane %v1448_v10, %v5582_v28  ;;  %v1513_v33 = vrot.slane %v1462_v47, %v5582_v28  ;;  %v1517_v34 = vrot.slane %v1470_v38, %v5582_v28  ;;  %v1591_v10 = vld [vmem:[#allocation5 + $0x70] sm:$0xff] }
  0xa8   :  { %v1521_v41 = vrot.slane %v1472_v53, %v5582_v28  ;;  %v1525_v13 = vrot.slane %v1455_v26, %v5582_v28  ;;  %v1529_v22 = vrot.slane %v1469_v37, %v5582_v28  ;;  %v1533_v35 = vrot.slane %v1471_v7, %v5582_v28 }
  0xa9   :  { %v1537_v18 = vrot.slane %v1473_v43, %v5582_v28  ;;  %v1554_v52 = vmul.f32 %v1477_v14, %v1370_v1  ;;  %v1555_v61 = vmul.f32 %v1481_v4, %v1370_v1  ;;  %v1556_v11 = vmul.f32 %v1485_v16, %v1370_v1 }
  0xaa   :  { %v1557_v17 = vmul.f32 %v1489_v56, %v1370_v1  ;;  %v1558_v25 = vmul.f32 %v1493_v29, %v1370_v1  ;;  %v1559_v46 = vmul.f32 %v1497_v31, %v1370_v1  ;;  %v1560_v39 = vmul.f32 %v1501_v57, %v1370_v1 }
  0xab   :  { %v1561_v54 = vmul.f32 %v1505_v32, %v1370_v1  ;;  %v1562_v44 = vmul.f32 %v1509_v20, %v1370_v1  ;;  %v1563_v0 = vmul.f32 %v1513_v33, %v1370_v1  ;;  %v1564_v49 = vmul.f32 %v1517_v34, %v1370_v1 }
  0xac   :  { %v1565_v23 = vmul.f32 %v1521_v41, %v1370_v1  ;;  %v1566_v21 = vmul.f32 %v1525_v13, %v1370_v1  ;;  %v1567_v30 = vmul.f32 %v1529_v22, %v1370_v1  ;;  %v1568_v60 = vmul.f32 %v1533_v35, %v1370_v1  ;;  %v1810_v41 = vld [vmem:[#allocation5 + $0x80] sm:$0xff] }
  0xad   :  { %v1569_v45 = vmul.f32 %v1537_v18, %v1370_v1  ;;  %v6073_v26 = vadd.f32 %v1554_v52, %v5994_v27  ;;  %v6076_v47 = vadd.f32 %v1555_v61, %v5997_v36  ;;  %v6079_v40 = vadd.f32 %v1556_v11, %v6000_v59 }
  0xae   :  { %v6082_v37 = vadd.f32 %v1557_v17, %v6003_v3  ;;  %v6085_v38 = vadd.f32 %v1558_v25, %v6006_v12  ;;  %v6088_v7 = vadd.f32 %v1559_v46, %v6009_v2  ;;  %v1595_v53 = vcombine.high %v1591_v10, %v1591_v10 }
  0xaf   :  { %v6091_v1 = vadd.f32 %v1560_v39, %v6015_v62  ;;  %v1602_v27 = vrot.slane %v1591_v10, %v5571_v6  ;;  %v1644_v36 = vcombine.high %v1592_v51, %v1592_v51  ;;  %v1651_v43 = vrot.slane %v1592_v51, %v5571_v6 }
  0xb0   :  { %v6096_v59 = vadd.f32 %v1561_v54, %v6018_v9  ;;  %v6099_v3 = vadd.f32 %v1562_v44, %v6022_v19  ;;  %v1587_v12 = vand.u32 2147483647, %v6054_v8  ;;  %v1609_v2 = vrot.slane %v1595_v53, %v5571_v6 }
  0xb1   :  { %v6104_v14 = vadd.f32 %v1563_v0, %v6025_v63  ;;  %v1610_v62 = vcombine.high %v1602_v27, %v1602_v27  ;;  %v1618_v4 = vrot.slane %v1602_v27, %v5571_v6  ;;  %v1658_v16 = vrot.slane %v1644_v36, %v5571_v6 }
  0xb2   :  { %v6109_v56 = vadd.f32 %v1564_v49, %v6029_v58  ;;  %v6112_v9 = vadd.f32 %v1565_v23, %v6032_v48  ;;  %v1611_v19 = vcombine.high %v1609_v2, %v1609_v2  ;;  %v1659_v29 = vcombine.high %v1651_v43, %v1651_v43 }
  0xb3   :  { %v6115_v8 = vadd.f32 %v1566_v21, %v6035_v50  ;;  %v6118_v31 = vadd.f32 %v1567_v30, %v6038_v55  ;;  %v6121_v63 = vadd.f32 %v1568_v60, %v6043_v24  ;;  %v1660_v57 = vcombine.high %v1658_v16, %v1658_v16 }
  0xb4   :  { %v6124_v32 = vadd.f32 %v1569_v45, %v6050_v5  ;;  %v1588_v58 = vsub.f32 1.0, %v1587_v12  ;;  %v1625_v20 = vrot.slane %v1609_v2, %v5571_v6  ;;  %v1632_v48 = vrot.slane %v1610_v62, %v5571_v6 }
  0xb5   :  { %v1639_v33 = vrot.slane %v1611_v19, %v5571_v6  ;;  %v1640_v34 = vcombine.high %v1618_v4, %v1618_v4  ;;  %v1667_v50 = vrot.slane %v1651_v43, %v5571_v6  ;;  %v6131_v55 = vadd.f32 -8.0, %v5575_v15 }
  0xb6   :  { %v1641_v24 = vcombine.high %v1625_v20, %v1625_v20  ;;  %v1642_v13 = vcombine.high %v1632_v48, %v1632_v48  ;;  %v1674_v22 = vrot.slane %v1658_v16, %v5571_v6  ;;  %v1681_v5 = vrot.slane %v1659_v29, %v5571_v6 }
  0xb7   :  { %v1643_v35 = vcombine.high %v1639_v33, %v1639_v33  ;;  %v1688_v18 = vrot.slane %v1660_v57, %v5571_v6  ;;  %v1689_v52 = vcombine.high %v1667_v50, %v1667_v50  ;;  %v1814_v61 = vcombine.high %v1810_v41, %v1810_v41 }
  0xb8   :  { %v1589_v11 = vmax.f32 %v1588_v58, 0.0  ;;  %v1690_v17 = vcombine.high %v1674_v22, %v1674_v22  ;;  %v1691_v25 = vcombine.high %v1681_v5, %v1681_v5  ;;  %v1821_v46 = vrot.slane %v1810_v41, %v5571_v6 }
  0xb9   :  { %v1692_v39 = vcombine.high %v1688_v18, %v1688_v18  ;;  %v1696_v54 = vrot.slane %v1618_v4, %v5582_v28  ;;  %v1700_v44 = vrot.slane %v1632_v48, %v5582_v28  ;;  %v1704_v0 = vrot.slane %v1640_v34, %v5582_v28 }
  0xba   :  { %v1708_v49 = vrot.slane %v1642_v13, %v5582_v28  ;;  %v1712_v23 = vrot.slane %v1625_v20, %v5582_v28  ;;  %v1716_v21 = vrot.slane %v1639_v33, %v5582_v28  ;;  %v1720_v30 = vrot.slane %v1641_v24, %v5582_v28  ;;  %v1811_v13 = vld [vmem:[#allocation5 + $0x88] sm:$0xff] }
  0xbb   :  { %v1724_v60 = vrot.slane %v1643_v35, %v5582_v28  ;;  %v1728_v10 = vrot.slane %v1667_v50, %v5582_v28  ;;  %v1732_v51 = vrot.slane %v1681_v5, %v5582_v28  ;;  %v1736_v45 = vrot.slane %v1689_v52, %v5582_v28 }
  0xbc   :  { %v1740_v53 = vrot.slane %v1691_v25, %v5582_v28  ;;  %v1744_v27 = vrot.slane %v1674_v22, %v5582_v28  ;;  %v1748_v36 = vrot.slane %v1688_v18, %v5582_v28  ;;  %v1752_v43 = vrot.slane %v1690_v17, %v5582_v28 }
  0xbd   :  { %v1756_v12 = vrot.slane %v1692_v39, %v5582_v28  ;;  %v1773_v2 = vmul.f32 %v1696_v54, %v1589_v11  ;;  %v1774_v62 = vmul.f32 %v1700_v44, %v1589_v11  ;;  %v1775_v4 = vmul.f32 %v1704_v0, %v1589_v11 }
  0xbe   :  { %v1776_v16 = vmul.f32 %v1708_v49, %v1589_v11  ;;  %v1777_v19 = vmul.f32 %v1712_v23, %v1589_v11  ;;  %v1778_v29 = vmul.f32 %v1716_v21, %v1589_v11  ;;  %v1779_v57 = vmul.f32 %v1720_v30, %v1589_v11 }
  0xbf   :  { %v1780_v58 = vmul.f32 %v1724_v60, %v1589_v11  ;;  %v1781_v20 = vmul.f32 %v1728_v10, %v1589_v11  ;;  %v1782_v48 = vmul.f32 %v1732_v51, %v1589_v11  ;;  %v1783_v33 = vmul.f32 %v1736_v45, %v1589_v11 }
  0xc0   :  { %v1784_v34 = vmul.f32 %v1740_v53, %v1589_v11  ;;  %v1785_v50 = vmul.f32 %v1744_v27, %v1589_v11  ;;  %v1786_v41 = vmul.f32 %v1748_v36, %v1589_v11  ;;  %v1787_v24 = vmul.f32 %v1752_v43, %v1589_v11 }
  0xc1   :  { %v1788_v22 = vmul.f32 %v1756_v12, %v1589_v11  ;;  %v6154_v5 = vadd.f32 %v1773_v2, %v6073_v26  ;;  %v6157_v35 = vadd.f32 %v1774_v62, %v6076_v47  ;;  %v6160_v18 = vadd.f32 %v1775_v4, %v6079_v40 }
  0xc2   :  { %v6163_v52 = vadd.f32 %v1776_v16, %v6082_v37  ;;  %v6166_v17 = vadd.f32 %v1777_v19, %v6085_v38  ;;  %v6169_v25 = vadd.f32 %v1778_v29, %v6088_v7  ;;  %v1828_v11 = vrot.slane %v1814_v61, %v5571_v6 }
  0xc3   :  { %v1806_v26 = vand.u32 2147483647, %v6131_v55  ;;  %v1829_v39 = vcombine.high %v1821_v46, %v1821_v46  ;;  %v1863_v54 = vcombine.high %v1811_v13, %v1811_v13  ;;  %v1870_v47 = vrot.slane %v1811_v13, %v5571_v6 }
  0xc4   :  { %v6175_v40 = vadd.f32 %v1779_v57, %v6091_v1  ;;  %v6178_v37 = vadd.f32 %v1780_v58, %v6096_v59  ;;  %v1830_v44 = vcombine.high %v1828_v11, %v1828_v11  ;;  %v1837_v38 = vrot.slane %v1821_v46, %v5571_v6 }
  0xc5   :  { %v6182_v7 = vadd.f32 %v1781_v20, %v6099_v3  ;;  %v6185_v61 = vadd.f32 %v1782_v48, %v6104_v14  ;;  %v1877_v55 = vrot.slane %v1863_v54, %v5571_v6  ;;  %v1878_v0 = vcombine.high %v1870_v47, %v1870_v47 }
  0xc6   :  { %v6189_v49 = vadd.f32 %v1783_v33, %v6109_v56  ;;  %v6192_v1 = vadd.f32 %v1784_v34, %v6112_v9  ;;  %v6195_v59 = vadd.f32 %v1785_v50, %v6115_v8  ;;  %v6198_v46 = vadd.f32 %v1786_v41, %v6118_v31 }
  0xc7   :  { %v1807_v3 = vsub.f32 1.0, %v1806_v26  ;;  %v1844_v23 = vrot.slane %v1828_v11, %v5571_v6  ;;  %v1851_v14 = vrot.slane %v1829_v39, %v5571_v6  ;;  %v1879_v21 = vcombine.high %v1877_v55, %v1877_v55 }
  0xc8   :  { %v6203_v30 = vadd.f32 %v1787_v24, %v6121_v63  ;;  %v1858_v56 = vrot.slane %v1830_v44, %v5571_v6  ;;  %v1859_v60 = vcombine.high %v1837_v38, %v1837_v38  ;;  %v1886_v9 = vrot.slane %v1870_v47, %v5571_v6 }
  0xc9   :  { %v1860_v10 = vcombine.high %v1844_v23, %v1844_v23  ;;  %v1861_v8 = vcombine.high %v1851_v14, %v1851_v14  ;;  %v1893_v51 = vrot.slane %v1877_v55, %v5571_v6  ;;  %v1900_v31 = vrot.slane %v1878_v0, %v5571_v6 }
  0xca   :  { %v6210_v45 = vadd.f32 %v1788_v22, %v6124_v32  ;;  %v1862_v53 = vcombine.high %v1858_v56, %v1858_v56  ;;  %v1907_v27 = vrot.slane %v1879_v21, %v5571_v6  ;;  %v1908_v36 = vcombine.high %v1886_v9, %v1886_v9 }
  0xcb   :  { %v1808_v63 = vmax.f32 %v1807_v3, 0.0  ;;  %v1909_v43 = vcombine.high %v1893_v51, %v1893_v51  ;;  %v1910_v12 = vcombine.high %v1900_v31, %v1900_v31  ;;  %v6214_v2 = vadd.f32 -9.0, %v5575_v15 }
  0xcc   :  { %v1911_v62 = vcombine.high %v1907_v27, %v1907_v27  ;;  %v1915_v4 = vrot.slane %v1837_v38, %v5582_v28  ;;  %v1919_v16 = vrot.slane %v1851_v14, %v5582_v28  ;;  %v1923_v19 = vrot.slane %v1859_v60, %v5582_v28 }
  0xcd   :  { %v1927_v32 = vrot.slane %v1861_v8, %v5582_v28  ;;  %v1931_v29 = vrot.slane %v1844_v23, %v5582_v28  ;;  %v1935_v57 = vrot.slane %v1858_v56, %v5582_v28  ;;  %v1939_v58 = vrot.slane %v1860_v10, %v5582_v28  ;;  %v2030_v10 = vld [vmem:[#allocation5 + $0x98] sm:$0xff] }
  0xce   :  { %v1943_v20 = vrot.slane %v1862_v53, %v5582_v28  ;;  %v1947_v48 = vrot.slane %v1886_v9, %v5582_v28  ;;  %v1951_v33 = vrot.slane %v1900_v31, %v5582_v28  ;;  %v1955_v34 = vrot.slane %v1908_v36, %v5582_v28  ;;  %v2029_v9 = vld [vmem:[#allocation5 + $0x90] sm:$0xff] }
  0xcf   :  { %v1959_v50 = vrot.slane %v1910_v12, %v5582_v28  ;;  %v1963_v41 = vrot.slane %v1893_v51, %v5582_v28  ;;  %v1967_v24 = vrot.slane %v1907_v27, %v5582_v28  ;;  %v1971_v13 = vrot.slane %v1909_v43, %v5582_v28 }
  0xd0   :  { %v1975_v22 = vrot.slane %v1911_v62, %v5582_v28  ;;  %v1992_v11 = vmul.f32 %v1915_v4, %v1808_v63  ;;  %v1993_v26 = vmul.f32 %v1919_v16, %v1808_v63  ;;  %v1994_v39 = vmul.f32 %v1923_v19, %v1808_v63 }
  0xd1   :  { %v1995_v54 = vmul.f32 %v1927_v32, %v1808_v63  ;;  %v1996_v47 = vmul.f32 %v1931_v29, %v1808_v63  ;;  %v1997_v44 = vmul.f32 %v1935_v57, %v1808_v63  ;;  %v1998_v38 = vmul.f32 %v1939_v58, %v1808_v63 }
  0xd2   :  { %v1999_v55 = vmul.f32 %v1943_v20, %v1808_v63  ;;  %v2000_v0 = vmul.f32 %v1947_v48, %v1808_v63  ;;  %v2001_v3 = vmul.f32 %v1951_v33, %v1808_v63  ;;  %v2002_v23 = vmul.f32 %v1955_v34, %v1808_v63 }
  0xd3   :  { %v2003_v14 = vmul.f32 %v1959_v50, %v1808_v63  ;;  %v2004_v21 = vmul.f32 %v1963_v41, %v1808_v63  ;;  %v2005_v56 = vmul.f32 %v1967_v24, %v1808_v63  ;;  %v2006_v60 = vmul.f32 %v1971_v13, %v1808_v63  ;;  %v2248_v50 = vld [vmem:[#allocation5 + $0xa0] sm:$0xff] }
  0xd4   :  { %v2007_v8 = vmul.f32 %v1975_v22, %v1808_v63  ;;  %v6233_v51 = vadd.f32 %v1992_v11, %v6154_v5  ;;  %v6236_v31 = vadd.f32 %v1993_v26, %v6157_v35  ;;  %v6239_v53 = vadd.f32 %v1994_v39, %v6160_v18 }
  0xd5   :  { %v6242_v27 = vadd.f32 %v1995_v54, %v6163_v52  ;;  %v6245_v36 = vadd.f32 %v1996_v47, %v6166_v17  ;;  %v6248_v43 = vadd.f32 %v1997_v44, %v6169_v25  ;;  %v2033_v12 = vcombine.high %v2029_v9, %v2029_v9 }
  0xd6   :  { %v6251_v63 = vadd.f32 %v1998_v38, %v6175_v40  ;;  %v2040_v5 = vrot.slane %v2029_v9, %v5571_v6  ;;  %v2082_v35 = vcombine.high %v2030_v10, %v2030_v10  ;;  %v2089_v62 = vrot.slane %v2030_v10, %v5571_v6 }
  0xd7   :  { %v6256_v18 = vadd.f32 %v1999_v55, %v6178_v37  ;;  %v6259_v52 = vadd.f32 %v2000_v0, %v6182_v7  ;;  %v2025_v17 = vand.u32 2147483647, %v6214_v2  ;;  %v2047_v25 = vrot.slane %v2033_v12, %v5571_v6 }
  0xd8   :  { %v6264_v4 = vadd.f32 %v2001_v3, %v6185_v61  ;;  %v2048_v40 = vcombine.high %v2040_v5, %v2040_v5  ;;  %v2056_v16 = vrot.slane %v2040_v5, %v5571_v6  ;;  %v2096_v19 = vrot.slane %v2082_v35, %v5571_v6 }
  0xd9   :  { %v6269_v32 = vadd.f32 %v2002_v23, %v6189_v49  ;;  %v6272_v37 = vadd.f32 %v2003_v14, %v6192_v1  ;;  %v2049_v7 = vcombine.high %v2047_v25, %v2047_v25  ;;  %v2097_v29 = vcombine.high %v2089_v62, %v2089_v62 }
  0xda   :  { %v6275_v2 = vadd.f32 %v2004_v21, %v6195_v59  ;;  %v6278_v57 = vadd.f32 %v2005_v56, %v6198_v46  ;;  %v6281_v61 = vadd.f32 %v2006_v60, %v6203_v30  ;;  %v2098_v58 = vcombine.high %v2096_v19, %v2096_v19 }
  0xdb   :  { %v6284_v20 = vadd.f32 %v2007_v8, %v6210_v45  ;;  %v2026_v49 = vsub.f32 1.0, %v2025_v17  ;;  %v2063_v48 = vrot.slane %v2047_v25, %v5571_v6  ;;  %v2070_v1 = vrot.slane %v2048_v40, %v5571_v6 }
  0xdc   :  { %v2077_v33 = vrot.slane %v2049_v7, %v5571_v6  ;;  %v2078_v34 = vcombine.high %v2056_v16, %v2056_v16  ;;  %v2105_v59 = vrot.slane %v2089_v62, %v5571_v6  ;;  %v6291_v46 = vadd.f32 -10.0, %v5575_v15 }
  0xdd   :  { %v2079_v30 = vcombine.high %v2063_v48, %v2063_v48  ;;  %v2080_v41 = vcombine.high %v2070_v1, %v2070_v1  ;;  %v2112_v24 = vrot.slane %v2096_v19, %v5571_v6  ;;  %v2119_v45 = vrot.slane %v2097_v29, %v5571_v6 }
  0xde   :  { %v2081_v13 = vcombine.high %v2077_v33, %v2077_v33  ;;  %v2126_v22 = vrot.slane %v2098_v58, %v5571_v6  ;;  %v2127_v11 = vcombine.high %v2105_v59, %v2105_v59  ;;  %v2252_v26 = vcombine.high %v2248_v50, %v2248_v50 }
  0xdf   :  { %v2027_v39 = vmax.f32 %v2026_v49, 0.0  ;;  %v2128_v54 = vcombine.high %v2112_v24, %v2112_v24  ;;  %v2129_v47 = vcombine.high %v2119_v45, %v2119_v45  ;;  %v2259_v44 = vrot.slane %v2248_v50, %v5571_v6 }
  0xe0   :  { %v2130_v38 = vcombine.high %v2126_v22, %v2126_v22  ;;  %v2134_v55 = vrot.slane %v2056_v16, %v5582_v28  ;;  %v2138_v0 = vrot.slane %v2070_v1, %v5582_v28  ;;  %v2142_v3 = vrot.slane %v2078_v34, %v5582_v28 }
  0xe1   :  { %v2146_v23 = vrot.slane %v2080_v41, %v5582_v28  ;;  %v2150_v14 = vrot.slane %v2063_v48, %v5582_v28  ;;  %v2154_v21 = vrot.slane %v2077_v33, %v5582_v28  ;;  %v2158_v56 = vrot.slane %v2079_v30, %v5582_v28  ;;  %v2249_v41 = vld [vmem:[#allocation5 + $0xa8] sm:$0xff] }
  0xe2   :  { %v2162_v60 = vrot.slane %v2081_v13, %v5582_v28  ;;  %v2166_v9 = vrot.slane %v2105_v59, %v5582_v28  ;;  %v2170_v10 = vrot.slane %v2119_v45, %v5582_v28  ;;  %v2174_v8 = vrot.slane %v2127_v11, %v5582_v28 }
  0xe3   :  { %v2178_v12 = vrot.slane %v2129_v47, %v5582_v28  ;;  %v2182_v5 = vrot.slane %v2112_v24, %v5582_v28  ;;  %v2186_v35 = vrot.slane %v2126_v22, %v5582_v28  ;;  %v2190_v62 = vrot.slane %v2128_v54, %v5582_v28 }
  0xe4   :  { %v2194_v17 = vrot.slane %v2130_v38, %v5582_v28  ;;  %v2211_v25 = vmul.f32 %v2134_v55, %v2027_v39  ;;  %v2212_v40 = vmul.f32 %v2138_v0, %v2027_v39  ;;  %v2213_v16 = vmul.f32 %v2142_v3, %v2027_v39 }
  0xe5   :  { %v2214_v19 = vmul.f32 %v2146_v23, %v2027_v39  ;;  %v2215_v7 = vmul.f32 %v2150_v14, %v2027_v39  ;;  %v2216_v29 = vmul.f32 %v2154_v21, %v2027_v39  ;;  %v2217_v58 = vmul.f32 %v2158_v56, %v2027_v39 }
  0xe6   :  { %v2218_v49 = vmul.f32 %v2162_v60, %v2027_v39  ;;  %v2219_v48 = vmul.f32 %v2166_v9, %v2027_v39  ;;  %v2220_v1 = vmul.f32 %v2170_v10, %v2027_v39  ;;  %v2221_v33 = vmul.f32 %v2174_v8, %v2027_v39 }
  0xe7   :  { %v2222_v34 = vmul.f32 %v2178_v12, %v2027_v39  ;;  %v2223_v59 = vmul.f32 %v2182_v5, %v2027_v39  ;;  %v2224_v50 = vmul.f32 %v2186_v35, %v2027_v39  ;;  %v2225_v30 = vmul.f32 %v2190_v62, %v2027_v39 }
  0xe8   :  { %v2226_v24 = vmul.f32 %v2194_v17, %v2027_v39  ;;  %v6314_v45 = vadd.f32 %v2211_v25, %v6233_v51  ;;  %v6317_v13 = vadd.f32 %v2212_v40, %v6236_v31  ;;  %v6320_v22 = vadd.f32 %v2213_v16, %v6239_v53 }
  0xe9   :  { %v6323_v11 = vadd.f32 %v2214_v19, %v6242_v27  ;;  %v6326_v54 = vadd.f32 %v2215_v7, %v6245_v36  ;;  %v6329_v47 = vadd.f32 %v2216_v29, %v6248_v43  ;;  %v2266_v39 = vrot.slane %v2252_v26, %v5571_v6 }
  0xea   :  { %v2244_v51 = vand.u32 2147483647, %v6291_v46  ;;  %v2267_v38 = vcombine.high %v2259_v44, %v2259_v44  ;;  %v2301_v55 = vcombine.high %v2249_v41, %v2249_v41  ;;  %v2308_v31 = vrot.slane %v2249_v41, %v5571_v6 }
  0xeb   :  { %v6335_v53 = vadd.f32 %v2217_v58, %v6251_v63  ;;  %v6338_v27 = vadd.f32 %v2218_v49, %v6256_v18  ;;  %v2268_v0 = vcombine.high %v2266_v39, %v2266_v39  ;;  %v2275_v36 = vrot.slane %v2259_v44, %v5571_v6 }
  0xec   :  { %v6342_v43 = vadd.f32 %v2219_v48, %v6259_v52  ;;  %v6345_v26 = vadd.f32 %v2220_v1, %v6264_v4  ;;  %v2315_v46 = vrot.slane %v2301_v55, %v5571_v6  ;;  %v2316_v3 = vcombine.high %v2308_v31, %v2308_v31 }
  0xed   :  { %v6349_v23 = vadd.f32 %v2221_v33, %v6269_v32  ;;  %v6352_v63 = vadd.f32 %v2222_v34, %v6272_v37  ;;  %v6355_v18 = vadd.f32 %v2223_v59, %v6275_v2  ;;  %v6358_v44 = vadd.f32 %v2224_v50, %v6278_v57 }
  0xee   :  { %v2245_v52 = vsub.f32 1.0, %v2244_v51  ;;  %v2282_v14 = vrot.slane %v2266_v39, %v5571_v6  ;;  %v2289_v4 = vrot.slane %v2267_v38, %v5571_v6  ;;  %v2317_v21 = vcombine.high %v2315_v46, %v2315_v46 }
  0xef   :  { %v6363_v56 = vadd.f32 %v2225_v30, %v6281_v61  ;;  %v2296_v32 = vrot.slane %v2268_v0, %v5571_v6  ;;  %v2297_v60 = vcombine.high %v2275_v36, %v2275_v36  ;;  %v2324_v37 = vrot.slane %v2308_v31, %v5571_v6 }
  0xf0   :  { %v2298_v9 = vcombine.high %v2282_v14, %v2282_v14  ;;  %v2299_v2 = vcombine.high %v2289_v4, %v2289_v4  ;;  %v2331_v10 = vrot.slane %v2315_v46, %v5571_v6  ;;  %v2338_v57 = vrot.slane %v2316_v3, %v5571_v6 }
  0xf1   :  { %v6370_v8 = vadd.f32 %v2226_v24, %v6284_v20  ;;  %v2300_v12 = vcombine.high %v2296_v32, %v2296_v32  ;;  %v2345_v5 = vrot.slane %v2317_v21, %v5571_v6  ;;  %v2346_v35 = vcombine.high %v2324_v37, %v2324_v37 }
  0xf2   :  { %v2246_v61 = vmax.f32 %v2245_v52, 0.0  ;;  %v2347_v62 = vcombine.high %v2331_v10, %v2331_v10  ;;  %v2348_v17 = vcombine.high %v2338_v57, %v2338_v57  ;;  %v6374_v25 = vadd.f32 -11.0, %v5575_v15 }
  0xf3   :  { %v2349_v40 = vcombine.high %v2345_v5, %v2345_v5  ;;  %v2353_v16 = vrot.slane %v2275_v36, %v5582_v28  ;;  %v2357_v19 = vrot.slane %v2289_v4, %v5582_v28  ;;  %v2361_v7 = vrot.slane %v2297_v60, %v5582_v28 }
  0xf4   :  { %v2365_v20 = vrot.slane %v2299_v2, %v5582_v28  ;;  %v2369_v29 = vrot.slane %v2282_v14, %v5582_v28  ;;  %v2373_v58 = vrot.slane %v2296_v32, %v5582_v28  ;;  %v2377_v49 = vrot.slane %v2298_v9, %v5582_v28  ;;  %v2468_v9 = vld [vmem:[#allocation5 + $0xb8] sm:$0xff] }
  0xf5   :  { %v2381_v48 = vrot.slane %v2300_v12, %v5582_v28  ;;  %v2385_v1 = vrot.slane %v2324_v37, %v5582_v28  ;;  %v2389_v33 = vrot.slane %v2338_v57, %v5582_v28  ;;  %v2393_v34 = vrot.slane %v2346_v35, %v5582_v28  ;;  %v2467_v37 = vld [vmem:[#allocation5 + $0xb0] sm:$0xff] }
  0xf6   :  { %v2397_v59 = vrot.slane %v2348_v17, %v5582_v28  ;;  %v2401_v50 = vrot.slane %v2331_v10, %v5582_v28  ;;  %v2405_v30 = vrot.slane %v2345_v5, %v5582_v28  ;;  %v2409_v41 = vrot.slane %v2347_v62, %v5582_v28 }
  0xf7   :  { %v2413_v24 = vrot.slane %v2349_v40, %v5582_v28  ;;  %v2430_v39 = vmul.f32 %v2353_v16, %v2246_v61  ;;  %v2431_v51 = vmul.f32 %v2357_v19, %v2246_v61  ;;  %v2432_v38 = vmul.f32 %v2361_v7, %v2246_v61 }
  0xf8   :  { %v2433_v55 = vmul.f32 %v2365_v20, %v2246_v61  ;;  %v2434_v31 = vmul.f32 %v2369_v29, %v2246_v61  ;;  %v2435_v0 = vmul.f32 %v2373_v58, %v2246_v61  ;;  %v2436_v36 = vmul.f32 %v2377_v49, %v2246_v61 }
  0xf9   :  { %v2437_v46 = vmul.f32 %v2381_v48, %v2246_v61  ;;  %v2438_v3 = vmul.f32 %v2385_v1, %v2246_v61  ;;  %v2439_v52 = vmul.f32 %v2389_v33, %v2246_v61  ;;  %v2440_v14 = vmul.f32 %v2393_v34, %v2246_v61 }
  0xfa   :  { %v2441_v4 = vmul.f32 %v2397_v59, %v2246_v61  ;;  %v2442_v21 = vmul.f32 %v2401_v50, %v2246_v61  ;;  %v2443_v32 = vmul.f32 %v2405_v30, %v2246_v61  ;;  %v2444_v60 = vmul.f32 %v2409_v41, %v2246_v61  ;;  %v2686_v59 = vld [vmem:[#allocation5 + $0xc0] sm:$0xff] }
  0xfb   :  { %v2445_v2 = vmul.f32 %v2413_v24, %v2246_v61  ;;  %v6393_v10 = vadd.f32 %v2430_v39, %v6314_v45  ;;  %v6396_v57 = vadd.f32 %v2431_v51, %v6317_v13  ;;  %v6399_v12 = vadd.f32 %v2432_v38, %v6320_v22 }
  0xfc   :  { %v6402_v5 = vadd.f32 %v2433_v55, %v6323_v11  ;;  %v6405_v35 = vadd.f32 %v2434_v31, %v6326_v54  ;;  %v6408_v62 = vadd.f32 %v2435_v0, %v6329_v47  ;;  %v2471_v17 = vcombine.high %v2467_v37, %v2467_v37 }
  0xfd   :  { %v6411_v61 = vadd.f32 %v2436_v36, %v6335_v53  ;;  %v2478_v45 = vrot.slane %v2467_v37, %v5571_v6  ;;  %v2520_v13 = vcombine.high %v2468_v9, %v2468_v9  ;;  %v2527_v40 = vrot.slane %v2468_v9, %v5571_v6 }
  0xfe   :  { %v6416_v22 = vadd.f32 %v2437_v46, %v6338_v27  ;;  %v6419_v11 = vadd.f32 %v2438_v3, %v6342_v43  ;;  %v2463_v54 = vand.u32 2147483647, %v6374_v25  ;;  %v2485_v47 = vrot.slane %v2471_v17, %v5571_v6 }
  0xff   :  { %v6424_v16 = vadd.f32 %v2439_v52, %v6345_v26  ;;  %v2486_v53 = vcombine.high %v2478_v45, %v2478_v45  ;;  %v2494_v19 = vrot.slane %v2478_v45, %v5571_v6  ;;  %v2534_v7 = vrot.slane %v2520_v13, %v5571_v6 }
 0x100   :  { %v6429_v20 = vadd.f32 %v2440_v14, %v6349_v23  ;;  %v6432_v27 = vadd.f32 %v2441_v4, %v6352_v63  ;;  %v2487_v43 = vcombine.high %v2485_v47, %v2485_v47  ;;  %v2535_v29 = vcombine.high %v2527_v40, %v2527_v40 }
 0x101   :  { %v6435_v25 = vadd.f32 %v2442_v21, %v6355_v18  ;;  %v6438_v58 = vadd.f32 %v2443_v32, %v6358_v44  ;;  %v6441_v26 = vadd.f32 %v2444_v60, %v6363_v56  ;;  %v2536_v49 = vcombine.high %v2534_v7, %v2534_v7 }
 0x102   :  { %v6444_v48 = vadd.f32 %v2445_v2, %v6370_v8  ;;  %v2464_v23 = vsub.f32 1.0, %v2463_v54  ;;  %v2501_v1 = vrot.slane %v2485_v47, %v5571_v6  ;;  %v2508_v63 = vrot.slane %v2486_v53, %v5571_v6 }
 0x103   :  { %v2515_v33 = vrot.slane %v2487_v43, %v5571_v6  ;;  %v2516_v34 = vcombine.high %v2494_v19, %v2494_v19  ;;  %v2543_v18 = vrot.slane %v2527_v40, %v5571_v6  ;;  %v6451_v44 = vadd.f32 -12.0, %v5575_v15 }
 0x104   :  { %v2517_v56 = vcombine.high %v2501_v1, %v2501_v1  ;;  %v2518_v50 = vcombine.high %v2508_v63, %v2508_v63  ;;  %v2550_v30 = vrot.slane %v2534_v7, %v5571_v6  ;;  %v2557_v8 = vrot.slane %v2535_v29, %v5571_v6 }
 0x105   :  { %v2519_v41 = vcombine.high %v2515_v33, %v2515_v33  ;;  %v2564_v24 = vrot.slane %v2536_v49, %v5571_v6  ;;  %v2565_v39 = vcombine.high %v2543_v18, %v2543_v18  ;;  %v2690_v51 = vcombine.high %v2686_v59, %v2686_v59 }
 0x106   :  { %v2465_v38 = vmax.f32 %v2464_v23, 0.0  ;;  %v2566_v55 = vcombine.high %v2550_v30, %v2550_v30  ;;  %v2567_v31 = vcombine.high %v2557_v8, %v2557_v8  ;;  %v2697_v0 = vrot.slane %v2686_v59, %v5571_v6 }
 0x107   :  { %v2568_v36 = vcombine.high %v2564_v24, %v2564_v24  ;;  %v2572_v46 = vrot.slane %v2494_v19, %v5582_v28  ;;  %v2576_v3 = vrot.slane %v2508_v63, %v5582_v28  ;;  %v2580_v52 = vrot.slane %v2516_v34, %v5582_v28 }
 0x108   :  { %v2584_v14 = vrot.slane %v2518_v50, %v5582_v28  ;;  %v2588_v4 = vrot.slane %v2501_v1, %v5582_v28  ;;  %v2592_v21 = vrot.slane %v2515_v33, %v5582_v28  ;;  %v2596_v32 = vrot.slane %v2517_v56, %v5582_v28  ;;  %v2687_v50 = vld [vmem:[#allocation5 + $0xc8] sm:$0xff] }
 0x109   :  { %v2600_v60 = vrot.slane %v2519_v41, %v5582_v28  ;;  %v2604_v37 = vrot.slane %v2543_v18, %v5582_v28  ;;  %v2608_v9 = vrot.slane %v2557_v8, %v5582_v28  ;;  %v2612_v2 = vrot.slane %v2565_v39, %v5582_v28 }
 0x10a   :  { %v2616_v17 = vrot.slane %v2567_v31, %v5582_v28  ;;  %v2620_v45 = vrot.slane %v2550_v30, %v5582_v28  ;;  %v2624_v13 = vrot.slane %v2564_v24, %v5582_v28  ;;  %v2628_v40 = vrot.slane %v2566_v55, %v5582_v28 }
 0x10b   :  { %v2632_v54 = vrot.slane %v2568_v36, %v5582_v28  ;;  %v2649_v47 = vmul.f32 %v2572_v46, %v2465_v38  ;;  %v2650_v53 = vmul.f32 %v2576_v3, %v2465_v38  ;;  %v2651_v19 = vmul.f32 %v2580_v52, %v2465_v38 }
 0x10c   :  { %v2652_v7 = vmul.f32 %v2584_v14, %v2465_v38  ;;  %v2653_v43 = vmul.f32 %v2588_v4, %v2465_v38  ;;  %v2654_v29 = vmul.f32 %v2592_v21, %v2465_v38  ;;  %v2655_v49 = vmul.f32 %v2596_v32, %v2465_v38 }
 0x10d   :  { %v2656_v23 = vmul.f32 %v2600_v60, %v2465_v38  ;;  %v2657_v1 = vmul.f32 %v2604_v37, %v2465_v38  ;;  %v2658_v63 = vmul.f32 %v2608_v9, %v2465_v38  ;;  %v2659_v33 = vmul.f32 %v2612_v2, %v2465_v38 }
 0x10e   :  { %v2660_v34 = vmul.f32 %v2616_v17, %v2465_v38  ;;  %v2661_v18 = vmul.f32 %v2620_v45, %v2465_v38  ;;  %v2662_v59 = vmul.f32 %v2624_v13, %v2465_v38  ;;  %v2663_v56 = vmul.f32 %v2628_v40, %v2465_v38 }
 0x10f   :  { %v2664_v30 = vmul.f32 %v2632_v54, %v2465_v38  ;;  %v6474_v8 = vadd.f32 %v2649_v47, %v6393_v10  ;;  %v6477_v41 = vadd.f32 %v2650_v53, %v6396_v57  ;;  %v6480_v24 = vadd.f32 %v2651_v19, %v6399_v12 }
 0x110   :  { %v6483_v39 = vadd.f32 %v2652_v7, %v6402_v5  ;;  %v6486_v55 = vadd.f32 %v2653_v43, %v6405_v35  ;;  %v6489_v31 = vadd.f32 %v2654_v29, %v6408_v62  ;;  %v2704_v38 = vrot.slane %v2690_v51, %v5571_v6 }
 0x111   :  { %v2682_v10 = vand.u32 2147483647, %v6451_v44  ;;  %v2705_v36 = vcombine.high %v2697_v0, %v2697_v0  ;;  %v2739_v46 = vcombine.high %v2687_v50, %v2687_v50  ;;  %v2746_v57 = vrot.slane %v2687_v50, %v5571_v6 }
 0x112   :  { %v6495_v12 = vadd.f32 %v2655_v49, %v6411_v61  ;;  %v6498_v5 = vadd.f32 %v2656_v23, %v6416_v22  ;;  %v2706_v3 = vcombine.high %v2704_v38, %v2704_v38  ;;  %v2713_v35 = vrot.slane %v2697_v0, %v5571_v6 }
 0x113   :  { %v6502_v62 = vadd.f32 %v2657_v1, %v6419_v11  ;;  %v6505_v51 = vadd.f32 %v2658_v63, %v6424_v16  ;;  %v2753_v44 = vrot.slane %v2739_v46, %v5571_v6  ;;  %v2754_v52 = vcombine.high %v2746_v57, %v2746_v57 }
 0x114   :  { %v6509_v14 = vadd.f32 %v2659_v33, %v6429_v20  ;;  %v6512_v61 = vadd.f32 %v2660_v34, %v6432_v27  ;;  %v6515_v22 = vadd.f32 %v2661_v18, %v6435_v25  ;;  %v6518_v0 = vadd.f32 %v2662_v59, %v6438_v58 }
 0x115   :  { %v2683_v11 = vsub.f32 1.0, %v2682_v10  ;;  %v2720_v4 = vrot.slane %v2704_v38, %v5571_v6  ;;  %v2727_v16 = vrot.slane %v2705_v36, %v5571_v6  ;;  %v2755_v21 = vcombine.high %v2753_v44, %v2753_v44 }
 0x116   :  { %v6523_v32 = vadd.f32 %v2663_v56, %v6441_v26  ;;  %v2734_v20 = vrot.slane %v2706_v3, %v5571_v6  ;;  %v2735_v60 = vcombine.high %v2713_v35, %v2713_v35  ;;  %v2762_v27 = vrot.slane %v2746_v57, %v5571_v6 }
 0x117   :  { %v2736_v37 = vcombine.high %v2720_v4, %v2720_v4  ;;  %v2737_v25 = vcombine.high %v2727_v16, %v2727_v16  ;;  %v2769_v9 = vrot.slane %v2753_v44, %v5571_v6  ;;  %v2776_v58 = vrot.slane %v2754_v52, %v5571_v6 }
 0x118   :  { %v6530_v2 = vadd.f32 %v2664_v30, %v6444_v48  ;;  %v2738_v17 = vcombine.high %v2734_v20, %v2734_v20  ;;  %v2783_v45 = vrot.slane %v2755_v21, %v5571_v6  ;;  %v2784_v13 = vcombine.high %v2762_v27, %v2762_v27 }
 0x119   :  { %v2684_v26 = vmax.f32 %v2683_v11, 0.0  ;;  %v2785_v40 = vcombine.high %v2769_v9, %v2769_v9  ;;  %v2786_v54 = vcombine.high %v2776_v58, %v2776_v58  ;;  %v6534_v47 = vadd.f32 -13.0, %v5575_v15 }
 0x11a   :  { %v2787_v53 = vcombine.high %v2783_v45, %v2783_v45  ;;  %v2791_v19 = vrot.slane %v2713_v35, %v5582_v28  ;;  %v2795_v7 = vrot.slane %v2727_v16, %v5582_v28  ;;  %v2799_v43 = vrot.slane %v2735_v60, %v5582_v28 }
 0x11b   :  { %v2803_v48 = vrot.slane %v2737_v25, %v5582_v28  ;;  %v2807_v29 = vrot.slane %v2720_v4, %v5582_v28  ;;  %v2811_v49 = vrot.slane %v2734_v20, %v5582_v28  ;;  %v2815_v23 = vrot.slane %v2736_v37, %v5582_v28  ;;  %v2906_v37 = vld [vmem:[#allocation5 + $0xd8] sm:$0xff] }
 0x11c   :  { %v2819_v1 = vrot.slane %v2738_v17, %v5582_v28  ;;  %v2823_v63 = vrot.slane %v2762_v27, %v5582_v28  ;;  %v2827_v33 = vrot.slane %v2776_v58, %v5582_v28  ;;  %v2831_v34 = vrot.slane %v2784_v13, %v5582_v28  ;;  %v2905_v27 = vld [vmem:[#allocation5 + $0xd0] sm:$0xff] }
 0x11d   :  { %v2835_v18 = vrot.slane %v2786_v54, %v5582_v28  ;;  %v2839_v59 = vrot.slane %v2769_v9, %v5582_v28  ;;  %v2843_v56 = vrot.slane %v2783_v45, %v5582_v28  ;;  %v2847_v50 = vrot.slane %v2785_v40, %v5582_v28 }
 0x11e   :  { %v2851_v30 = vrot.slane %v2787_v53, %v5582_v28  ;;  %v2868_v38 = vmul.f32 %v2791_v19, %v2684_v26  ;;  %v2869_v10 = vmul.f32 %v2795_v7, %v2684_v26  ;;  %v2870_v36 = vmul.f32 %v2799_v43, %v2684_v26 }
 0x11f   :  { %v2871_v46 = vmul.f32 %v2803_v48, %v2684_v26  ;;  %v2872_v57 = vmul.f32 %v2807_v29, %v2684_v26  ;;  %v2873_v3 = vmul.f32 %v2811_v49, %v2684_v26  ;;  %v2874_v35 = vmul.f32 %v2815_v23, %v2684_v26 }
 0x120   :  { %v2875_v44 = vmul.f32 %v2819_v1, %v2684_v26  ;;  %v2876_v52 = vmul.f32 %v2823_v63, %v2684_v26  ;;  %v2877_v11 = vmul.f32 %v2827_v33, %v2684_v26  ;;  %v2878_v4 = vmul.f32 %v2831_v34, %v2684_v26 }
 0x121   :  { %v2879_v16 = vmul.f32 %v2835_v18, %v2684_v26  ;;  %v2880_v21 = vmul.f32 %v2839_v59, %v2684_v26  ;;  %v2881_v20 = vmul.f32 %v2843_v56, %v2684_v26  ;;  %v2882_v60 = vmul.f32 %v2847_v50, %v2684_v26  ;;  %v3124_v18 = vld [vmem:[#allocation5 + $0xe0] sm:$0xff] }
 0x122   :  { %v2883_v25 = vmul.f32 %v2851_v30, %v2684_v26  ;;  %v6553_v9 = vadd.f32 %v2868_v38, %v6474_v8  ;;  %v6556_v58 = vadd.f32 %v2869_v10, %v6477_v41  ;;  %v6559_v17 = vadd.f32 %v2870_v36, %v6480_v24 }
 0x123   :  { %v6562_v45 = vadd.f32 %v2871_v46, %v6483_v39  ;;  %v6565_v13 = vadd.f32 %v2872_v57, %v6486_v55  ;;  %v6568_v40 = vadd.f32 %v2873_v3, %v6489_v31  ;;  %v2909_v54 = vcombine.high %v2905_v27, %v2905_v27 }
 0x124   :  { %v6571_v26 = vadd.f32 %v2874_v35, %v6495_v12  ;;  %v2916_v8 = vrot.slane %v2905_v27, %v5571_v6  ;;  %v2958_v41 = vcombine.high %v2906_v37, %v2906_v37  ;;  %v2965_v53 = vrot.slane %v2906_v37, %v5571_v6 }
 0x125   :  { %v6576_v24 = vadd.f32 %v2875_v44, %v6498_v5  ;;  %v6579_v39 = vadd.f32 %v2876_v52, %v6502_v62  ;;  %v2901_v55 = vand.u32 2147483647, %v6534_v47  ;;  %v2923_v31 = vrot.slane %v2909_v54, %v5571_v6 }
 0x126   :  { %v6584_v19 = vadd.f32 %v2877_v11, %v6505_v51  ;;  %v2924_v12 = vcombine.high %v2916_v8, %v2916_v8  ;;  %v2932_v7 = vrot.slane %v2916_v8, %v5571_v6  ;;  %v2972_v43 = vrot.slane %v2958_v41, %v5571_v6 }
 0x127   :  { %v6589_v48 = vadd.f32 %v2878_v4, %v6509_v14  ;;  %v6592_v5 = vadd.f32 %v2879_v16, %v6512_v61  ;;  %v2925_v62 = vcombine.high %v2923_v31, %v2923_v31  ;;  %v2973_v29 = vcombine.high %v2965_v53, %v2965_v53 }
 0x128   :  { %v6595_v47 = vadd.f32 %v2880_v21, %v6515_v22  ;;  %v6598_v49 = vadd.f32 %v2881_v20, %v6518_v0  ;;  %v6601_v51 = vadd.f32 %v2882_v60, %v6523_v32  ;;  %v2974_v23 = vcombine.high %v2972_v43, %v2972_v43 }
 0x129   :  { %v6604_v1 = vadd.f32 %v2883_v25, %v6530_v2  ;;  %v2902_v14 = vsub.f32 1.0, %v2901_v55  ;;  %v2939_v63 = vrot.slane %v2923_v31, %v5571_v6  ;;  %v2946_v61 = vrot.slane %v2924_v12, %v5571_v6 }
 0x12a   :  { %v2953_v33 = vrot.slane %v2925_v62, %v5571_v6  ;;  %v2954_v34 = vcombine.high %v2932_v7, %v2932_v7  ;;  %v2981_v22 = vrot.slane %v2965_v53, %v5571_v6  ;;  %v6611_v0 = vadd.f32 -14.0, %v5575_v15 }
 0x12b   :  { %v2955_v32 = vcombine.high %v2939_v63, %v2939_v63  ;;  %v2956_v59 = vcombine.high %v2946_v61, %v2946_v61  ;;  %v2988_v56 = vrot.slane %v2972_v43, %v5571_v6  ;;  %v2995_v2 = vrot.slane %v2973_v29, %v5571_v6 }
 0x12c   :  { %v2957_v50 = vcombine.high %v2953_v33, %v2953_v33  ;;  %v3002_v30 = vrot.slane %v2974_v23, %v5571_v6  ;;  %v3003_v38 = vcombine.high %v2981_v22, %v2981_v22  ;;  %v3128_v10 = vcombine.high %v3124_v18, %v3124_v18 }
 0x12d   :  { %v2903_v36 = vmax.f32 %v2902_v14, 0.0  ;;  %v3004_v46 = vcombine.high %v2988_v56, %v2988_v56  ;;  %v3005_v57 = vcombine.high %v2995_v2, %v2995_v2  ;;  %v3135_v3 = vrot.slane %v3124_v18, %v5571_v6 }
 0x12e   :  { %v3006_v35 = vcombine.high %v3002_v30, %v3002_v30  ;;  %v3010_v44 = vrot.slane %v2932_v7, %v5582_v28  ;;  %v3014_v52 = vrot.slane %v2946_v61, %v5582_v28  ;;  %v3018_v11 = vrot.slane %v2954_v34, %v5582_v28 }
 0x12f   :  { %v3022_v4 = vrot.slane %v2956_v59, %v5582_v28  ;;  %v3026_v16 = vrot.slane %v2939_v63, %v5582_v28  ;;  %v3030_v21 = vrot.slane %v2953_v33, %v5582_v28  ;;  %v3034_v20 = vrot.slane %v2955_v32, %v5582_v28  ;;  %v3125_v59 = vld [vmem:[#allocation5 + $0xe8] sm:$0xff] }
 0x130   :  { %v3038_v60 = vrot.slane %v2957_v50, %v5582_v28  ;;  %v3042_v27 = vrot.slane %v2981_v22, %v5582_v28  ;;  %v3046_v37 = vrot.slane %v2995_v2, %v5582_v28  ;;  %v3050_v25 = vrot.slane %v3003_v38, %v5582_v28 }
 0x131   :  { %v3054_v54 = vrot.slane %v3005_v57, %v5582_v28  ;;  %v3058_v8 = vrot.slane %v2988_v56, %v5582_v28  ;;  %v3062_v41 = vrot.slane %v3002_v30, %v5582_v28  ;;  %v3066_v53 = vrot.slane %v3004_v46, %v5582_v28 }
 0x132   :  { %v3070_v55 = vrot.slane %v3006_v35, %v5582_v28  ;;  %v3087_v31 = vmul.f32 %v3010_v44, %v2903_v36  ;;  %v3088_v12 = vmul.f32 %v3014_v52, %v2903_v36  ;;  %v3089_v7 = vmul.f32 %v3018_v11, %v2903_v36 }
 0x133   :  { %v3090_v43 = vmul.f32 %v3022_v4, %v2903_v36  ;;  %v3091_v62 = vmul.f32 %v3026_v16, %v2903_v36  ;;  %v3092_v29 = vmul.f32 %v3030_v21, %v2903_v36  ;;  %v3093_v23 = vmul.f32 %v3034_v20, %v2903_v36 }
 0x134   :  { %v3094_v14 = vmul.f32 %v3038_v60, %v2903_v36  ;;  %v3095_v63 = vmul.f32 %v3042_v27, %v2903_v36  ;;  %v3096_v61 = vmul.f32 %v3046_v37, %v2903_v36  ;;  %v3097_v33 = vmul.f32 %v3050_v25, %v2903_v36 }
 0x135   :  { %v3098_v34 = vmul.f32 %v3054_v54, %v2903_v36  ;;  %v3099_v22 = vmul.f32 %v3058_v8, %v2903_v36  ;;  %v3100_v18 = vmul.f32 %v3062_v41, %v2903_v36  ;;  %v3101_v32 = vmul.f32 %v3066_v53, %v2903_v36 }
 0x136   :  { %v3102_v56 = vmul.f32 %v3070_v55, %v2903_v36  ;;  %v6634_v2 = vadd.f32 %v3087_v31, %v6553_v9  ;;  %v6637_v50 = vadd.f32 %v3088_v12, %v6556_v58  ;;  %v6640_v30 = vadd.f32 %v3089_v7, %v6559_v17 }
 0x137   :  { %v6643_v38 = vadd.f32 %v3090_v43, %v6562_v45  ;;  %v6646_v46 = vadd.f32 %v3091_v62, %v6565_v13  ;;  %v6649_v57 = vadd.f32 %v3092_v29, %v6568_v40  ;;  %v3142_v36 = vrot.slane %v3128_v10, %v5571_v6 }
 0x138   :  { %v3120_v9 = vand.u32 2147483647, %v6611_v0  ;;  %v3143_v35 = vcombine.high %v3135_v3, %v3135_v3  ;;  %v3177_v44 = vcombine.high %v3125_v59, %v3125_v59  ;;  %v3184_v58 = vrot.slane %v3125_v59, %v5571_v6 }
 0x139   :  { %v6655_v17 = vadd.f32 %v3093_v23, %v6571_v26  ;;  %v6658_v45 = vadd.f32 %v3094_v14, %v6576_v24  ;;  %v3144_v52 = vcombine.high %v3142_v36, %v3142_v36  ;;  %v3151_v13 = vrot.slane %v3135_v3, %v5571_v6 }
 0x13a   :  { %v6662_v40 = vadd.f32 %v3095_v63, %v6579_v39  ;;  %v6665_v10 = vadd.f32 %v3096_v61, %v6584_v19  ;;  %v3191_v0 = vrot.slane %v3177_v44, %v5571_v6  ;;  %v3192_v11 = vcombine.high %v3184_v58, %v3184_v58 }
 0x13b   :  { %v6669_v4 = vadd.f32 %v3097_v33, %v6589_v48  ;;  %v6672_v26 = vadd.f32 %v3098_v34, %v6592_v5  ;;  %v6675_v24 = vadd.f32 %v3099_v22, %v6595_v47  ;;  %v6678_v3 = vadd.f32 %v3100_v18, %v6598_v49 }
 0x13c   :  { %v3121_v39 = vsub.f32 1.0, %v3120_v9  ;;  %v3158_v16 = vrot.slane %v3142_v36, %v5571_v6  ;;  %v3165_v19 = vrot.slane %v3143_v35, %v5571_v6  ;;  %v3193_v21 = vcombine.high %v3191_v0, %v3191_v0 }
 0x13d   :  { %v6683_v20 = vadd.f32 %v3101_v32, %v6601_v51  ;;  %v3172_v48 = vrot.slane %v3144_v52, %v5571_v6  ;;  %v3173_v60 = vcombine.high %v3151_v13, %v3151_v13  ;;  %v3200_v5 = vrot.slane %v3184_v58, %v5571_v6 }
 0x13e   :  { %v3174_v27 = vcombine.high %v3158_v16, %v3158_v16  ;;  %v3175_v47 = vcombine.high %v3165_v19, %v3165_v19  ;;  %v3207_v37 = vrot.slane %v3191_v0, %v5571_v6  ;;  %v3214_v49 = vrot.slane %v3192_v11, %v5571_v6 }
 0x13f   :  { %v6690_v25 = vadd.f32 %v3102_v56, %v6604_v1  ;;  %v3176_v54 = vcombine.high %v3172_v48, %v3172_v48  ;;  %v3221_v8 = vrot.slane %v3193_v21, %v5571_v6  ;;  %v3222_v41 = vcombine.high %v3200_v5, %v3200_v5 }
 0x140   :  { %v3122_v51 = vmax.f32 %v3121_v39, 0.0  ;;  %v3223_v53 = vcombine.high %v3207_v37, %v3207_v37  ;;  %v3224_v55 = vcombine.high %v3214_v49, %v3214_v49  ;;  %v6694_v31 = vadd.f32 -15.0, %v5575_v15 }
 0x141   :  { %v3225_v12 = vcombine.high %v3221_v8, %v3221_v8  ;;  %v3229_v7 = vrot.slane %v3151_v13, %v5582_v28  ;;  %v3233_v43 = vrot.slane %v3165_v19, %v5582_v28  ;;  %v3237_v62 = vrot.slane %v3173_v60, %v5582_v28  ;;  %v3343_v60 = vld [vmem:[#allocation5 + $0xf0] sm:$0xff] }
 0x142   :  { %v3241_v1 = vrot.slane %v3175_v47, %v5582_v28  ;;  %v3245_v29 = vrot.slane %v3158_v16, %v5582_v28  ;;  %v3249_v23 = vrot.slane %v3172_v48, %v5582_v28  ;;  %v3253_v14 = vrot.slane %v3174_v27, %v5582_v28 }
 0x143   :  { %v3257_v63 = vrot.slane %v3176_v54, %v5582_v28  ;;  %v3261_v15 = vrot.slane %v3200_v5, %v5582_v28  ;;  %v3265_v61 = vrot.slane %v3214_v49, %v5582_v28  ;;  %v3269_v33 = vrot.slane %v3222_v41, %v5582_v28  ;;  %v3344_v5 = vld [vmem:[#allocation5 + $0xf8] sm:$0xff] }
 0x144   :  { %v3273_v34 = vrot.slane %v3224_v55, %v5582_v28  ;;  %v3277_v22 = vrot.slane %v3207_v37, %v5582_v28  ;;  %v3281_v18 = vrot.slane %v3221_v8, %v5582_v28  ;;  %v3285_v32 = vrot.slane %v3223_v53, %v5582_v28 }
 0x145   :  { %v3289_v59 = vrot.slane %v3225_v12, %v5582_v28  ;;  %v3306_v56 = vmul.f32 %v3229_v7, %v3122_v51  ;;  %v3307_v36 = vmul.f32 %v3233_v43, %v3122_v51  ;;  %v3308_v9 = vmul.f32 %v3237_v62, %v3122_v51 }
 0x146   :  { %v3309_v35 = vmul.f32 %v3241_v1, %v3122_v51  ;;  %v3310_v44 = vmul.f32 %v3245_v29, %v3122_v51  ;;  %v3311_v58 = vmul.f32 %v3249_v23, %v3122_v51  ;;  %v3312_v52 = vmul.f32 %v3253_v14, %v3122_v51 }
 0x147   :  { %v3313_v13 = vmul.f32 %v3257_v63, %v3122_v51  ;;  %v3314_v0 = vmul.f32 %v3261_v15, %v3122_v51  ;;  %v3315_v11 = vmul.f32 %v3265_v61, %v3122_v51  ;;  %v3316_v39 = vmul.f32 %v3269_v33, %v3122_v51 }
 0x148   :  { %v3317_v16 = vmul.f32 %v3273_v34, %v3122_v51  ;;  %v3318_v19 = vmul.f32 %v3277_v22, %v3122_v51  ;;  %v3319_v21 = vmul.f32 %v3281_v18, %v3122_v51  ;;  %v3320_v48 = vmul.f32 %v3285_v32, %v3122_v51 }
 0x149   :  { %v3321_v27 = vmul.f32 %v3289_v59, %v3122_v51  ;;  %v6713_v47 = vadd.f32 %v3306_v56, %v6634_v2  ;;  %v6716_v37 = vadd.f32 %v3307_v36, %v6637_v50  ;;  %v6719_v49 = vadd.f32 %v3308_v9, %v6640_v30 }
 0x14a   :  { %v6722_v54 = vadd.f32 %v3309_v35, %v6643_v38  ;;  %v6725_v8 = vadd.f32 %v3310_v44, %v6646_v46  ;;  %v6728_v41 = vadd.f32 %v3311_v58, %v6649_v57  ;;  %v3347_v53 = vcombine.high %v3343_v60, %v3343_v60 }
 0x14b   :  { %v6731_v51 = vadd.f32 %v3312_v52, %v6655_v17  ;;  %v3354_v2 = vrot.slane %v3343_v60, %v5571_v6  ;;  %v3396_v50 = vcombine.high %v3344_v5, %v3344_v5  ;;  %v3403_v55 = vrot.slane %v3344_v5, %v5571_v6 }
 0x14c   :  { %v6736_v30 = vadd.f32 %v3313_v13, %v6658_v45  ;;  %v6739_v38 = vadd.f32 %v3314_v0, %v6662_v40  ;;  %v3339_v46 = vand.u32 2147483647, %v6694_v31  ;;  %v3361_v57 = vrot.slane %v3347_v53, %v5571_v6 }
 0x14d   :  { %v6744_v12 = vadd.f32 %v3315_v11, %v6665_v10  ;;  %v3362_v17 = vcombine.high %v3354_v2, %v3354_v2  ;;  %v3370_v7 = vrot.slane %v3354_v2, %v5571_v6  ;;  %v3410_v43 = vrot.slane %v3396_v50, %v5571_v6 }
 0x14e   :  { %v6749_v62 = vadd.f32 %v3316_v39, %v6669_v4  ;;  %v6752_v45 = vadd.f32 %v3317_v16, %v6672_v26  ;;  %v3363_v40 = vcombine.high %v3361_v57, %v3361_v57  ;;  %v3411_v1 = vcombine.high %v3403_v55, %v3403_v55 }
 0x14f   :  { %v6755_v31 = vadd.f32 %v3318_v19, %v6675_v24  ;;  %v6758_v29 = vadd.f32 %v3319_v21, %v6678_v3  ;;  %v6761_v10 = vadd.f32 %v3320_v48, %v6683_v20  ;;  %v3412_v23 = vcombine.high %v3410_v43, %v3410_v43 }
 0x150   :  { %v6764_v14 = vadd.f32 %v3321_v27, %v6690_v25  ;;  %v3340_v4 = vsub.f32 1.0, %v3339_v46  ;;  %v3377_v63 = vrot.slane %v3361_v57, %v5571_v6  ;;  %v3384_v26 = vrot.slane %v3362_v17, %v5571_v6 }
 0x151   :  { %v3391_v15 = vrot.slane %v3363_v40, %v5571_v6  ;;  %v3392_v61 = vcombine.high %v3370_v7, %v3370_v7  ;;  %v3419_v24 = vrot.slane %v3403_v55, %v5571_v6  ;;  %v3557_v3 = vand.u32 2147483647, %v5591_v42 }
 0x152   :  { %v3393_v33 = vcombine.high %v3377_v63, %v3377_v63  ;;  %v3394_v34 = vcombine.high %v3384_v26, %v3384_v26  ;;  %v3426_v20 = vrot.slane %v3410_v43, %v5571_v6  ;;  %v3433_v22 = vrot.slane %v3411_v1, %v5571_v6 }
 0x153   :  { %v3395_v25 = vcombine.high %v3391_v15, %v3391_v15  ;;  %v3440_v18 = vrot.slane %v3412_v23, %v5571_v6  ;;  %v3441_v32 = vcombine.high %v3419_v24, %v3419_v24  ;;  %v5367_v59 = vadd.f32 -1.0, %v5591_v42 }
 0x154   :  { %v3341_v56 = vmax.f32 %v3340_v4, 0.0  ;;  %v3442_v36 = vcombine.high %v3426_v20, %v3426_v20  ;;  %v3443_v9 = vcombine.high %v3433_v22, %v3433_v22  ;;  %v5368_v35 = vadd.f32 -2.0, %v5591_v42 }
 0x155   :  { %v3444_v44 = vcombine.high %v3440_v18, %v3440_v18  ;;  %v3448_v58 = vrot.slane %v3370_v7, %v5582_v28  ;;  %v3452_v52 = vrot.slane %v3384_v26, %v5582_v28  ;;  %v3456_v13 = vrot.slane %v3392_v61, %v5582_v28 }
 0x156   :  { %v3460_v0 = vrot.slane %v3394_v34, %v5582_v28  ;;  %v3464_v11 = vrot.slane %v3377_v63, %v5582_v28  ;;  %v3468_v39 = vrot.slane %v3391_v15, %v5582_v28  ;;  %v3472_v16 = vrot.slane %v3393_v33, %v5582_v28 }
 0x157   :  { %v3476_v19 = vrot.slane %v3395_v25, %v5582_v28  ;;  %v3480_v21 = vrot.slane %v3419_v24, %v5582_v28  ;;  %v3484_v48 = vrot.slane %v3433_v22, %v5582_v28  ;;  %v3488_v60 = vrot.slane %v3441_v32, %v5582_v28 }
 0x158   :  { %v3492_v5 = vrot.slane %v3443_v9, %v5582_v28  ;;  %v3496_v27 = vrot.slane %v3426_v20, %v5582_v28  ;;  %v3500_v53 = vrot.slane %v3440_v18, %v5582_v28  ;;  %v3504_v2 = vrot.slane %v3442_v36, %v5582_v28 }
 0x159   :  { %v3508_v50 = vrot.slane %v3444_v44, %v5582_v28  ;;  %v3525_v55 = vmul.f32 %v3448_v58, %v3341_v56  ;;  %v3526_v46 = vmul.f32 %v3452_v52, %v3341_v56  ;;  %v3527_v57 = vmul.f32 %v3456_v13, %v3341_v56 }
 0x15a   :  { %v3528_v17 = vmul.f32 %v3460_v0, %v3341_v56  ;;  %v3529_v7 = vmul.f32 %v3464_v11, %v3341_v56  ;;  %v3530_v43 = vmul.f32 %v3468_v39, %v3341_v56  ;;  %v3531_v40 = vmul.f32 %v3472_v16, %v3341_v56 }
 0x15b   :  { %v3532_v1 = vmul.f32 %v3476_v19, %v3341_v56  ;;  %v3533_v23 = vmul.f32 %v3480_v21, %v3341_v56  ;;  %v3534_v4 = vmul.f32 %v3484_v48, %v3341_v56  ;;  %v3535_v63 = vmul.f32 %v3488_v60, %v3341_v56 }
 0x15c   :  { %v3536_v26 = vmul.f32 %v3492_v5, %v3341_v56  ;;  %v3537_v15 = vmul.f32 %v3496_v27, %v3341_v56  ;;  %v3538_v61 = vmul.f32 %v3500_v53, %v3341_v56  ;;  %v3539_v24 = vmul.f32 %v3504_v2, %v3341_v56 }
 0x15d   :  { %v6792_v33 = vmul.f32 %v3508_v50, %v3341_v56  ;;  %v6795_v34 = vadd.f32 %v3525_v55, %v6713_v47  ;;  %v6798_v20 = vadd.f32 %v3526_v46, %v6716_v37  ;;  %v6801_v22 = vadd.f32 %v3527_v57, %v6719_v49 }
 0x15e   :  { %v6804_v25 = vadd.f32 %v3528_v17, %v6722_v54  ;;  %v6807_v18 = vadd.f32 %v3529_v7, %v6725_v8  ;;  %v3558_v32 = vsub.f32 1.0, %v3557_v3  ;;  %v3667_v36 = vand.u32 2147483647, %v5367_v59 }
 0x15f   :  { %v6810_v56 = vadd.f32 %v3530_v43, %v6728_v41  ;;  %v6813_v47 = vadd.f32 %v3531_v40, %v6731_v51  ;;  %v3777_v9 = vand.u32 2147483647, %v5368_v35  ;;  %v5369_v37 = vadd.f32 -3.0, %v5591_v42 }
 0x160   :  { %v6817_v49 = vadd.f32 %v3532_v1, %v6736_v30  ;;  %v6820_v54 = vadd.f32 %v3533_v23, %v6739_v38  ;;  %v3559_v44 = vmax.f32 %v3558_v32, 0.0  ;;  %v3668_v8 = vsub.f32 1.0, %v3667_v36 }
 0x161   :  { %v6823_v3 = vadd.f32 %v3534_v4, %v6744_v12  ;;  %v6826_v41 = vadd.f32 %v3535_v63, %v6749_v62  ;;  %v6829_v51 = vadd.f32 %v3536_v26, %v6752_v45  ;;  %v5370_v59 = vadd.f32 -4.0, %v5591_v42 }
 0x162   :  { %v3561_v35 = vcombine.high %v3559_v44, %v3559_v44  ;;  %v3568_v30 = vrot.slane %v3559_v44, %v5571_v6  ;;  %v3669_v58 = vmax.f32 %v3668_v8, 0.0  ;;  %v3778_v52 = vsub.f32 1.0, %v3777_v9 }
 0x163   :  { %v6834_v38 = vadd.f32 %v3537_v15, %v6755_v31  ;;  %v6837_v13 = vadd.f32 %v3538_v61, %v6758_v29  ;;  %v3887_v12 = vand.u32 2147483647, %v5369_v37  ;;  %v6840_v62 = vadd.f32 -5.0, %v5591_v42 }
 0x164   :  { %v3575_v45 = vrot.slane %v3561_v35, %v5571_v6  ;;  %v3576_v0 = vcombine.high %v3568_v30, %v3568_v30  ;;  %v3584_v11 = vrot.slane %v3568_v30, %v5571_v6  ;;  %v3671_v39 = vcombine.high %v3669_v58, %v3669_v58 }
 0x165   :  { %v6845_v16 = vadd.f32 %v3539_v24, %v6761_v10  ;;  %v3678_v19 = vrot.slane %v3669_v58, %v5571_v6  ;;  %v3997_v31 = vand.u32 2147483647, %v5370_v59  ;;  %v6849_v21 = vadd.f32 -6.0, %v5591_v42 }
 0x166   :  { %v3577_v29 = vcombine.high %v3575_v45, %v3575_v45  ;;  %v3598_v48 = vrot.slane %v3576_v0, %v5571_v6  ;;  %v3779_v60 = vmax.f32 %v3778_v52, 0.0  ;;  %v6853_v5 = vadd.f32 -7.0, %v5591_v42 }
 0x167   :  { %v3591_v27 = vrot.slane %v3575_v45, %v5571_v6  ;;  %v3685_v53 = vrot.slane %v3671_v39, %v5571_v6  ;;  %v3888_v2 = vsub.f32 1.0, %v3887_v12  ;;  %v6858_v10 = vadd.f32 -8.0, %v5591_v42 }
 0x168   :  { %v3605_v50 = vrot.slane %v3577_v29, %v5571_v6  ;;  %v3606_v55 = vcombine.high %v3584_v11, %v3584_v11  ;;  %v3613_v46 = vrot.slane %v3584_v11, %v5582_v28  ;;  %v4107_v57 = vand.u32 2147483647, %v6840_v62 }
 0x169   :  { %v3686_v17 = vcombine.high %v3678_v19, %v3678_v19  ;;  %v3687_v7 = vcombine.high %v3685_v53, %v3685_v53  ;;  %v3694_v43 = vrot.slane %v3678_v19, %v5571_v6  ;;  %v6864_v40 = vsub.f32 1.0, %v3997_v31 }
 0x16a   :  { %v3608_v1 = vcombine.high %v3598_v48, %v3598_v48  ;;  %v3781_v23 = vcombine.high %v3779_v60, %v3779_v60  ;;  %v3788_v4 = vrot.slane %v3779_v60, %v5571_v6  ;;  %v4217_v63 = vand.u32 2147483647, %v6849_v21 }
 0x16b   :  { %v3607_v26 = vcombine.high %v3591_v27, %v3591_v27  ;;  %v3609_v15 = vcombine.high %v3605_v50, %v3605_v50  ;;  %v3701_v61 = vrot.slane %v3685_v53, %v5571_v6  ;;  %v6869_v24 = vmax.f32 %v3888_v2, 0.0 }
 0x16c   :  { %v3617_v32 = vrot.slane %v3598_v48, %v5582_v28  ;;  %v3621_v36 = vrot.slane %v3606_v55, %v5582_v28  ;;  %v3629_v9 = vrot.slane %v3591_v27, %v5582_v28  ;;  %v3650_v37 = vmul.f32 %v3613_v46, %v6795_v34 }
 0x16d   :  { %v3708_v44 = vrot.slane %v3686_v17, %v5571_v6  ;;  %v3715_v8 = vrot.slane %v3687_v7, %v5571_v6  ;;  %v3716_v59 = vcombine.high %v3694_v43, %v3694_v43  ;;  %v3717_v35 = vcombine.high %v3701_v61, %v3701_v61 }
 0x16e   :  { %v3625_v30 = vrot.slane %v3608_v1, %v5582_v28  ;;  %v3633_v58 = vrot.slane %v3605_v50, %v5582_v28  ;;  %v3723_v52 = vrot.slane %v3694_v43, %v5582_v28  ;;  %v3739_v12 = vrot.slane %v3701_v61, %v5582_v28 }
 0x16f   :  { %v3637_v45 = vrot.slane %v3607_v26, %v5582_v28  ;;  %v3641_v0 = vrot.slane %v3609_v15, %v5582_v28  ;;  %v3718_v11 = vcombine.high %v3708_v44, %v3708_v44  ;;  %v3719_v39 = vcombine.high %v3715_v8, %v3715_v8 }
 0x170   :  { %v3651_v19 = vmul.f32 %v3617_v32, %v6795_v34  ;;  %v3727_v31 = vrot.slane %v3708_v44, %v5582_v28  ;;  %v3731_v29 = vrot.slane %v3716_v59, %v5582_v28  ;;  %v3795_v48 = vrot.slane %v3781_v23, %v5571_v6 }
 0x171   :  { %v3652_v60 = vmul.f32 %v3621_v36, %v6795_v34  ;;  %v3654_v27 = vmul.f32 %v3629_v9, %v6795_v34  ;;  %v3743_v53 = vrot.slane %v3715_v8, %v5582_v28  ;;  %v3747_v2 = vrot.slane %v3717_v35, %v5582_v28 }
 0x172   :  { %v3653_v50 = vmul.f32 %v3625_v30, %v6795_v34  ;;  %v3655_v55 = vmul.f32 %v3633_v58, %v6795_v34  ;;  %v3760_v46 = vmul.f32 %v3723_v52, %v6798_v20  ;;  %v3764_v17 = vmul.f32 %v3739_v12, %v6798_v20 }
 0x173   :  { %v3656_v7 = vmul.f32 %v3637_v45, %v6795_v34  ;;  %v3657_v43 = vmul.f32 %v3641_v0, %v6795_v34  ;;  %v3735_v1 = vrot.slane %v3718_v11, %v5582_v28  ;;  %v3751_v23 = vrot.slane %v3719_v39, %v5582_v28 }
 0x174   :  { %v3761_v26 = vmul.f32 %v3727_v31, %v6798_v20  ;;  %v3762_v15 = vmul.f32 %v3731_v29, %v6798_v20  ;;  %v3796_v61 = vcombine.high %v3788_v4, %v3788_v4  ;;  %v3797_v32 = vcombine.high %v3795_v48, %v3795_v48 }
 0x175   :  { %v3765_v36 = vmul.f32 %v3743_v53, %v6798_v20  ;;  %v3766_v9 = vmul.f32 %v3747_v2, %v6798_v20  ;;  %v3804_v44 = vrot.slane %v3788_v4, %v5571_v6  ;;  %v3811_v8 = vrot.slane %v3795_v48, %v5571_v6 }
 0x176   :  { %v3768_v59 = vadd.f32 %v3760_v46, %v3650_v37  ;;  %v3772_v34 = vadd.f32 %v3764_v17, %v3654_v27  ;;  %v3818_v35 = vrot.slane %v3796_v61, %v5571_v6  ;;  %v3825_v30 = vrot.slane %v3797_v32, %v5571_v6 }
 0x177   :  { %v3763_v58 = vmul.f32 %v3735_v1, %v6798_v20  ;;  %v3826_v52 = vcombine.high %v3804_v44, %v3804_v44  ;;  %v3827_v12 = vcombine.high %v3811_v8, %v3811_v8  ;;  %v3833_v45 = vrot.slane %v3804_v44, %v5582_v28 }
 0x178   :  { %v3767_v0 = vmul.f32 %v3751_v23, %v6798_v20  ;;  %v3828_v11 = vcombine.high %v3818_v35, %v3818_v35  ;;  %v3829_v39 = vcombine.high %v3825_v30, %v3825_v30  ;;  %v3849_v4 = vrot.slane %v3811_v8, %v5582_v28 }
 0x179   :  { %v3837_v31 = vrot.slane %v3818_v35, %v5582_v28  ;;  %v3853_v37 = vrot.slane %v3825_v30, %v5582_v28  ;;  %v3891_v29 = vcombine.high %v6869_v24, %v6869_v24  ;;  %v3898_v48 = vrot.slane %v6869_v24, %v5571_v6 }
 0x17a   :  { %v3769_v27 = vadd.f32 %v3761_v26, %v3651_v19  ;;  %v3770_v53 = vadd.f32 %v3762_v15, %v3652_v60  ;;  %v3841_v2 = vrot.slane %v3826_v52, %v5582_v28  ;;  %v3857_v20 = vrot.slane %v3827_v12, %v5582_v28 }
 0x17b   :  { %v3771_v46 = vadd.f32 %v3763_v58, %v3653_v50  ;;  %v3773_v17 = vadd.f32 %v3765_v36, %v3655_v55  ;;  %v3774_v1 = vadd.f32 %v3766_v9, %v3656_v7  ;;  %v3870_v23 = vmul.f32 %v3833_v45, %v6801_v22 }
 0x17c   :  { %v3775_v61 = vadd.f32 %v3767_v0, %v3657_v43  ;;  %v3845_v32 = vrot.slane %v3828_v11, %v5582_v28  ;;  %v3861_v44 = vrot.slane %v3829_v39, %v5582_v28  ;;  %v3874_v8 = vmul.f32 %v3849_v4, %v6801_v22 }
 0x17d   :  { %v3871_v24 = vmul.f32 %v3837_v31, %v6801_v22  ;;  %v3875_v19 = vmul.f32 %v3853_v37, %v6801_v22  ;;  %v3905_v60 = vrot.slane %v3891_v29, %v5571_v6  ;;  %v3906_v26 = vcombine.high %v3898_v48, %v3898_v48 }
 0x17e   :  { %v3872_v50 = vmul.f32 %v3841_v2, %v6801_v22  ;;  %v3876_v55 = vmul.f32 %v3857_v20, %v6801_v22  ;;  %v3914_v7 = vrot.slane %v3898_v48, %v5571_v6  ;;  %v3999_v43 = vmax.f32 %v6864_v40, 0.0 }
 0x17f   :  { %v3878_v15 = vadd.f32 %v3870_v23, %v3768_v59  ;;  %v3907_v36 = vcombine.high %v3905_v60, %v3905_v60  ;;  %v3921_v9 = vrot.slane %v3905_v60, %v5571_v6  ;;  %v3928_v35 = vrot.slane %v3906_v26, %v5571_v6 }
 0x180   :  { %v3882_v30 = vadd.f32 %v3874_v8, %v3772_v34  ;;  %v3936_v58 = vcombine.high %v3914_v7, %v3914_v7  ;;  %v3943_v52 = vrot.slane %v3914_v7, %v5582_v28  ;;  %v4001_v12 = vcombine.high %v3999_v43, %v3999_v43 }
 0x181   :  { %v3873_v45 = vmul.f32 %v3845_v32, %v6801_v22  ;;  %v3935_v0 = vrot.slane %v3907_v36, %v5571_v6  ;;  %v3937_v11 = vcombine.high %v3921_v9, %v3921_v9  ;;  %v3938_v39 = vcombine.high %v3928_v35, %v3928_v35 }
 0x182   :  { %v3877_v4 = vmul.f32 %v3861_v44, %v6801_v22  ;;  %v3879_v40 = vadd.f32 %v3871_v24, %v3769_v27  ;;  %v3947_v59 = vrot.slane %v3928_v35, %v5582_v28  ;;  %v4008_v31 = vrot.slane %v3999_v43, %v5571_v6 }
 0x183   :  { %v3939_v37 = vcombine.high %v3935_v0, %v3935_v0  ;;  %v3951_v34 = vrot.slane %v3936_v58, %v5582_v28  ;;  %v3959_v29 = vrot.slane %v3921_v9, %v5582_v28  ;;  %v3980_v48 = vmul.f32 %v3943_v52, %v6804_v25 }
 0x184   :  { %v3880_v2 = vadd.f32 %v3872_v50, %v3770_v53  ;;  %v3883_v20 = vadd.f32 %v3875_v19, %v3773_v17  ;;  %v3884_v23 = vadd.f32 %v3876_v55, %v3774_v1  ;;  %v4015_v32 = vrot.slane %v4001_v12, %v5571_v6 }
 0x185   :  { %v3955_v8 = vrot.slane %v3938_v39, %v5582_v28  ;;  %v3963_v22 = vrot.slane %v3935_v0, %v5582_v28  ;;  %v3967_v27 = vrot.slane %v3937_v11, %v5582_v28  ;;  %v4108_v44 = vsub.f32 1.0, %v4107_v57 }
 0x186   :  { %v3881_v24 = vadd.f32 %v3873_v45, %v3771_v46  ;;  %v3885_v60 = vadd.f32 %v3877_v4, %v3775_v61  ;;  %v3981_v26 = vmul.f32 %v3947_v59, %v6804_v25  ;;  %v4016_v7 = vcombine.high %v4008_v31, %v4008_v31 }
 0x187   :  { %v3971_v53 = vrot.slane %v3939_v37, %v5582_v28  ;;  %v3982_v17 = vmul.f32 %v3951_v34, %v6804_v25  ;;  %v3984_v1 = vmul.f32 %v3959_v29, %v6804_v25  ;;  %v3988_v19 = vadd.f32 %v3980_v48, %v3878_v15 }
 0x188   :  { %v4017_v50 = vcombine.high %v4015_v32, %v4015_v32  ;;  %v4024_v55 = vrot.slane %v4008_v31, %v5571_v6  ;;  %v4031_v43 = vrot.slane %v4015_v32, %v5571_v6  ;;  %v4038_v62 = vrot.slane %v4016_v7, %v5571_v6 }
 0x189   :  { %v3983_v57 = vmul.f32 %v3955_v8, %v6804_v25  ;;  %v3985_v46 = vmul.f32 %v3963_v22, %v6804_v25  ;;  %v3986_v61 = vmul.f32 %v3967_v27, %v6804_v25  ;;  %v4109_v36 = vmax.f32 %v4108_v44, 0.0 }
 0x18a   :  { %v4045_v9 = vrot.slane %v4017_v50, %v5571_v6  ;;  %v4046_v35 = vcombine.high %v4024_v55, %v4024_v55  ;;  %v4047_v58 = vcombine.high %v4031_v43, %v4031_v43  ;;  %v4048_v52 = vcombine.high %v4038_v62, %v4038_v62 }
 0x18b   :  { %v3987_v15 = vmul.f32 %v3971_v53, %v6804_v25  ;;  %v3989_v12 = vadd.f32 %v3981_v26, %v3879_v40  ;;  %v4053_v45 = vrot.slane %v4024_v55, %v5582_v28  ;;  %v4057_v0 = vrot.slane %v4038_v62, %v5582_v28 }
 0x18c   :  { %v3990_v11 = vadd.f32 %v3982_v17, %v3880_v2  ;;  %v4049_v39 = vcombine.high %v4045_v9, %v4045_v9  ;;  %v4061_v4 = vrot.slane %v4046_v35, %v5582_v28  ;;  %v4069_v59 = vrot.slane %v4031_v43, %v5582_v28 }
 0x18d   :  { %v3992_v31 = vadd.f32 %v3984_v1, %v3882_v30  ;;  %v4065_v37 = vrot.slane %v4048_v52, %v5582_v28  ;;  %v4111_v34 = vcombine.high %v4109_v36, %v4109_v36  ;;  %v4218_v29 = vsub.f32 1.0, %v4217_v63 }
 0x18e   :  { %v4073_v25 = vrot.slane %v4045_v9, %v5582_v28  ;;  %v4077_v40 = vrot.slane %v4047_v58, %v5582_v28  ;;  %v4090_v48 = vmul.f32 %v4053_v45, %v6807_v18  ;;  %v4091_v2 = vmul.f32 %v4057_v0, %v6807_v18 }
 0x18f   :  { %v3991_v32 = vadd.f32 %v3983_v57, %v3881_v24  ;;  %v3993_v8 = vadd.f32 %v3985_v46, %v3883_v20  ;;  %v3994_v22 = vadd.f32 %v3986_v61, %v3884_v23  ;;  %v3995_v27 = vadd.f32 %v3987_v15, %v3885_v60 }
 0x190   :  { %v4081_v30 = vrot.slane %v4049_v39, %v5582_v28  ;;  %v4092_v44 = vmul.f32 %v4061_v4, %v6807_v18  ;;  %v4094_v26 = vmul.f32 %v4069_v59, %v6807_v18  ;;  %v4327_v21 = vand.u32 2147483647, %v6853_v5 }
 0x191   :  { %v4093_v63 = vmul.f32 %v4065_v37, %v6807_v18  ;;  %v4118_v7 = vrot.slane %v4109_v36, %v5571_v6  ;;  %v4125_v53 = vrot.slane %v4111_v34, %v5571_v6  ;;  %v4219_v17 = vmax.f32 %v4218_v29, 0.0 }
 0x192   :  { %v4095_v24 = vmul.f32 %v4073_v25, %v6807_v18  ;;  %v4096_v20 = vmul.f32 %v4077_v40, %v6807_v18  ;;  %v4098_v23 = vadd.f32 %v4090_v48, %v3988_v19  ;;  %v4099_v60 = vadd.f32 %v4091_v2, %v3989_v12 }
 0x193   :  { %v4126_v1 = vcombine.high %v4118_v7, %v4118_v7  ;;  %v4127_v50 = vcombine.high %v4125_v53, %v4125_v53  ;;  %v4134_v55 = vrot.slane %v4118_v7, %v5571_v6  ;;  %v4141_v43 = vrot.slane %v4125_v53, %v5571_v6 }
 0x194   :  { %v4097_v5 = vmul.f32 %v4081_v30, %v6807_v18  ;;  %v4102_v62 = vadd.f32 %v4094_v26, %v3992_v31  ;;  %v4221_v57 = vcombine.high %v4219_v17, %v4219_v17  ;;  %v4228_v46 = vrot.slane %v4219_v17, %v5571_v6 }
 0x195   :  { %v4148_v61 = vrot.slane %v4126_v1, %v5571_v6  ;;  %v4155_v36 = vrot.slane %v4127_v50, %v5571_v6  ;;  %v4156_v9 = vcombine.high %v4134_v55, %v4134_v55  ;;  %v4157_v35 = vcombine.high %v4141_v43, %v4141_v43 }
 0x196   :  { %v4100_v19 = vadd.f32 %v4092_v44, %v3990_v11  ;;  %v4101_v58 = vadd.f32 %v4093_v63, %v3991_v32  ;;  %v4163_v52 = vrot.slane %v4134_v55, %v5582_v28  ;;  %v4328_v15 = vsub.f32 1.0, %v4327_v21 }
 0x197   :  { %v4158_v12 = vcombine.high %v4148_v61, %v4148_v61  ;;  %v4159_v45 = vcombine.high %v4155_v36, %v4155_v36  ;;  %v4179_v0 = vrot.slane %v4141_v43, %v5582_v28  ;;  %v4437_v18 = vand.u32 2147483647, %v6858_v10 }
 0x198   :  { %v4103_v39 = vadd.f32 %v4095_v24, %v3993_v8  ;;  %v4167_v4 = vrot.slane %v4148_v61, %v5582_v28  ;;  %v4171_v59 = vrot.slane %v4156_v9, %v5582_v28  ;;  %v4235_v31 = vrot.slane %v4221_v57, %v5571_v6 }
 0x199   :  { %v4104_v37 = vadd.f32 %v4096_v20, %v3994_v22  ;;  %v4183_v11 = vrot.slane %v4155_v36, %v5582_v28  ;;  %v4187_v34 = vrot.slane %v4157_v35, %v5582_v28  ;;  %v4236_v29 = vcombine.high %v4228_v46, %v4228_v46 }
 0x19a   :  { %v4105_v25 = vadd.f32 %v4097_v5, %v3995_v27  ;;  %v4200_v40 = vmul.f32 %v4163_v52, %v6810_v56  ;;  %v4329_v48 = vmax.f32 %v4328_v15, 0.0  ;;  %v6995_v2 = vadd.f32 -9.0, %v5591_v42 }
 0x19b   :  { %v4175_v10 = vrot.slane %v4158_v12, %v5582_v28  ;;  %v4191_v32 = vrot.slane %v4159_v45, %v5582_v28  ;;  %v4204_v8 = vmul.f32 %v4179_v0, %v6810_v56  ;;  %v4438_v30 = vsub.f32 1.0, %v4437_v18 }
 0x19c   :  { %v4201_v22 = vmul.f32 %v4167_v4, %v6810_v56  ;;  %v4202_v44 = vmul.f32 %v4171_v59, %v6810_v56  ;;  %v4237_v26 = vcombine.high %v4235_v31, %v4235_v31  ;;  %v4244_v27 = vrot.slane %v4228_v46, %v5571_v6 }
 0x19d   :  { %v4205_v21 = vmul.f32 %v4183_v11, %v6810_v56  ;;  %v4206_v63 = vmul.f32 %v4187_v34, %v6810_v56  ;;  %v4251_v7 = vrot.slane %v4235_v31, %v5571_v6  ;;  %v4258_v53 = vrot.slane %v4236_v29, %v5571_v6 }
 0x19e   :  { %v4208_v17 = vadd.f32 %v4200_v40, %v4098_v23  ;;  %v4265_v24 = vrot.slane %v4237_v26, %v5571_v6  ;;  %v4266_v20 = vcombine.high %v4244_v27, %v4244_v27  ;;  %v4273_v1 = vrot.slane %v4244_v27, %v5582_v28 }
 0x19f   :  { %v4203_v50 = vmul.f32 %v4175_v10, %v6810_v56  ;;  %v4207_v55 = vmul.f32 %v4191_v32, %v6810_v56  ;;  %v4267_v43 = vcombine.high %v4251_v7, %v4251_v7  ;;  %v4268_v5 = vcombine.high %v4258_v53, %v4258_v53 }
 0x1a0   :  { %v4212_v57 = vadd.f32 %v4204_v8, %v4102_v62  ;;  %v4269_v46 = vcombine.high %v4265_v24, %v4265_v24  ;;  %v4277_v61 = vrot.slane %v4258_v53, %v5582_v28  ;;  %v4289_v36 = vrot.slane %v4251_v7, %v5582_v28 }
 0x1a1   :  { %v4209_v9 = vadd.f32 %v4201_v22, %v4099_v60  ;;  %v4281_v23 = vrot.slane %v4266_v20, %v5582_v28  ;;  %v4293_v35 = vrot.slane %v4265_v24, %v5582_v28  ;;  %v4331_v52 = vcombine.high %v4329_v48, %v4329_v48 }
 0x1a2   :  { %v4210_v15 = vadd.f32 %v4202_v44, %v4100_v19  ;;  %v4213_v12 = vadd.f32 %v4205_v21, %v4103_v39  ;;  %v4285_v45 = vrot.slane %v4268_v5, %v5582_v28  ;;  %v4310_v56 = vmul.f32 %v4273_v1, %v6813_v47 }
 0x1a3   :  { %v4211_v0 = vadd.f32 %v4203_v50, %v4101_v58  ;;  %v4214_v18 = vadd.f32 %v4206_v63, %v4104_v37  ;;  %v4215_v62 = vadd.f32 %v4207_v55, %v4105_v25  ;;  %v4297_v4 = vrot.slane %v4267_v43, %v5582_v28 }
 0x1a4   :  { %v4301_v59 = vrot.slane %v4269_v46, %v5582_v28  ;;  %v4311_v60 = vmul.f32 %v4277_v61, %v6813_v47  ;;  %v4314_v31 = vmul.f32 %v4289_v36, %v6813_v47  ;;  %v4338_v11 = vrot.slane %v4329_v48, %v5571_v6 }
 0x1a5   :  { %v4312_v19 = vmul.f32 %v4281_v23, %v6813_v47  ;;  %v4315_v39 = vmul.f32 %v4293_v35, %v6813_v47  ;;  %v4345_v34 = vrot.slane %v4331_v52, %v5571_v6  ;;  %v4439_v29 = vmax.f32 %v4438_v30, 0.0 }
 0x1a6   :  { %v4313_v58 = vmul.f32 %v4285_v45, %v6813_v47  ;;  %v4318_v37 = vadd.f32 %v4310_v56, %v4208_v17  ;;  %v4346_v25 = vcombine.high %v4338_v11, %v4338_v11  ;;  %v4354_v40 = vrot.slane %v4338_v11, %v5571_v6 }
 0x1a7   :  { %v4316_v10 = vmul.f32 %v4297_v4, %v6813_v47  ;;  %v4347_v32 = vcombine.high %v4345_v34, %v4345_v34  ;;  %v4361_v8 = vrot.slane %v4345_v34, %v5571_v6  ;;  %v4441_v22 = vcombine.high %v4439_v29, %v4439_v29 }
 0x1a8   :  { %v4319_v48 = vadd.f32 %v4311_v60, %v4209_v9  ;;  %v4368_v44 = vrot.slane %v4346_v25, %v5571_v6  ;;  %v4376_v26 = vcombine.high %v4354_v40, %v4354_v40  ;;  %v4383_v27 = vrot.slane %v4354_v40, %v5582_v28 }
 0x1a9   :  { %v4322_v21 = vadd.f32 %v4314_v31, %v4212_v57  ;;  %v4375_v30 = vrot.slane %v4347_v32, %v5571_v6  ;;  %v4377_v63 = vcombine.high %v4361_v8, %v4361_v8  ;;  %v4399_v7 = vrot.slane %v4361_v8, %v5582_v28 }
 0x1aa   :  { %v4317_v53 = vmul.f32 %v4301_v59, %v6813_v47  ;;  %v4378_v17 = vcombine.high %v4368_v44, %v4368_v44  ;;  %v4448_v24 = vrot.slane %v4439_v29, %v5571_v6  ;;  %v4547_v20 = vand.u32 2147483647, %v6995_v2 }
 0x1ab   :  { %v4379_v1 = vcombine.high %v4375_v30, %v4375_v30  ;;  %v4387_v50 = vrot.slane %v4368_v44, %v5582_v28  ;;  %v4391_v55 = vrot.slane %v4376_v26, %v5582_v28  ;;  %v4455_v43 = vrot.slane %v4441_v22, %v5571_v6 }
 0x1ac   :  { %v4320_v5 = vadd.f32 %v4312_v19, %v4210_v15  ;;  %v4321_v57 = vadd.f32 %v4313_v58, %v4211_v0  ;;  %v4323_v46 = vadd.f32 %v4315_v39, %v4213_v12  ;;  %v4420_v61 = vmul.f32 %v4383_v27, %v6817_v49 }
 0x1ad   :  { %v4324_v36 = vadd.f32 %v4316_v10, %v4214_v18  ;;  %v4403_v47 = vrot.slane %v4375_v30, %v5582_v28  ;;  %v4407_v9 = vrot.slane %v4377_v63, %v5582_v28  ;;  %v4424_v23 = vmul.f32 %v4399_v7, %v6817_v49 }
 0x1ae   :  { %v4325_v2 = vadd.f32 %v4317_v53, %v4215_v62  ;;  %v4395_v35 = vrot.slane %v4378_v17, %v5582_v28  ;;  %v4456_v52 = vcombine.high %v4448_v24, %v4448_v24  ;;  %v4548_v45 = vsub.f32 1.0, %v4547_v20 }
 0x1af   :  { %v4411_v56 = vrot.slane %v4379_v1, %v5582_v28  ;;  %v4421_v15 = vmul.f32 %v4387_v50, %v6817_v49  ;;  %v4422_v12 = vmul.f32 %v4391_v55, %v6817_v49  ;;  %v4457_v0 = vcombine.high %v4455_v43, %v4455_v43 }
 0x1b0   :  { %v4428_v4 = vadd.f32 %v4420_v61, %v4318_v37  ;;  %v4464_v18 = vrot.slane %v4448_v24, %v5571_v6  ;;  %v4471_v59 = vrot.slane %v4455_v43, %v5571_v6  ;;  %v4478_v60 = vrot.slane %v4456_v52, %v5571_v6 }
 0x1b1   :  { %v4425_v62 = vmul.f32 %v4403_v47, %v6817_v49  ;;  %v4426_v31 = vmul.f32 %v4407_v9, %v6817_v49  ;;  %v4432_v11 = vadd.f32 %v4424_v23, %v4322_v21  ;;  %v4485_v19 = vrot.slane %v4457_v0, %v5571_v6 }
 0x1b2   :  { %v4486_v39 = vcombine.high %v4464_v18, %v4464_v18  ;;  %v4487_v34 = vcombine.high %v4471_v59, %v4471_v59  ;;  %v4488_v29 = vcombine.high %v4478_v60, %v4478_v60  ;;  %v4493_v58 = vrot.slane %v4464_v18, %v5582_v28 }
 0x1b3   :  { %v4423_v37 = vmul.f32 %v4395_v35, %v6817_v49  ;;  %v4427_v25 = vmul.f32 %v4411_v56, %v6817_v49  ;;  %v4489_v40 = vcombine.high %v4485_v19, %v4485_v19  ;;  %v4497_v10 = vrot.slane %v4478_v60, %v5582_v28 }
 0x1b4   :  { %v4501_v32 = vrot.slane %v4486_v39, %v5582_v28  ;;  %v4509_v8 = vrot.slane %v4471_v59, %v5582_v28  ;;  %v4513_v22 = vrot.slane %v4485_v19, %v5582_v28  ;;  %v4549_v44 = vmax.f32 %v4548_v45, 0.0 }
 0x1b5   :  { %v4429_v26 = vadd.f32 %v4421_v15, %v4319_v48  ;;  %v4430_v27 = vadd.f32 %v4422_v12, %v4320_v5  ;;  %v4505_v21 = vrot.slane %v4488_v29, %v5582_v28  ;;  %v5376_v30 = vadd.f32 -10.0, %v5591_v42 }
 0x1b6   :  { %v4433_v63 = vadd.f32 %v4425_v62, %v4323_v46  ;;  %v4517_v7 = vrot.slane %v4487_v34, %v5582_v28  ;;  %v4521_v49 = vrot.slane %v4489_v40, %v5582_v28  ;;  %v4530_v53 = vmul.f32 %v4493_v58, %v6820_v54 }
 0x1b7   :  { %v4431_v17 = vadd.f32 %v4423_v37, %v4321_v57  ;;  %v4434_v24 = vadd.f32 %v4426_v31, %v4324_v36  ;;  %v4435_v20 = vadd.f32 %v4427_v25, %v4325_v2  ;;  %v4531_v1 = vmul.f32 %v4497_v10, %v6820_v54 }
 0x1b8   :  { %v4532_v50 = vmul.f32 %v4501_v32, %v6820_v54  ;;  %v4534_v48 = vmul.f32 %v4509_v8, %v6820_v54  ;;  %v4535_v55 = vmul.f32 %v4513_v22, %v6820_v54  ;;  %v4551_v43 = vcombine.high %v4549_v44, %v4549_v44 }
 0x1b9   :  { %v4533_v5 = vmul.f32 %v4505_v21, %v6820_v54  ;;  %v4558_v46 = vrot.slane %v4549_v44, %v5571_v6  ;;  %v4657_v61 = vand.u32 2147483647, %v5376_v30  ;;  %v5377_v47 = vadd.f32 -11.0, %v5591_v42 }
 0x1ba   :  { %v4536_v57 = vmul.f32 %v4517_v7, %v6820_v54  ;;  %v4537_v36 = vmul.f32 %v4521_v49, %v6820_v54  ;;  %v4538_v9 = vadd.f32 %v4530_v53, %v4428_v4  ;;  %v4565_v23 = vrot.slane %v4551_v43, %v5571_v6 }
 0x1bb   :  { %v4539_v2 = vadd.f32 %v4531_v1, %v4429_v26  ;;  %v4566_v35 = vcombine.high %v4558_v46, %v4558_v46  ;;  %v4574_v52 = vrot.slane %v4558_v46, %v5571_v6  ;;  %v4658_v45 = vsub.f32 1.0, %v4657_v61 }
 0x1bc   :  { %v4542_v56 = vadd.f32 %v4534_v48, %v4432_v11  ;;  %v7076_v15 = vadd.f32 %v4535_v55, %v4433_v63  ;;  %v4567_v12 = vcombine.high %v4565_v23, %v4565_v23  ;;  %v4581_v0 = vrot.slane %v4565_v23, %v5571_v6 }
 0x1bd   :  { %v4588_v18 = vrot.slane %v4566_v35, %v5571_v6  ;;  %v4596_v59 = vcombine.high %v4574_v52, %v4574_v52  ;;  %v4603_v60 = vrot.slane %v4574_v52, %v5582_v28  ;;  %v4767_v54 = vand.u32 2147483647, %v5377_v47 }
 0x1be   :  { %v4540_v4 = vadd.f32 %v4532_v50, %v4430_v27  ;;  %v4595_v62 = vrot.slane %v4567_v12, %v5571_v6  ;;  %v4597_v31 = vcombine.high %v4581_v0, %v4581_v0  ;;  %v4619_v19 = vrot.slane %v4581_v0, %v5582_v28 }
 0x1bf   :  { %v4598_v39 = vcombine.high %v4588_v18, %v4588_v18  ;;  %v4659_v34 = vmax.f32 %v4658_v45, 0.0  ;;  %v5378_v11 = vadd.f32 -12.0, %v5591_v42  ;;  %v5379_v29 = vadd.f32 -13.0, %v5591_v42 }
 0x1c0   :  { %v4541_v58 = vadd.f32 %v4533_v5, %v4431_v17  ;;  %v4607_v37 = vrot.slane %v4588_v18, %v5582_v28  ;;  %v4611_v25 = vrot.slane %v4596_v59, %v5582_v28  ;;  %v4640_v40 = vmul.f32 %v4603_v60, %v6823_v3 }
 0x1c1   :  { %v4544_v10 = vadd.f32 %v4536_v57, %v4434_v24  ;;  %v4599_v32 = vcombine.high %v4595_v62, %v4595_v62  ;;  %v4623_v8 = vrot.slane %v4595_v62, %v5582_v28  ;;  %v4768_v22 = vsub.f32 1.0, %v4767_v54 }
 0x1c2   :  { %v4545_v44 = vadd.f32 %v4537_v36, %v4435_v20  ;;  %v4627_v26 = vrot.slane %v4597_v31, %v5582_v28  ;;  %v4644_v27 = vmul.f32 %v4619_v19, %v6823_v3  ;;  %v7092_v21 = vadd.f32 -14.0, %v5591_v42 }
 0x1c3   :  { %v4615_v30 = vrot.slane %v4598_v39, %v5582_v28  ;;  %v4661_v63 = vcombine.high %v4659_v34, %v4659_v34  ;;  %v4877_v7 = vand.u32 2147483647, %v5378_v11  ;;  %v4987_v49 = vand.u32 2147483647, %v5379_v29 }
 0x1c4   :  { %v4641_v53 = vmul.f32 %v4607_v37, %v6823_v3  ;;  %v4642_v17 = vmul.f32 %v4611_v25, %v6823_v3  ;;  %v4648_v24 = vadd.f32 %v4640_v40, %v4538_v9  ;;  %v4668_v1 = vrot.slane %v4659_v34, %v5571_v6 }
 0x1c5   :  { %v4631_v20 = vrot.slane %v4599_v32, %v5582_v28  ;;  %v4645_v50 = vmul.f32 %v4623_v8, %v6823_v3  ;;  %v4675_v48 = vrot.slane %v4661_v63, %v5571_v6  ;;  %v4769_v55 = vmax.f32 %v4768_v22, 0.0 }
 0x1c6   :  { %v4646_v43 = vmul.f32 %v4627_v26, %v6823_v3  ;;  %v4652_v5 = vadd.f32 %v4644_v27, %v4542_v56  ;;  %v4676_v46 = vcombine.high %v4668_v1, %v4668_v1  ;;  %v4684_v61 = vrot.slane %v4668_v1, %v5571_v6 }
 0x1c7   :  { %v4643_v47 = vmul.f32 %v4615_v30, %v6823_v3  ;;  %v4677_v57 = vcombine.high %v4675_v48, %v4675_v48  ;;  %v4691_v36 = vrot.slane %v4675_v48, %v5571_v6  ;;  %v4771_v9 = vcombine.high %v4769_v55, %v4769_v55 }
 0x1c8   :  { %v4649_v23 = vadd.f32 %v4641_v53, %v4539_v2  ;;  %v4698_v35 = vrot.slane %v4676_v46, %v5571_v6  ;;  %v4706_v52 = vcombine.high %v4684_v61, %v4684_v61  ;;  %v4713_v45 = vrot.slane %v4684_v61, %v5582_v28 }
 0x1c9   :  { %v4647_v12 = vmul.f32 %v4631_v20, %v6823_v3  ;;  %v4705_v0 = vrot.slane %v4677_v57, %v5571_v6  ;;  %v4707_v56 = vcombine.high %v4691_v36, %v4691_v36  ;;  %v4729_v18 = vrot.slane %v4691_v36, %v5582_v28 }
 0x1ca   :  { %v4650_v59 = vadd.f32 %v4642_v17, %v4540_v4  ;;  %v4708_v60 = vcombine.high %v4698_v35, %v4698_v35  ;;  %v4778_v54 = vrot.slane %v4769_v55, %v5571_v6  ;;  %v4878_v62 = vsub.f32 1.0, %v4877_v7 }
 0x1cb   :  { %v4709_v31 = vcombine.high %v4705_v0, %v4705_v0  ;;  %v4717_v2 = vrot.slane %v4698_v35, %v5582_v28  ;;  %v4721_v19 = vrot.slane %v4706_v52, %v5582_v28  ;;  %v4785_v39 = vrot.slane %v4771_v9, %v5571_v6 }
 0x1cc   :  { %v4651_v34 = vadd.f32 %v4643_v47, %v4541_v58  ;;  %v4653_v3 = vadd.f32 %v4645_v50, %v7076_v15  ;;  %v4654_v11 = vadd.f32 %v4646_v43, %v4544_v10  ;;  %v4750_v29 = vmul.f32 %v4713_v45, %v6826_v41 }
 0x1cd   :  { %v4655_v37 = vadd.f32 %v4647_v12, %v4545_v44  ;;  %v4733_v4 = vrot.slane %v4705_v0, %v5582_v28  ;;  %v4737_v25 = vrot.slane %v4707_v56, %v5582_v28  ;;  %v4754_v40 = vmul.f32 %v4729_v18, %v6826_v41 }
 0x1ce   :  { %v4725_v32 = vrot.slane %v4708_v60, %v5582_v28  ;;  %v4786_v8 = vcombine.high %v4778_v54, %v4778_v54  ;;  %v4879_v22 = vmax.f32 %v4878_v62, 0.0  ;;  %v4988_v26 = vsub.f32 1.0, %v4987_v49 }
 0x1cf   :  { %v4741_v27 = vrot.slane %v4709_v31, %v5582_v28  ;;  %v4751_v58 = vmul.f32 %v4717_v2, %v6826_v41  ;;  %v4752_v15 = vmul.f32 %v4721_v19, %v6826_v41  ;;  %v4787_v10 = vcombine.high %v4785_v39, %v4785_v39 }
 0x1d0   :  { %v4758_v30 = vadd.f32 %v4750_v29, %v4648_v24  ;;  %v4794_v44 = vrot.slane %v4778_v54, %v5571_v6  ;;  %v4801_v63 = vrot.slane %v4785_v39, %v5571_v6  ;;  %v4808_v7 = vrot.slane %v4786_v8, %v5571_v6 }
 0x1d1   :  { %v4755_v53 = vmul.f32 %v4733_v4, %v6826_v41  ;;  %v4756_v17 = vmul.f32 %v4737_v25, %v6826_v41  ;;  %v4762_v1 = vadd.f32 %v4754_v40, %v4652_v5  ;;  %v4815_v49 = vrot.slane %v4787_v10, %v5571_v6 }
 0x1d2   :  { %v4816_v20 = vcombine.high %v4794_v44, %v4794_v44  ;;  %v4817_v50 = vcombine.high %v4801_v63, %v4801_v63  ;;  %v4818_v48 = vcombine.high %v4808_v7, %v4808_v7  ;;  %v4823_v55 = vrot.slane %v4794_v44, %v5582_v28 }
 0x1d3   :  { %v4753_v24 = vmul.f32 %v4725_v32, %v6826_v41  ;;  %v4757_v43 = vmul.f32 %v4741_v27, %v6826_v41  ;;  %v4819_v46 = vcombine.high %v4815_v49, %v4815_v49  ;;  %v4827_v61 = vrot.slane %v4808_v7, %v5582_v28 }
 0x1d4   :  { %v4831_v47 = vrot.slane %v4816_v20, %v5582_v28  ;;  %v4839_v57 = vrot.slane %v4801_v63, %v5582_v28  ;;  %v4843_v5 = vrot.slane %v4815_v49, %v5582_v28  ;;  %v4881_v36 = vcombine.high %v4879_v22, %v4879_v22 }
 0x1d5   :  { %v4759_v9 = vadd.f32 %v4751_v58, %v4649_v23  ;;  %v4760_v35 = vadd.f32 %v4752_v15, %v4650_v59  ;;  %v4835_v52 = vrot.slane %v4818_v48, %v5582_v28  ;;  %v4888_v45 = vrot.slane %v4879_v22, %v5571_v6 }
 0x1d6   :  { %v4763_v12 = vadd.f32 %v4755_v53, %v4653_v3  ;;  %v4764_v0 = vadd.f32 %v4756_v17, %v4654_v11  ;;  %v4847_v41 = vrot.slane %v4817_v50, %v5582_v28  ;;  %v4860_v56 = vmul.f32 %v4823_v55, %v6829_v51 }
 0x1d7   :  { %v4761_v18 = vadd.f32 %v4753_v24, %v4651_v34  ;;  %v4765_v60 = vadd.f32 %v4757_v43, %v4655_v37  ;;  %v4851_v54 = vrot.slane %v4819_v46, %v5582_v28  ;;  %v4861_v62 = vmul.f32 %v4827_v61, %v6829_v51 }
 0x1d8   :  { %v4862_v31 = vmul.f32 %v4831_v47, %v6829_v51  ;;  %v4864_v23 = vmul.f32 %v4839_v57, %v6829_v51  ;;  %v4865_v59 = vmul.f32 %v4843_v5, %v6829_v51  ;;  %v4895_v2 = vrot.slane %v4881_v36, %v5571_v6 }
 0x1d9   :  { %v4863_v19 = vmul.f32 %v4835_v52, %v6829_v51  ;;  %v4896_v39 = vcombine.high %v4888_v45, %v4888_v45  ;;  %v4904_v3 = vrot.slane %v4888_v45, %v5571_v6  ;;  %v4989_v11 = vmax.f32 %v4988_v26, 0.0 }
 0x1da   :  { %v4866_v34 = vmul.f32 %v4847_v41, %v6829_v51  ;;  %v4868_v29 = vadd.f32 %v4860_v56, %v4758_v30  ;;  %v4897_v37 = vcombine.high %v4895_v2, %v4895_v2  ;;  %v4911_v4 = vrot.slane %v4895_v2, %v5571_v6 }
 0x1db   :  { %v4867_v25 = vmul.f32 %v4851_v54, %v6829_v51  ;;  %v4918_v40 = vrot.slane %v4896_v39, %v5571_v6  ;;  %v4926_v32 = vcombine.high %v4904_v3, %v4904_v3  ;;  %v4933_v8 = vrot.slane %v4904_v3, %v5582_v28 }
 0x1dc   :  { %v4869_v22 = vadd.f32 %v4861_v62, %v4759_v9  ;;  %v4872_v27 = vadd.f32 %v4864_v23, %v4762_v1  ;;  %v4925_v58 = vrot.slane %v4897_v37, %v5571_v6  ;;  %v4927_v15 = vcombine.high %v4911_v4, %v4911_v4 }
 0x1dd   :  { %v4873_v10 = vadd.f32 %v4865_v59, %v4763_v12  ;;  %v4928_v26 = vcombine.high %v4918_v40, %v4918_v40  ;;  %v4949_v44 = vrot.slane %v4911_v4, %v5582_v28  ;;  %v4991_v30 = vcombine.high %v4989_v11, %v4989_v11 }
 0x1de   :  { %v4937_v63 = vrot.slane %v4918_v40, %v5582_v28  ;;  %v4941_v7 = vrot.slane %v4926_v32, %v5582_v28  ;;  %v4970_v51 = vmul.f32 %v4933_v8, %v6834_v38  ;;  %v4998_v53 = vrot.slane %v4989_v11, %v5571_v6 }
 0x1df   :  { %v4870_v17 = vadd.f32 %v4862_v31, %v4760_v35  ;;  %v4871_v49 = vadd.f32 %v4863_v19, %v4761_v18  ;;  %v4874_v20 = vadd.f32 %v4866_v34, %v4764_v0  ;;  %v4929_v1 = vcombine.high %v4925_v58, %v4925_v58 }
 0x1e0   :  { %v4875_v50 = vadd.f32 %v4867_v25, %v4765_v60  ;;  %v4953_v48 = vrot.slane %v4925_v58, %v5582_v28  ;;  %v4957_v55 = vrot.slane %v4927_v15, %v5582_v28  ;;  %v5097_v24 = vand.u32 2147483647, %v7092_v21 }
 0x1e1   :  { %v4945_v43 = vrot.slane %v4928_v26, %v5582_v28  ;;  %v4974_v46 = vmul.f32 %v4949_v44, %v6834_v38  ;;  %v5005_v61 = vrot.slane %v4991_v30, %v5571_v6  ;;  %v5381_v47 = vadd.f32 -15.0, %v5591_v42 }
 0x1e2   :  { %v4971_v57 = vmul.f32 %v4937_v63, %v6834_v38  ;;  %v4972_v5 = vmul.f32 %v4941_v7, %v6834_v38  ;;  %v4978_v36 = vadd.f32 %v4970_v51, %v4868_v29  ;;  %v5006_v9 = vcombine.high %v4998_v53, %v4998_v53 }
 0x1e3   :  { %v4961_v35 = vrot.slane %v4929_v1, %v5582_v28  ;;  %v5007_v52 = vcombine.high %v5005_v61, %v5005_v61  ;;  %v5014_v45 = vrot.slane %v4998_v53, %v5571_v6  ;;  %v5021_v21 = vrot.slane %v5005_v61, %v5571_v6 }
 0x1e4   :  { %v4975_v12 = vmul.f32 %v4953_v48, %v6834_v38  ;;  %v4976_v0 = vmul.f32 %v4957_v55, %v6834_v38  ;;  %v5028_v41 = vrot.slane %v5006_v9, %v5571_v6  ;;  %v5098_v42 = vsub.f32 1.0, %v5097_v24 }
 0x1e5   :  { %v5035_v56 = vrot.slane %v5007_v52, %v5571_v6  ;;  %v5036_v18 = vcombine.high %v5014_v45, %v5014_v45  ;;  %v5037_v60 = vcombine.high %v5021_v21, %v5021_v21  ;;  %v5043_v54 = vrot.slane %v5014_v45, %v5582_v28 }
 0x1e6   :  { %v4973_v62 = vmul.f32 %v4945_v43, %v6834_v38  ;;  %v4982_v31 = vadd.f32 %v4974_v46, %v4872_v27  ;;  %v5038_v23 = vcombine.high %v5028_v41, %v5028_v41  ;;  %v5047_v59 = vrot.slane %v5028_v41, %v5582_v28 }
 0x1e7   :  { %v5039_v2 = vcombine.high %v5035_v56, %v5035_v56  ;;  %v5051_v19 = vrot.slane %v5036_v18, %v5582_v28  ;;  %v5059_v39 = vrot.slane %v5021_v21, %v5582_v28  ;;  %v5063_v3 = vrot.slane %v5035_v56, %v5582_v28 }
 0x1e8   :  { %v4977_v11 = vmul.f32 %v4961_v35, %v6834_v38  ;;  %v4979_v34 = vadd.f32 %v4971_v57, %v4869_v22  ;;  %v5099_v29 = vmax.f32 %v5098_v42, 0.0  ;;  %v5207_v37 = vand.u32 2147483647, %v5381_v47 }
 0x1e9   :  { %v5055_v4 = vrot.slane %v5038_v23, %v5582_v28  ;;  %v5067_v25 = vrot.slane %v5037_v60, %v5582_v28  ;;  %v5080_v40 = vmul.f32 %v5043_v54, %v6837_v13  ;;  %v5081_v32 = vmul.f32 %v5047_v59, %v6837_v13 }
 0x1ea   :  { %v4980_v8 = vadd.f32 %v4972_v5, %v4870_v17  ;;  %v4981_v27 = vadd.f32 %v4973_v62, %v4871_v49  ;;  %v4983_v58 = vadd.f32 %v4975_v12, %v4873_v10  ;;  %v4984_v15 = vadd.f32 %v4976_v0, %v4874_v20 }
 0x1eb   :  { %v5071_v26 = vrot.slane %v5039_v2, %v5582_v28  ;;  %v5082_v44 = vmul.f32 %v5051_v19, %v6837_v13  ;;  %v5084_v38 = vmul.f32 %v5059_v39, %v6837_v13  ;;  %v5085_v22 = vmul.f32 %v5063_v3, %v6837_v13 }
 0x1ec   :  { %v4985_v30 = vadd.f32 %v4977_v11, %v4875_v50  ;;  %v5101_v63 = vcombine.high %v5099_v29, %v5099_v29  ;;  %v5108_v7 = vrot.slane %v5099_v29, %v5571_v6  ;;  %v5208_v51 = vsub.f32 1.0, %v5207_v37 }
 0x1ed   :  { %v5083_v53 = vmul.f32 %v5055_v4, %v6837_v13  ;;  %v5086_v17 = vmul.f32 %v5067_v25, %v6837_v13  ;;  %v5088_v49 = vadd.f32 %v5080_v40, %v4978_v36  ;;  %v5089_v10 = vadd.f32 %v5081_v32, %v4979_v34 }
 0x1ee   :  { %v5115_v20 = vrot.slane %v5101_v63, %v5571_v6  ;;  %v5116_v1 = vcombine.high %v5108_v7, %v5108_v7  ;;  %v5124_v48 = vrot.slane %v5108_v7, %v5571_v6  ;;  %v5209_v55 = vmax.f32 %v5208_v51, 0.0 }
 0x1ef   :  { %v5087_v24 = vmul.f32 %v5071_v26, %v6837_v13  ;;  %v5090_v43 = vadd.f32 %v5082_v44, %v4980_v8  ;;  %v5092_v50 = vadd.f32 %v5084_v38, %v4982_v31  ;;  %v5093_v46 = vadd.f32 %v5085_v22, %v4983_v58 }
 0x1f0   :  { %v5117_v61 = vcombine.high %v5115_v20, %v5115_v20  ;;  %v5131_v47 = vrot.slane %v5115_v20, %v5571_v6  ;;  %v5138_v57 = vrot.slane %v5116_v1, %v5571_v6  ;;  %v5146_v5 = vcombine.high %v5124_v48, %v5124_v48 }
 0x1f1   :  { %v5091_v9 = vadd.f32 %v5083_v53, %v4981_v27  ;;  %v5094_v36 = vadd.f32 %v5086_v17, %v4984_v15  ;;  %v5153_v35 = vrot.slane %v5124_v48, %v5582_v28  ;;  %v5211_v52 = vcombine.high %v5209_v55, %v5209_v55 }
 0x1f2   :  { %v5145_v45 = vrot.slane %v5117_v61, %v5571_v6  ;;  %v5147_v21 = vcombine.high %v5131_v47, %v5131_v47  ;;  %v5148_v12 = vcombine.high %v5138_v57, %v5138_v57  ;;  %v5157_v13 = vrot.slane %v5138_v57, %v5582_v28 }
 0x1f3   :  { %v5161_v0 = vrot.slane %v5146_v5, %v5582_v28  ;;  %v5169_v41 = vrot.slane %v5131_v47, %v5582_v28  ;;  %v5190_v42 = vmul.f32 %v5153_v35, %v6845_v16  ;;  %v5218_v56 = vrot.slane %v5209_v55, %v5571_v6 }
 0x1f4   :  { %v5149_v18 = vcombine.high %v5145_v45, %v5145_v45  ;;  %v5165_v60 = vrot.slane %v5148_v12, %v5582_v28  ;;  %v5173_v54 = vrot.slane %v5145_v45, %v5582_v28  ;;  %v5177_v62 = vrot.slane %v5147_v21, %v5582_v28 }
 0x1f5   :  { %v5191_v31 = vmul.f32 %v5157_v13, %v6845_v16  ;;  %v5192_v23 = vmul.f32 %v5161_v0, %v6845_v16  ;;  %v5194_v59 = vmul.f32 %v5169_v41, %v6845_v16  ;;  %v5225_v2 = vrot.slane %v5211_v52, %v5571_v6 }
 0x1f6   :  { %v5181_v19 = vrot.slane %v5149_v18, %v5582_v28  ;;  %v5193_v39 = vmul.f32 %v5165_v60, %v6845_v16  ;;  %v5195_v3 = vmul.f32 %v5173_v54, %v6845_v16  ;;  %v5196_v11 = vmul.f32 %v5177_v62, %v6845_v16 }
 0x1f7   :  { %v3556_v34 = vadd.f32 %v6792_v33, %v6764_v14  ;;  %v5095_v29 = vadd.f32 %v5087_v24, %v4985_v30  ;;  %v5226_v37 = vcombine.high %v5218_v56, %v5218_v56  ;;  %v5198_v25 = vadd.f32 %v5190_v42, %v5088_v49 }
 0x1f8   :  { %v5197_v4 = vmul.f32 %v5181_v19, %v6845_v16  ;;  %v5199_v40 = vadd.f32 %v5191_v31, %v5089_v10  ;;  %v5200_v32 = vadd.f32 %v5192_v23, %v5090_v43  ;;  %v5227_v8 = vcombine.high %v5225_v2, %v5225_v2 }
 0x1f9   :  { %v5234_v27 = vrot.slane %v5218_v56, %v5571_v6  ;;  %v5241_v58 = vrot.slane %v5225_v2, %v5571_v6  ;;  %v5248_v15 = vrot.slane %v5226_v37, %v5571_v6  ;;  %v5201_v26 = vadd.f32 %v5193_v39, %v5091_v9 }
 0x1fa   :  { %v5202_v44 = vadd.f32 %v5194_v59, %v5092_v50  ;;  %v5203_v38 = vadd.f32 %v5195_v3, %v5093_v46  ;;  %v5204_v22 = vadd.f32 %v5196_v11, %v5094_v36  ;;  %v5255_v14 = vrot.slane %v5227_v8, %v5571_v6 }
 0x1fb   :  { %v5256_v33 = vcombine.high %v5234_v27, %v5234_v27  ;;  %v5257_v30 = vcombine.high %v5241_v58, %v5241_v58  ;;  %v5258_v63 = vcombine.high %v5248_v15, %v5248_v15  ;;  %v5205_v16 = vadd.f32 %v5197_v4, %v5095_v29 }
 0x1fc   :  { %v5263_v7 = vrot.slane %v5234_v27, %v5582_v28  ;;  %v5267_v51 = vrot.slane %v5248_v15, %v5582_v28  ;;  %v5279_v53 = vrot.slane %v5241_v58, %v5582_v28  ;;  %v5259_v17 = vcombine.high %v5255_v14, %v5255_v14 }
 0x1fd   :  { %v5271_v49 = vrot.slane %v5256_v33, %v5582_v28  ;;  %v5275_v10 = vrot.slane %v5258_v63, %v5582_v28  ;;  %v5283_v20 = vrot.slane %v5255_v14, %v5582_v28  ;;  %v5287_v1 = vrot.slane %v5257_v30, %v5582_v28 }
 0x1fe   :  { %v5300_v6 = vmul.f32 %v5263_v7, %v3556_v34  ;;  %v5301_v48 = vmul.f32 %v5267_v51, %v3556_v34  ;;  %v5304_v55 = vmul.f32 %v5279_v53, %v3556_v34  ;;  %v5291_v24 = vrot.slane %v5259_v17, %v5582_v28 }
 0x1ff   :  { %v5302_v43 = vmul.f32 %v5271_v49, %v3556_v34  ;;  %v5303_v50 = vmul.f32 %v5275_v10, %v3556_v34  ;;  %v5305_v46 = vmul.f32 %v5283_v20, %v3556_v34  ;;  %v5306_v61 = vmul.f32 %v5287_v1, %v3556_v34 }
 0x200   :  { %v5308_v47 = vadd.f32 %v5300_v6, %v5198_v25  ;;  %v5309_v57 = vadd.f32 %v5301_v48, %v5199_v40  ;;  %v5312_v5 = vadd.f32 %v5304_v55, %v5202_v44  ;;  %v5307_v9 = vmul.f32 %v5291_v24, %v3556_v34 }
 0x201   :  { %v5310_v36 = vadd.f32 %v5302_v43, %v5200_v32  ;;  %v5311_v35 = vadd.f32 %v5303_v50, %v5201_v26  ;;  %v5313_v52 = vadd.f32 %v5305_v46, %v5203_v38  ;;  %v5314_v45 = vadd.f32 %v5306_v61, %v5204_v22 }
 0x202   :  { %v5384_v21 = vcvt.f32.s32 %v5308_v47  ;;  %v5387_v12 = vcvt.f32.s32 %v5309_v57  ;;  %v5396_v13 = vcvt.f32.s32 %v5312_v5  ;;  %v5315_v0 = vadd.f32 %v5307_v9, %v5205_v16 }
 0x203   :  { %v5390_v41 = vcvt.f32.s32 %v5310_v36  ;;  %v5393_v28 = vcvt.f32.s32 %v5311_v35  ;;  %v5399_v42 = vcvt.f32.s32 %v5313_v52  ;;  %v5402_v56 = vcvt.f32.s32 %v5314_v45 }
 0x204   :  { %5324 = vst [vmem:[#allocation7] sm:$0xff] %v5384_v21  ;;  %5325 = vst [vmem:[#allocation7 + $0x8] sm:$0xff] %v5387_v12  ;;  %v5405_v18 = vcvt.f32.s32 %v5315_v0 }
 0x205   :  { %5328 = vst [vmem:[#allocation7 + $0x20] sm:$0xff] %v5396_v13  ;;  %5326 = vst [vmem:[#allocation7 + $0x10] sm:$0xff] %v5390_v41 }
 0x206   :  { %5327 = vst [vmem:[#allocation7 + $0x18] sm:$0xff] %v5393_v28  ;;  %5329 = vst [vmem:[#allocation7 + $0x28] sm:$0xff] %v5399_v42 }
 0x207   :  { %5330 = vst [vmem:[#allocation7 + $0x30] sm:$0xff] %v5402_v56  ;;  %5331 = vst [vmem:[#allocation7 + $0x38] sm:$0xff] %v5405_v18 }
 0x208   :  { %5499 = shalt.err (!%p5496_p6)
}
 0x209   :  { %s5500_s10 = scalar_lea.hbm %s7248_s2, 1024 }
 0x20a   :  { %p5501_p7 = scmp.ne.s32.totalorder %s7248_s2, %s5500_s10  ;;  %p5504_p8 = scmp.lt.u32.totalorder %s5500_s10, %s7248_s2 }
 0x20c   :  { %p5506_p9 = pnand %p5504_p8, %p5501_p7 }
 0x20e   :  { %5509 = shalt.err (!%p5506_p9)
}
 0x20f   :  { %5343 = dma.vmem_to_hbm [thread:$0]  %s5338_s6, 1024, %s7248_s2, [#allocation4], %s5518_s0, %s5518_s0, %s5519_s3  }
 0x210   :  { %5514 = dma.done.wait [#allocation4], 1024  }
 0x211   :  { %5515 = vsyncadd [#allocation4], 4294966272 }
 0x212   :  { %5347 = vsyncpa [#allocation3], 1 }
 0x213   :  { %5348 = vsyncpa [#allocation6], 1 }
 0x214   :  { %5349 = vsyncpa [#allocation4], 1 }

</bundles_post_ra>
